<compile_context>
chip_gen: v7x
topology: tpu7x:2x2x1
jax: 0.10.0
libtpu: 0.0.40
codegen_flags: <defaults>
</compile_context>

<pallas_src>
import functools

import jax
import jax.numpy as jnp
from jax.experimental import pallas as pl
from jax.experimental.pallas import tpu as pltpu


def _attention_kernel(x_ref, wqkv_ref, wout_ref, bout_ref, o_ref,
                      qn_sc, kn_sc, v_sc, *, heads, dim_head, scale):
    """
    Grid: (batch, n_query_tiles) -- one batch element, one query tile per step.
      x_ref    : (1, c, n)   f32   full sequence for this batch element
      wqkv_ref : (3H, c)     bf16  Conv1d(1x1) weight (no bias)
      wout_ref : (c, H)      bf16  Conv1d(1x1) weight
      bout_ref : (c, 1)      f32   Conv1d bias
      o_ref    : (1, c, tq)  f32   output tile
      qn_sc/kn_sc/v_sc : (heads, dim_head, n) bf16 scratch, resident across query tiles
    """
    n = x_ref.shape[2]
    tq = o_ref.shape[2]
    hidden = heads * dim_head
    qi = pl.program_id(1)

    # ---- once per batch element: full-sequence QKV projection + l2 norm (over n) ----
    @pl.when(qi == 0)
    def _project_and_normalize():
        x = x_ref[0].astype(jnp.bfloat16)                                    # (c, n)
        qkv = jnp.dot(wqkv_ref[...], x,
                      preferred_element_type=jnp.float32)                    # (3H, n) f32
        q = qkv[0 * hidden:1 * hidden, :].reshape(heads, dim_head, n)
        k = qkv[1 * hidden:2 * hidden, :].reshape(heads, dim_head, n)
        v = qkv[2 * hidden:3 * hidden, :].reshape(heads, dim_head, n)

        eps = 1e-12
        q_nrm = jnp.sqrt(jnp.sum(q * q, axis=-1, keepdims=True))             # (h, d, 1)
        k_nrm = jnp.sqrt(jnp.sum(k * k, axis=-1, keepdims=True))
        # fold the attention scale into qn: O(n*d) multiplies instead of O(n^2)
        qn_sc[...] = (q * (scale / jnp.maximum(q_nrm, eps))).astype(jnp.bfloat16)
        kn_sc[...] = (k / jnp.maximum(k_nrm, eps)).astype(jnp.bfloat16)
        v_sc[...] = v.astype(jnp.bfloat16)

    # ---- every query tile: scores, softmax, weighted sum, output projection ----
    start = pl.multiple_of(qi * tq, tq)
    qs = qn_sc[:, :, pl.ds(start, tq)]                                       # (h, d, tq) bf16
    qs_t = jnp.swapaxes(qs, 1, 2)                                            # (h, tq, d)

    # sim[h, i, j] = sum_d qn[h, d, i] * kn[h, d, j]   (scale already folded into qn)
    sim = jnp.einsum('hqd,hdn->hqn', qs_t, kn_sc[...],
                     preferred_element_type=jnp.float32)                     # (h, tq, n) f32

    sim = sim - jnp.max(sim, axis=-1, keepdims=True)
    p = jnp.exp(sim)
    denom = jnp.sum(p, axis=-1, keepdims=True)
    attn = (p * pl.reciprocal(denom, approx=True)).astype(jnp.bfloat16)

    # out[h, d, i] = sum_j v[h, d, j] * attn[h, i, j]
    out = jnp.einsum('hdn,hqn->hdq', v_sc[...], attn,
                     preferred_element_type=jnp.float32)                     # (h, d, tq) f32

    # 'b h x d -> b (h d) x'  ==> output channel index = h * dim_head + d
    out = out.reshape(hidden, tq).astype(jnp.bfloat16)
    y = jnp.dot(wout_ref[...], out, preferred_element_type=jnp.float32)      # (c, tq)
    y = y + bout_ref[...]
    o_ref[0] = y.astype(o_ref.dtype)


def attention_forward(x_bcn, w_qkv, w_out, b_out, *, heads, dim_head, scale, tq=None):
    """x_bcn: (b, dim, n) as in the PyTorch module.  Returns (b, dim, n)."""
    b, c, n = x_bcn.shape
    hidden = heads * dim_head
    assert w_qkv.shape == (3 * hidden, c, 1)
    assert w_out.shape == (c, hidden, 1)
    assert b_out.shape == (c,)

    if tq is None:
        if n % 256 == 0 and n > 256:
            tq = 256
        elif n % 128 == 0:
            tq = 128
        else:
            tq = n
    assert n % tq == 0, "sequence length must be a multiple of the query tile"
    # TODO(synk): pad n up to a multiple of 128 to support ragged sequence lengths.

    x = x_bcn.astype(jnp.float32)
    wqkv = w_qkv[:, :, 0].astype(jnp.bfloat16)          # (3H, c)
    wout = w_out[:, :, 0].astype(jnp.bfloat16)          # (c, H)
    bout = b_out.reshape(c, 1).astype(jnp.float32)      # (c, 1)

    kernel = functools.partial(_attention_kernel, heads=heads,
                               dim_head=dim_head, scale=float(scale))

    out = pl.pallas_call(
        kernel,
        out_shape=jax.ShapeDtypeStruct((b, c, n), jnp.float32),
        grid_spec=pltpu.PrefetchScalarGridSpec(
            num_scalar_prefetch=0,
            grid=(b, n // tq),
            in_specs=[
                pl.BlockSpec((1, c, n), lambda bi, qi: (bi, 0, 0)),
                pl.BlockSpec((3 * hidden, c), lambda bi, qi: (0, 0)),
                pl.BlockSpec((c, hidden), lambda bi, qi: (0, 0)),
                pl.BlockSpec((c, 1), lambda bi, qi: (0, 0)),
            ],
            out_specs=pl.BlockSpec((1, c, tq), lambda bi, qi: (bi, 0, qi)),
            scratch_shapes=[
                pltpu.VMEM((heads, dim_head, n), jnp.bfloat16),   # qn * scale
                pltpu.VMEM((heads, dim_head, n), jnp.bfloat16),   # kn
                pltpu.VMEM((heads, dim_head, n), jnp.bfloat16),   # v
            ],
        ),
        compiler_params=pltpu.CompilerParams(
            # query-tile axis must be 'arbitrary': the per-batch scratch is filled at qi == 0
            dimension_semantics=("parallel", "arbitrary"),
            vmem_limit_bytes=64 * 1024 * 1024,
        ),
    )(x, wqkv, wout, bout)
    return out


def _reference_forward(x_bcn, w_qkv, w_out, b_out, *, heads, dim_head, scale):
    """Pure-JAX f32 reference mirroring the PyTorch forward exactly."""
    b, c, n = x_bcn.shape
    hidden = heads * dim_head
    qkv = jnp.einsum('oc,bcn->bon', w_qkv[:, :, 0], x_bcn)        # (b, 3H, n)
    q, k, v = jnp.split(qkv, 3, axis=1)

    def rearr(t):  # 'b (h c) x -> b h c x'
        return t.reshape(b, heads, dim_head, n)

    q, k, v = map(rearr, (q, k, v))

    def l2norm(t):  # F.normalize(dim=-1)
        nrm = jnp.sqrt(jnp.sum(t * t, axis=-1, keepdims=True))
        return t / jnp.maximum(nrm, 1e-12)

    q, k = l2norm(q), l2norm(k)
    sim = jnp.einsum('bhdi,bhdj->bhij', q, k) * scale
    attn = jax.nn.softmax(sim, axis=-1)
    out = jnp.einsum('bhij,bhdj->bhid', attn, v)                   # (b, h, n, d)
    out = jnp.transpose(out, (0, 1, 3, 2)).reshape(b, hidden, n)   # 'b h x d -> b (h d) x'
    y = jnp.einsum('oc,bcn->bon', w_out[:, :, 0], out) + b_out[None, :, None]
    return y


if __name__ == "__main__":
    # small, module-consistent shapes (exercises 2 batches x 2 query tiles)
    batch, dim, seq = 2, 32, 256
    heads, dim_head, scale = 4, 32, 10.0
    hidden = heads * dim_head

    key = jax.random.PRNGKey(0)
    kx, kq, kw, kb = jax.random.split(key, 4)

    x = jax.random.normal(kx, (batch, dim, seq), dtype=jnp.float32)
    # Conv1d weight shapes: (out_channels, in_channels, 1)
    w_qkv = 0.1 * jax.random.normal(kq, (hidden * 3, dim, 1), dtype=jnp.float32)
    w_out = 0.1 * jax.random.normal(kw, (dim, hidden, 1), dtype=jnp.float32)
    b_out = 0.1 * jax.random.normal(kb, (dim,), dtype=jnp.float32)

    y = attention_forward(x, w_qkv, w_out, b_out,
                          heads=heads, dim_head=dim_head, scale=scale, tq=128)
    y = jax.block_until_ready(y)

    y_ref = _reference_forward(x, w_qkv, w_out, b_out,
                               heads=heads, dim_head=dim_head, scale=scale)
    assert y.shape == (batch, dim, seq)
    # bf16 MXU inputs with f32 accumulation -> compare against the f32 reference loosely
    assert jnp.allclose(y, y_ref, rtol=2e-2, atol=2e-2), "mismatch vs reference"

    print("KERNEL_OK")
</pallas_src>

<mosaic_0001>
module attributes {stable_mosaic.version = 11 : i64} {
  func.func @_attention_kernel(%arg0: i32, %arg1: i32, %arg2: memref<1x32x256xf32, #tpu.memory_space<vmem>>, %arg3: memref<384x32xbf16, #tpu.memory_space<vmem>>, %arg4: memref<32x128xbf16, #tpu.memory_space<vmem>>, %arg5: memref<32x1xf32, #tpu.memory_space<vmem>>, %arg6: memref<1x32x128xf32, #tpu.memory_space<vmem>>, %arg7: memref<4x32x256xbf16, #tpu.memory_space<vmem>>, %arg8: memref<4x32x256xbf16, #tpu.memory_space<vmem>>, %arg9: memref<4x32x256xbf16, #tpu.memory_space<vmem>>) attributes {dimension_semantics = [#tpu.dimension_semantics<parallel>, #tpu.dimension_semantics<arbitrary>], iteration_bounds = array<i64: 2, 2>, scalar_prefetch = 0 : i64, scratch_operands = 3 : i64, tpu.core_type = #tpu.core_type<tc>, window_params = [{transform_indices = @transform_0, window_bounds = array<i64: 1, 32, 256>}, {pipeline_mode = #tpu.pipeline_mode<synchronous>, transform_indices = @transform_1, window_bounds = array<i64: 384, 32>}, {pipeline_mode = #tpu.pipeline_mode<synchronous>, transform_indices = @transform_2, window_bounds = array<i64: 32, 128>}, {pipeline_mode = #tpu.pipeline_mode<synchronous>, transform_indices = @transform_3, window_bounds = array<i64: 32, 1>}, {transform_indices = @transform_4, window_bounds = array<i64: 1, 32, 128>}]} {
    %c0_i32 = arith.constant 0 : i32
    %0 = arith.cmpi eq, %arg1, %c0_i32 : i32
    %1 = arith.extui %0 : i1 to i32
    %c0_i32_0 = arith.constant 0 : i32
    %2 = arith.cmpi ne, %1, %c0_i32_0 : i32
    scf.if %2 {
      %c0_19 = arith.constant 0 : index
      %c0_20 = arith.constant 0 : index
      %c0_21 = arith.constant 0 : index
      %33 = vector.load %arg2[%c0_19, %c0_20, %c0_21] : memref<1x32x256xf32, #tpu.memory_space<vmem>>, vector<1x32x256xf32>
      %34 = vector.shape_cast %33 : vector<1x32x256xf32> to vector<32x256xf32>
      %35 = arith.truncf %34 : vector<32x256xf32> to vector<32x256xbf16>
      %c0_22 = arith.constant 0 : index
      %c0_23 = arith.constant 0 : index
      %36 = vector.load %arg3[%c0_22, %c0_23] : memref<384x32xbf16, #tpu.memory_space<vmem>>, vector<384x32xbf16>
      %cst_24 = arith.constant dense<0.000000e+00> : vector<384x256xf32>
      %37 = tpu.matmul %36, %35, %cst_24 {dimension_numbers = #tpu.dot_dimension_numbers<[1], [0], [0], [1], [0, 0, 1, 1], [], []>} : vector<384x32xbf16>, vector<32x256xbf16>, vector<384x256xf32> -> vector<384x256xf32>
      %38 = vector.extract_strided_slice %37 {offsets = [0, 0], sizes = [128, 256], strides = [1, 1]} : vector<384x256xf32> to vector<128x256xf32>
      %39 = vector.shape_cast %38 : vector<128x256xf32> to vector<4x32x256xf32>
      %40 = vector.extract_strided_slice %37 {offsets = [128, 0], sizes = [128, 256], strides = [1, 1]} : vector<384x256xf32> to vector<128x256xf32>
      %41 = vector.shape_cast %40 : vector<128x256xf32> to vector<4x32x256xf32>
      %42 = vector.extract_strided_slice %37 {offsets = [256, 0], sizes = [128, 256], strides = [1, 1]} : vector<384x256xf32> to vector<128x256xf32>
      %43 = vector.shape_cast %42 : vector<128x256xf32> to vector<4x32x256xf32>
      %44 = arith.mulf %39, %39 : vector<4x32x256xf32>
      %cst_25 = arith.constant dense<0.000000e+00> : vector<4x32xf32>
      %45 = vector.multi_reduction <add>, %44, %cst_25 [2] : vector<4x32x256xf32> to vector<4x32xf32>
      %46 = vector.shape_cast %45 : vector<4x32xf32> to vector<4x32x1xf32>
      %47 = math.sqrt %46 : vector<4x32x1xf32>
      %48 = arith.mulf %41, %41 : vector<4x32x256xf32>
      %cst_26 = arith.constant dense<0.000000e+00> : vector<4x32xf32>
      %49 = vector.multi_reduction <add>, %48, %cst_26 [2] : vector<4x32x256xf32> to vector<4x32xf32>
      %50 = vector.shape_cast %49 : vector<4x32xf32> to vector<4x32x1xf32>
      %51 = math.sqrt %50 : vector<4x32x1xf32>
      %cst_27 = arith.constant 9.99999996E-13 : f32
      %52 = vector.broadcast %cst_27 : f32 to vector<4x32x1xf32>
      %53 = arith.maximumf %47, %52 : vector<4x32x1xf32>
      %cst_28 = arith.constant 1.000000e+01 : f32
      %54 = vector.broadcast %cst_28 : f32 to vector<4x32x1xf32>
      %55 = arith.divf %54, %53 : vector<4x32x1xf32>
      %56 = vector.broadcast %55 : vector<4x32x1xf32> to vector<4x32x256xf32>
      %57 = arith.mulf %39, %56 : vector<4x32x256xf32>
      %58 = arith.truncf %57 : vector<4x32x256xf32> to vector<4x32x256xbf16>
      %c0_29 = arith.constant 0 : index
      %c0_30 = arith.constant 0 : index
      %c0_31 = arith.constant 0 : index
      %59 = vector.load %arg7[%c0_29, %c0_30, %c0_31] : memref<4x32x256xbf16, #tpu.memory_space<vmem>>, vector<4x32x256xbf16>
      tpu.vector_store %arg7[%c0_29, %c0_30, %c0_31], %58 {strides = array<i32>} : memref<4x32x256xbf16, #tpu.memory_space<vmem>>, vector<4x32x256xbf16>,
      %cst_32 = arith.constant 9.99999996E-13 : f32
      %60 = vector.broadcast %cst_32 : f32 to vector<4x32x1xf32>
      %61 = arith.maximumf %51, %60 : vector<4x32x1xf32>
      %62 = vector.broadcast %61 : vector<4x32x1xf32> to vector<4x32x256xf32>
      %63 = arith.divf %41, %62 : vector<4x32x256xf32>
      %64 = arith.truncf %63 : vector<4x32x256xf32> to vector<4x32x256xbf16>
      %c0_33 = arith.constant 0 : index
      %c0_34 = arith.constant 0 : index
      %c0_35 = arith.constant 0 : index
      %65 = vector.load %arg8[%c0_33, %c0_34, %c0_35] : memref<4x32x256xbf16, #tpu.memory_space<vmem>>, vector<4x32x256xbf16>
      tpu.vector_store %arg8[%c0_33, %c0_34, %c0_35], %64 {strides = array<i32>} : memref<4x32x256xbf16, #tpu.memory_space<vmem>>, vector<4x32x256xbf16>,
      %66 = arith.truncf %43 : vector<4x32x256xf32> to vector<4x32x256xbf16>
      %c0_36 = arith.constant 0 : index
      %c0_37 = arith.constant 0 : index
      %c0_38 = arith.constant 0 : index
      %67 = vector.load %arg9[%c0_36, %c0_37, %c0_38] : memref<4x32x256xbf16, #tpu.memory_space<vmem>>, vector<4x32x256xbf16>
      tpu.vector_store %arg9[%c0_36, %c0_37, %c0_38], %66 {strides = array<i32>} : memref<4x32x256xbf16, #tpu.memory_space<vmem>>, vector<4x32x256xbf16>,
    } else {
    }
    %c128_i32 = arith.constant 128 : i32
    %3 = arith.muli %arg1, %c128_i32 : i32
    %4 = tpu.assume_multiple %3, 128 : i32
    %c0 = arith.constant 0 : index
    %c0_1 = arith.constant 0 : index
    %5 = arith.index_cast %4 : i32 to index
    %6 = vector.load %arg7[%c0, %c0_1, %5] : memref<4x32x256xbf16, #tpu.memory_space<vmem>>, vector<4x32x128xbf16>
    %7 = tpu.transpose %6, [0, 2, 1] : vector<4x32x128xbf16> -> vector<4x128x32xbf16>
    %c0_2 = arith.constant 0 : index
    %c0_3 = arith.constant 0 : index
    %c0_4 = arith.constant 0 : index
    %8 = vector.load %arg8[%c0_2, %c0_3, %c0_4] : memref<4x32x256xbf16, #tpu.memory_space<vmem>>, vector<4x32x256xbf16>
    "tpu.trace_start"() <{level = 10 : i32, message = "hqd,hdn->hqn"}> : () -> ()
    %cst = arith.constant dense<0.000000e+00> : vector<4x128x256xf32>
    %9 = tpu.matmul %7, %8, %cst {dimension_numbers = #tpu.dot_dimension_numbers<[2], [1], [1], [2], [0, 0, 0, 1, 1, 2], [0], [0]>} : vector<4x128x32xbf16>, vector<4x32x256xbf16>, vector<4x128x256xf32> -> vector<4x128x256xf32>
    "tpu.trace_stop"() : () -> ()
    %cst_5 = arith.constant dense<0xFF800000> : vector<4x128xf32>
    %10 = vector.multi_reduction <maximumf>, %9, %cst_5 [2] : vector<4x128x256xf32> to vector<4x128xf32>
    %11 = vector.shape_cast %10 : vector<4x128xf32> to vector<4x128x1xf32>
    %12 = vector.broadcast %11 : vector<4x128x1xf32> to vector<4x128x256xf32>
    %13 = arith.subf %9, %12 : vector<4x128x256xf32>
    %14 = math.exp %13 : vector<4x128x256xf32>
    %cst_6 = arith.constant dense<0.000000e+00> : vector<4x128xf32>
    %15 = vector.multi_reduction <add>, %14, %cst_6 [2] : vector<4x128x256xf32> to vector<4x128xf32>
    %16 = vector.shape_cast %15 : vector<4x128xf32> to vector<4x128x1xf32>
    %17 = tpu.reciprocal %16 {approx = true} : vector<4x128x1xf32> -> vector<4x128x1xf32>
    %18 = vector.broadcast %17 : vector<4x128x1xf32> to vector<4x128x256xf32>
    %19 = arith.mulf %14, %18 : vector<4x128x256xf32>
    %20 = arith.truncf %19 : vector<4x128x256xf32> to vector<4x128x256xbf16>
    %c0_7 = arith.constant 0 : index
    %c0_8 = arith.constant 0 : index
    %c0_9 = arith.constant 0 : index
    %21 = vector.load %arg9[%c0_7, %c0_8, %c0_9] : memref<4x32x256xbf16, #tpu.memory_space<vmem>>, vector<4x32x256xbf16>
    "tpu.trace_start"() <{level = 10 : i32, message = "hdn,hqn->hdq"}> : () -> ()
    %cst_10 = arith.constant dense<0.000000e+00> : vector<4x32x128xf32>
    %22 = tpu.matmul %21, %20, %cst_10 {dimension_numbers = #tpu.dot_dimension_numbers<[2], [2], [1], [1], [0, 0, 0, 1, 1, 1], [0], [0]>} : vector<4x32x256xbf16>, vector<4x128x256xbf16>, vector<4x32x128xf32> -> vector<4x32x128xf32>
    "tpu.trace_stop"() : () -> ()
    %23 = vector.shape_cast %22 : vector<4x32x128xf32> to vector<128x128xf32>
    %24 = arith.truncf %23 : vector<128x128xf32> to vector<128x128xbf16>
    %c0_11 = arith.constant 0 : index
    %c0_12 = arith.constant 0 : index
    %25 = vector.load %arg4[%c0_11, %c0_12] : memref<32x128xbf16, #tpu.memory_space<vmem>>, vector<32x128xbf16>
    %cst_13 = arith.constant dense<0.000000e+00> : vector<32x128xf32>
    %26 = tpu.matmul %25, %24, %cst_13 {dimension_numbers = #tpu.dot_dimension_numbers<[1], [0], [0], [1], [0, 0, 1, 1], [], []>} : vector<32x128xbf16>, vector<128x128xbf16>, vector<32x128xf32> -> vector<32x128xf32>
    %c0_14 = arith.constant 0 : index
    %c0_15 = arith.constant 0 : index
    %27 = vector.load %arg5[%c0_14, %c0_15] : memref<32x1xf32, #tpu.memory_space<vmem>>, vector<32x1xf32>
    %28 = vector.broadcast %27 : vector<32x1xf32> to vector<32x128xf32>
    %29 = arith.addf %26, %28 : vector<32x128xf32>
    %c0_16 = arith.constant 0 : index
    %c0_17 = arith.constant 0 : index
    %c0_18 = arith.constant 0 : index
    %30 = vector.load %arg6[%c0_16, %c0_17, %c0_18] : memref<1x32x128xf32, #tpu.memory_space<vmem>>, vector<1x32x128xf32>
    %31 = vector.shape_cast %30 : vector<1x32x128xf32> to vector<32x128xf32>
    %32 = vector.shape_cast %29 : vector<32x128xf32> to vector<1x32x128xf32>
    tpu.vector_store %arg6[%c0_16, %c0_17, %c0_18], %32 {strides = array<i32>} : memref<1x32x128xf32, #tpu.memory_space<vmem>>, vector<1x32x128xf32>,
    return
  }
  func.func @transform_0(%arg0: i32, %arg1: i32) -> (i32, i32, i32) {
    %c0_i32 = arith.constant 0 : i32
    %c0_i32_0 = arith.constant 0 : i32
    %c0_i32_1 = arith.constant 0 : i32
    return %arg0, %c0_i32, %c0_i32_0 : i32, i32, i32
  }
  func.func @transform_1(%arg0: i32, %arg1: i32) -> (i32, i32) {
    %c0_i32 = arith.constant 0 : i32
    %c0_i32_0 = arith.constant 0 : i32
    %c0_i32_1 = arith.constant 0 : i32
    return %c0_i32, %c0_i32_0 : i32, i32
  }
  func.func @transform_2(%arg0: i32, %arg1: i32) -> (i32, i32) {
    %c0_i32 = arith.constant 0 : i32
    %c0_i32_0 = arith.constant 0 : i32
    %c0_i32_1 = arith.constant 0 : i32
    return %c0_i32, %c0_i32_0 : i32, i32
  }
  func.func @transform_3(%arg0: i32, %arg1: i32) -> (i32, i32) {
    %c0_i32 = arith.constant 0 : i32
    %c0_i32_0 = arith.constant 0 : i32
    %c0_i32_1 = arith.constant 0 : i32
    return %c0_i32, %c0_i32_0 : i32, i32
  }
  func.func @transform_4(%arg0: i32, %arg1: i32) -> (i32, i32, i32) {
    %c0_i32 = arith.constant 0 : i32
    %c0_i32_0 = arith.constant 0 : i32
    return %arg0, %c0_i32, %arg1 : i32, i32, i32
  }
}

</mosaic_0001>

<bundles_post_ra>
// kernel: tpu_custom_call.1
= control target key start
LH: loop header
LB: loop body
LE: loop exit
PB: predicated region body
PF: predicated region fallthrough
CT: control target
= control target key end

     0   :  { %s6845_s0 = inlined_call_operand.hbm [shape: f32[2,32,256], index: 0, kind: input, shape index: {}]   ;;  %s6846_s1 = inlined_call_operand.hbm [shape: bf16[384,32], index: 1, kind: input, shape index: {}]   ;;  %s6847_s2 = inlined_call_operand.hbm [shape: bf16[32,128], index: 2, kind: input, shape index: {}]   ;;  %s6848_s3 = inlined_call_operand.hbm [shape: f32[32,1], index: 3, kind: input, shape index: {}]   ;;  %s6849_s4 = inlined_call_operand.hbm [shape: f32[2,32,256], index: 4, kind: output, shape index: {}]  }
   0x1   :  { %7039 = sst [smem:[#allocation139_spill]] %s6846_s1 }
   0x2   :  { %7040 = sst [smem:[#allocation140_spill]] %s6847_s2 }
   0x3   :  { %7041 = sst [smem:[#allocation141_spill]] %s6849_s4 }
   0x4   :  { %9 = vsyncpa [#allocation6], 0 }
   0x5   :  { %11 = vsyncpa [#allocation6 + $0x1], 0 }
   0x6   :  { %12 = vsyncpa [#allocation9], 0 }
   0x7   :  { %13 = vsyncpa [#allocation12], 0 }
   0x8   :  { %14 = vsyncpa [#allocation7], 0 }
   0x9   :  { %16 = vsyncpa [#allocation7 + $0x1], 0  ;;  %s4656_s15 = smov 0   ;;  %s4658_s16 = smov 0  }
   0xa   :  { %s4660_s17 = smov 0   ;;  %s4662_s18 = smov 0  }
   0xb   :  { %s4664_s19 = smov 0   ;;  %s4666_s20 = smov 0  }
   0xc   :  { %s4668_s21 = smov 0   ;;  %s4670_s22 = smov 0  }
   0xd   :  { %s4672_s23 = smov 0   ;;  %s4674_s24 = smov 0  }
   0xe   :  { %s4676_s25 = smov 0  }
   0xf LB: > { %7042 = sst [smem:[#allocation18_spill]] %s4573_s15  ;;  %s3540_s26 = sadd.s32 4294967295, %s4613_s25   ;;  %s4613_s25 = sphi %s4676_s25, %s22_s25   ;;  %s4609_s24 = sphi %s4674_s24, %s7438_s24   ;;  %s4605_s23 = sphi %s4672_s23, %s7437_s23   ;;  %s4601_s22 = sphi %s4670_s22, %s7436_s22   ;;  %s4597_s21 = sphi %s4668_s21, %s7435_s21   ;;  %s4593_s20 = sphi %s4666_s20, %s7434_s20   ;;  %s4589_s19 = sphi %s4664_s19, %s7433_s19   ;;  %s4585_s18 = sphi %s4662_s18, %s7432_s18   ;;  %s4581_s17 = sphi %s4660_s17, %s7431_s17   ;;  %s4577_s16 = sphi %s4658_s16, %s7430_s16   ;;  %s4573_s15 = sphi %s4656_s15, %s7429_s15  }
  0x10   : > { %7043 = sst [smem:[#allocation19_spill]] %s4601_s22  ;;  %s3541_s27 = sadd.s32 4294967294, %s4613_s25  }
  0x11   : > { %p54_p0 = scmp.ne.s32.totalorder %s4589_s19, %s4585_s18  ;;  %p4712_p1 = scmp.eq.s32.totalorder %s3540_s26, 0 }
  0x12   : > { %p142_p2 = scmp.ne.s32.totalorder %s4581_s17, %s4577_s16  ;;  %p143_p4 = scmp.eq.s32.totalorder %s3540_s26, 3 }
  0x13   : > { %s7044_s28 = scalar_select %p4712_p1, 1, 0 }
  0x14   : > { %p4721_p3 = por %p4712_p1, %p54_p0  ;;  %p148_p5 = scmp.ne.s32.totalorder %s4577_s16, %s4573_s15 }
  0x15   : > { %p149_p6 = scmp.eq.s32.totalorder %s3541_s27, 3  ;;  %p4727_p7 = por %p143_p4, %p142_p2 }
  0x16   : > { %s7045_s30 = scalar_select %p4721_p3, 1, 0 }
  0x17   : > { %s7046_s5 = scalar_select %p4727_p7, 1, 0 }
  0x18   : > { %p3542_p8 = scmp.ge.s32.totalorder %s4613_s25, 1  ;;  %p4732_p9 = por %p149_p6, %p148_p5 }
  0x19   : > { %7047 = sst [smem:[#allocation20_spill]] %s7046_s5  ;;  %p156_p10 = scmp.lt.s32.totalorder %s4613_s25, 5 }
  0x1a   : > { %s7048_s6 = scalar_select %p4732_p9, 1, 0 }
  0x1b   : > { %p4737_p11 = pnand %p3542_p8, %p156_p10  ;;  %s4615_s8 = smov [#allocation8]  }
  0x1c   : > { %7049 = sst [smem:[#allocation21_spill]] %s7048_s6  ;;  %s168_s9 = sshll.u32 %s4615_s8, 4  ;;  %s4741_s9 = int_to_ptr.vmem [resolvable:$true] %s168_s9 }
  0x1d   : > { %s7050_s7 = scalar_select %p4737_p11, 1, 0 }
  0x1e   : > { %p3701_p12 = pneg %p4737_p11  ;;  %s4616_s11 = smov [#allocation10]  }
  0x1f   : > { %s181_s12 = sshll.u32 %s4616_s11, 4  ;;  %s4617_s13 = smov [#allocation11]   ;;  %s4751_s12 = int_to_ptr.vmem [resolvable:$true] %s181_s12 }
  0x20   : > { %p4747_p13 = pnand %p3701_p12, %p4712_p1  ;;  %s4753_s14 = sshll.u32 %s4617_s13, 4  ;;  %s195_s14 = int_to_ptr.vmem [resolvable:$true] %s4753_s14 }
  0x21   : > { %s7052_s1 = sld [smem:[#allocation139_spill]] }
  0x22   : > { %p4763_p2 = pneg %p4747_p13 }
  0x27   : > { %s4369_s27 = scalar_lea.hbm %s7052_s1, 3072 }
  0x28   : > { %p4370_p0 = scmp.ne.s32.totalorder %s7052_s1, %s4369_s27  ;;  %p4376_p6 = scmp.lt.u32.totalorder %s4369_s27, %s7052_s1 }
  0x2a   : > { %p4372_p4 = pnand %p4763_p2, %p4370_p0 }
  0x2c   : > { %p4373_p5 = pneg %p4372_p4 }
  0x2e   : > { %p4378_p8 = pnand %p4376_p6, %p4373_p5 }
  0x30   : > { %4381 = shalt.err (!%p4378_p8)
}
  0x31   : > { %s4382_s29 = scalar_lea.vmem %s4741_s9, 3072  ;;  %p4390_p7 = scmp.lt.s32.totalorder %s4741_s9, %s4741_s9 }
  0x32   : > { %p4383_p10 = scmp.ne.s32.totalorder %s4741_s9, %s4382_s29  ;;  %p4391_p1 = scmp.lt.s32.totalorder %s4382_s29, %s4382_s29 }
  0x34   : > { %p4385_p12 = pnand %p4383_p10, %p4763_p2  ;;  %p4392_p0 = por %p4391_p1, %p4390_p7 }
  0x36   : > { %p4386_p9 = pneg %p4385_p12 }
  0x38   : > { %p4393_p4 = pnand %p4392_p0, %p4386_p9 }
  0x3a   : > { %4396 = shalt.err (!%p4393_p4)
}
  0x3b   : > { %s4618_s18 = smov 64   ;;  %s4619_s26 = smov 4  }
  0x3c   : > { %3704 = dma.hbm_to_vmem [thread:$0]  (!%p4747_p13), %s7052_s1, 3072, %s4741_s9, [#allocation9], %s4618_s18, %s4618_s18, %s4619_s26  }
  0x3d   : > { %s7054_s2 = sld [smem:[#allocation140_spill]] }
  0x43   : > { %s4397_s15 = scalar_lea.hbm %s7054_s2, 256 }
  0x44   : > { %p4398_p1 = scmp.ne.s32.totalorder %s7054_s2, %s4397_s15  ;;  %p4404_p5 = scmp.lt.u32.totalorder %s4397_s15, %s7054_s2 }
  0x46   : > { %p4400_p7 = pnand %p4398_p1, %p4763_p2 }
  0x48   : > { %p4401_p9 = pneg %p4400_p7 }
  0x4a   : > { %p4406_p6 = pnand %p4404_p5, %p4401_p9 }
  0x4c   : > { %4409 = shalt.err (!%p4406_p6)
}
  0x4d   : > { %s4410_s9 = scalar_lea.vmem %s4751_s12, 256  ;;  %p4418_p0 = scmp.lt.s32.totalorder %s4751_s12, %s4751_s12 }
  0x4e   : > { %p4411_p8 = scmp.ne.s32.totalorder %s4751_s12, %s4410_s9  ;;  %p4419_p4 = scmp.lt.s32.totalorder %s4410_s9, %s4410_s9 }
  0x50   : > { %p4413_p10 = pnand %p4411_p8, %p4763_p2  ;;  %p4420_p1 = por %p4419_p4, %p4418_p0 }
  0x52   : > { %p4414_p12 = pneg %p4413_p10 }
  0x54   : > { %p4421_p7 = pnand %p4420_p1, %p4414_p12 }
  0x56   : > { %4424 = shalt.err (!%p4421_p7)
}
  0x57   : > { %3707 = dma.hbm_to_vmem [thread:$0]  (!%p4747_p13), %s7054_s2, 256, %s4751_s12, [#allocation9], %s4618_s18, %s4618_s18, %s4619_s26  }
  0x58   : > { %s4425_s27 = scalar_lea.hbm %s6848_s3, 512 }
  0x59   : > { %p4426_p9 = scmp.ne.s32.totalorder %s6848_s3, %s4425_s27  ;;  %p4432_p8 = scmp.lt.u32.totalorder %s4425_s27, %s6848_s3 }
  0x5b   : > { %p4428_p5 = pnand %p4426_p9, %p4763_p2 }
  0x5d   : > { %p4429_p6 = pneg %p4428_p5 }
  0x5f   : > { %p4434_p10 = pnand %p4432_p8, %p4429_p6 }
  0x61   : > { %4437 = shalt.err (!%p4434_p10)
}
  0x62   : > { %s4438_s9 = scalar_lea.vmem %s195_s14, 512  ;;  %p4446_p1 = scmp.lt.s32.totalorder %s195_s14, %s195_s14 }
  0x63   : > { %p4439_p12 = scmp.ne.s32.totalorder %s195_s14, %s4438_s9  ;;  %p4447_p7 = scmp.lt.s32.totalorder %s4438_s9, %s4438_s9 }
  0x65   : > { %p4441_p0 = pnand %p4439_p12, %p4763_p2  ;;  %p4448_p3 = por %p4447_p7, %p4446_p1 }
  0x67   : > { %p4442_p4 = pneg %p4441_p0 }
  0x69   : > { %p4449_p11 = pnand %p4448_p3, %p4442_p4 }
  0x6b   : > { %4452 = shalt.err (!%p4449_p11)
}
  0x6c   : > { %s4620_s12 = smov 128   ;;  %s4621_s6 = smov 8  }
  0x6d   : > { %3710 = dma.hbm_to_vmem [thread:$0]  (!%p4747_p13), %s6848_s3, 512, %s195_s14, [#allocation12], %s4620_s12, %s4620_s12, %s4621_s6  }
  0x6e   : > { %s31_s4 = sadd.s32 1, %s4605_s23  ;;  %s34_s15 = sadd.s32 1, %s4609_s24 }
  0x6f   : > { %p32_p3 = scmp.ge.s32.totalorder %s31_s4, 2  ;;  %s41_s22 = sadd.s32 1, %s4593_s20 }
  0x70   : > { %p48_p11 = scmp.ne.s32.totalorder %s4593_s20, %s4589_s19  ;;  %p49_p2 = scmp.eq.s32.totalorder %s4613_s25, 0 }
  0x71   : > { %s7440_s4 = smov (%p32_p3, %s31_s4), 0  ;;  %s7442_s15 = smov (!%p32_p3, %s34_s15), %s4609_s24 }
  0x72   : > { %s128_s10 = ssub.s32 %s4605_s23, %s7440_s4  ;;  %p36_p9 = scmp.ge.s32.totalorder %s7442_s15, 2 }
  0x73   : > { %p3722_p5 = scmp.lt.s32.totalorder %s4613_s25, 4  ;;  %p4838_p13 = por %p49_p2, %p48_p11 }
  0x74   : > { %s208_s5 = sand.u32 1, %s4593_s20   ;;  %s7444_s15 = smov (%p36_p9, %s7442_s15), 0 }
  0x75   : > { %s3547_s27 = sshll.u32 %s208_s5, 6  ;;  %s38_s8 = ssub.s32 %s4609_s24, %s7444_s15 }
  0x76   : > { %p39_p6 = scmp.eq.s32.totalorder %s38_s8, 0  ;;  %s129_s11 = sor.u32 %s128_s10, %s38_s8 }
  0x77   : > { %p130_p8 = scmp.eq.s32.totalorder %s129_s11, 0  ;;  %s3646_s13 = sshll.u32 %s4609_s24, 10 }
  0x78   : > { %s4849_s29 = scalar_select %p39_p6, %s4593_s20, %s41_s22  }
  0x79   : > { %s7056_s9 = sadd.s32 1, %s4581_s17  ;;  %s4859_s26 = scalar_lea.hbm %s6845_s0, %s3646_s13 }
  0x7a   : > { %s4854_s12 = scalar_select %p130_p8, %s4581_s17, %s7056_s9  }
  0x7b   : > { %s212_s1 = scalar_lea.vmem [#allocation5], %s3547_s27  ;;  %p4867_p10 = pnand %p3722_p5, %p4838_p13 }
  0x7c   : > { %s219_s2 = sshll.u32 %s212_s1, 4  ;;  %s4871_s10 = scalar_lea.sflag [#allocation6], %s208_s5  ;;  %s4861_s2 = int_to_ptr.vmem [resolvable:$true] %s219_s2 }
  0x7d   : > { %s4453_s8 = scalar_lea.hbm %s4859_s26, 1024  ;;  %p4455_p0 = pneg %p4867_p10 }
  0x7e   : > { %p4454_p12 = scmp.ne.s32.totalorder %s4859_s26, %s4453_s8  ;;  %s4458_s14 = scalar_lea.hbm %s6845_s0, 2048 }
  0x7f   : > { %p4459_p7 = scmp.lt.u32.totalorder %s4859_s26, %s6845_s0  ;;  %p4460_p3 = scmp.lt.u32.totalorder %s4458_s14, %s4453_s8 }
  0x80   : > { %p4456_p4 = pnand %p4455_p0, %p4454_p12  ;;  %p4462_p2 = scmp.lt.u32.totalorder %s4453_s8, %s4859_s26 }
  0x81   : > { %p4461_p11 = por %p4460_p3, %p4459_p7 }
  0x82   : > { %p4457_p1 = pneg %p4456_p4 }
  0x83   : > { %p4463_p9 = por %p4462_p2, %p4461_p11 }
  0x85   : > { %p4464_p5 = pnand %p4463_p9, %p4457_p1 }
  0x87   : > { %4467 = shalt.err (!%p4464_p5)
}
  0x88   : > { %s4468_s5 = scalar_lea.vmem %s4861_s2, 1024  ;;  %s4622_s9 = smov [#allocation5]  }
  0x89   : > { %p4469_p13 = scmp.ne.s32.totalorder %s4861_s2, %s4468_s5  ;;  %s4473_s6 = sshll.u32 %s4622_s9, 4  ;;  %s4474_s6 = int_to_ptr.vmem [resolvable:$false] %s4473_s6 }
  0x8a   : > { %s4475_s18 = scalar_lea.vmem %s4474_s6, 2048  ;;  %p4476_p12 = scmp.lt.s32.totalorder %s4861_s2, %s4474_s6 }
  0x8b   : > { %p4471_p6 = pnand %p4469_p13, %p4455_p0  ;;  %p4477_p4 = scmp.lt.s32.totalorder %s4475_s18, %s4468_s5 }
  0x8d   : > { %p4472_p8 = pneg %p4471_p6  ;;  %p4478_p7 = por %p4477_p4, %p4476_p12 }
  0x8f   : > { %p4479_p3 = pnand %p4478_p7, %p4472_p8 }
  0x91   : > { %4482 = shalt.err (!%p4479_p3)
}
  0x92   : > { %s4623_s8 = smov 256   ;;  %s4624_s1 = smov 16  }
  0x93   : > { %3714 = dma.hbm_to_vmem [thread:$0]  (!%p4867_p10), %s4859_s26, 1024, %s4861_s2, %s4871_s10, %s4623_s8, %s4623_s8, %s4624_s1  }
  0x94   : > { %p7058_p0 = scmp.ne.s32.totalorder %s7050_s7, 0 }
  0x96   : > { %231 = sbr.rel (%p7058_p0) target bundleno = 2002 (0x7d2), region = 36 }
  0x9d   : > { %s233_s27 = sand.u32 1, %s4589_s19   ;;  %p7059_p1 = scmp.ne.s32.totalorder %s7045_s30, 0 }
  0x9e   : > { %s3551_s14 = sshll.u32 %s233_s27, 6  ;;  %s234_s11 = scalar_lea.sflag [#allocation6], %s233_s27 }
  0x9f   : > { %s237_s13 = scalar_lea.vmem [#allocation5], %s3551_s14 }
  0xa0   : > { %4556 = dma.done.wait (%p7059_p1), %s234_s11, 1024  }
  0xa1   : > { %4558 = vsyncadd (%p7059_p1), %s234_s11, 4294966272  ;;  %p7060_p11 = scmp.ne.s32.totalorder %s7044_s28, 0 }
  0xa3   : > { %4560 = dma.done.wait (%p7060_p11), [#allocation9], 3328  }
  0xa4   : > { %4562 = vsyncadd (%p7060_p11), [#allocation9], 4294963968 }
  0xa5   : > { %4564 = dma.done.wait (%p7060_p11), [#allocation12], 512  }
  0xa6   : > { %4566 = vsyncadd (%p7060_p11), [#allocation12], 4294966784  ;;  %s271_s2 = sand.u32 1, %s4577_s16   ;;  %p3556_p10 = scmp.ne.s32.totalorder %s4597_s21, 0 }
  0xa7   : > { %s3555_s7 = sshll.u32 %s271_s2, 5 }
  0xa8   : > { %s4917_s26 = scalar_lea.vmem [#allocation13], %s3555_s7  ;;  %278 = sbr.rel (%p3556_p10) target bundleno = 674 (0x2a2), region = 56 }
  0xaf   : > { %v280_v0 = vld [vmem:[%s237_s13 + $0x8] sm:$0xff]  ;;  %v282_v1 = vld [vmem:[%s237_s13 + $0x18] sm:$0xff]  ;;  %v279_v2 = vld [vmem:[%s237_s13] sm:$0xff]  ;;  %v4625_v7 = vmov 0   ;;  %vm459_vm0 = vcmask 261120  }
  0xb0   : > { %v288_v3 = vpack.c.bf16 %v282_v1, %v280_v0  ;;  %v281_v4 = vld [vmem:[%s237_s13 + $0x10] sm:$0xff]  ;;  %v284_v5 = vld [vmem:[%s237_s13 + $0x28] sm:$0xff]  ;;  %v286_v6 = vld [vmem:[%s237_s13 + $0x38] sm:$0xff]  ;;  %564 = vmatprep.mubr.bf16.mxu0 %v4625_v7  ;;  %684 = vmatprep.mubr.bf16.mxu1 %v4625_v7 }
  0xb1   : > { %v287_v8 = vpack.c.bf16 %v281_v4, %v279_v2  ;;  %v290_v9 = vpack.c.bf16 %v286_v6, %v284_v5  ;;  %v283_v10 = vld [vmem:[%s237_s13 + $0x20] sm:$0xff]  ;;  %v285_v11 = vld [vmem:[%s237_s13 + $0x30] sm:$0xff]  ;;  %v3831_v15 = vld [vmem:[#allocation8 + $0x8] sm:$0xff]  }
  0xb2   : > { %532 = vmatprep.subr.bf16.mxu0 %v288_v3  ;;  %3677 = vmatprep.subr.bf16.mxu1 %v288_v3  ;;  %v289_v12 = vpack.c.bf16 %v285_v11, %v283_v10  ;;  %v3829_v13 = vld [vmem:[#allocation8] sm:$0xff]   ;;  %v3832_v16 = vld [vmem:[#allocation8 + $0x68] sm:$0xff]   ;;  %v3833_v17 = vld [vmem:[#allocation8 + $0x10] sm:$0xff]  }
  0xb3   : > { %533 = vmatpush1.bf16.msra.mxu0 %v287_v8  ;;  %3679 = vmatpush1.bf16.msra.mxu1 %v287_v8  ;;  %v3830_v14 = vld [vmem:[#allocation8 + $0x60] sm:$0xff]   ;;  %v3834_v18 = vld [vmem:[#allocation8 + $0x70] sm:$0xff]   ;;  %v3835_v19 = vld [vmem:[#allocation8 + $0x18] sm:$0xff]  }
  0xb4   : > { %534 = vmatprep.subr.bf16.mxu0 %v290_v9  ;;  %3678 = vmatprep.subr.bf16.mxu1 %v290_v9  ;;  %v3844_v20 = vld [vmem:[#allocation8 + $0x78] sm:$0xff]   ;;  %v3836_v21 = vld [vmem:[#allocation8 + $0x20] sm:$0xff]   ;;  %v3837_v23 = vld [vmem:[#allocation8 + $0x28] sm:$0xff]  }
  0xb5   : > { %v3845_v22 = vld [vmem:[#allocation8 + $0x80] sm:$0xff]   ;;  %v3838_v24 = vld [vmem:[#allocation8 + $0x30] sm:$0xff]   ;;  %v3839_v25 = vld [vmem:[#allocation8 + $0x38] sm:$0xff]  }
  0xb6   : > { %v3840_v26 = vld [vmem:[#allocation8 + $0x40] sm:$0xff]   ;;  %v3841_v27 = vld [vmem:[#allocation8 + $0x48] sm:$0xff]   ;;  %v3842_v28 = vld [vmem:[#allocation8 + $0x50] sm:$0xff]  }
  0xb7   : > { %535 = vmatpush1.bf16.msra.mxu0 %v289_v12  ;;  %3680 = vmatpush1.bf16.msra.mxu1 %v289_v12  ;;  %v3843_v29 = vld [vmem:[#allocation8 + $0x58] sm:$0xff]   ;;  %v3846_v30 = vld [vmem:[#allocation8 + $0x88] sm:$0xff]   ;;  %v3847_v31 = vld [vmem:[#allocation8 + $0x90] sm:$0xff]  }
  0xb8   : > { %v3848_v32 = vld [vmem:[#allocation8 + $0x98] sm:$0xff]   ;;  %v3849_v33 = vld [vmem:[#allocation8 + $0xa0] sm:$0xff]   ;;  %v3850_v34 = vld [vmem:[#allocation8 + $0xa8] sm:$0xff]  }
  0xb9   : > { %v3851_v35 = vld [vmem:[#allocation8 + $0xb0] sm:$0xff]   ;;  %v3852_v36 = vld [vmem:[#allocation8 + $0xb8] sm:$0xff]  }
  0xba   : > { %3581 = vmatmul.mubr.msk.bf16.vlgmr.msra.gmra.mrb[0].mxu0 %vm459_vm0, %v3829_v13  ;;  %3593 = vmatmul.mubr.msk.bf16.vlgmr.msra.gmra.mrb[0].mxu1 %vm459_vm0, %v3830_v14 }
  0xbb   : > { %574 = vmatprep.mubr.bf16.mxu0 %v4625_v7  ;;  %694 = vmatprep.mubr.bf16.mxu1 %v4625_v7 }
  0xc2   : > { %3582 = vmatmul.mubr.msk.bf16.gmra.mrb[4].mxu0 %vm459_vm0, %v3831_v15  ;;  %3594 = vmatmul.mubr.msk.bf16.gmra.mrb[4].mxu1 %vm459_vm0, %v3832_v16 }
  0xc3   : > { %584 = vmatprep.mubr.bf16.mxu0 %v4625_v7  ;;  %704 = vmatprep.mubr.bf16.mxu1 %v4625_v7 }
  0xca   : > { %3583 = vmatmul.mubr.msk.bf16.gmra.mrb[8].mxu0 %vm459_vm0, %v3833_v17  ;;  %3595 = vmatmul.mubr.msk.bf16.gmra.mrb[8].mxu1 %vm459_vm0, %v3834_v18 }
  0xcb   : > { %594 = vmatprep.mubr.bf16.mxu0 %v4625_v7  ;;  %714 = vmatprep.mubr.bf16.mxu1 %v4625_v7 }
  0xd2   : > { %3584 = vmatmul.mubr.msk.bf16.gmra.mrb[12].mxu0 %vm459_vm0, %v3835_v19  ;;  %3596 = vmatmul.mubr.msk.bf16.gmra.mrb[12].mxu1 %vm459_vm0, %v3844_v20 }
  0xd3   : > { %604 = vmatprep.mubr.bf16.mxu0 %v4625_v7  ;;  %724 = vmatprep.mubr.bf16.mxu1 %v4625_v7 }
  0xda   : > { %3585 = vmatmul.mubr.msk.bf16.gmra.mrb[16].mxu0 %vm459_vm0, %v3836_v21  ;;  %3597 = vmatmul.mubr.msk.bf16.gmra.mrb[16].mxu1 %vm459_vm0, %v3845_v22 }
  0xdb   : > { %614 = vmatprep.mubr.bf16.mxu0 %v4625_v7  ;;  %734 = vmatprep.mubr.bf16.mxu1 %v4625_v7 }
  0xe2   : > { %3586 = vmatmul.mubr.msk.bf16.gmra.mrb[20].mxu0 %vm459_vm0, %v3837_v23  ;;  %3598 = vmatmul.mubr.msk.bf16.gmra.mrb[20].mxu1 %vm459_vm0, %v3846_v30 }
  0xe3   : > { %624 = vmatprep.mubr.bf16.mxu0 %v4625_v7  ;;  %744 = vmatprep.mubr.bf16.mxu1 %v4625_v7 }
  0xea   : > { %3587 = vmatmul.mubr.msk.bf16.gmra.mrb[24].mxu0 %vm459_vm0, %v3838_v24  ;;  %3599 = vmatmul.mubr.msk.bf16.gmra.mrb[24].mxu1 %vm459_vm0, %v3847_v31 }
  0xeb   : > { %634 = vmatprep.mubr.bf16.mxu0 %v4625_v7  ;;  %754 = vmatprep.mubr.bf16.mxu1 %v4625_v7 }
  0xf2   : > { %3588 = vmatmul.mubr.msk.bf16.gmra.mrb[28].mxu0 %vm459_vm0, %v3839_v25  ;;  %3600 = vmatmul.mubr.msk.bf16.gmra.mrb[28].mxu1 %vm459_vm0, %v3848_v32 }
  0xf3   : > { %644 = vmatprep.mubr.bf16.mxu0 %v4625_v7  ;;  %764 = vmatprep.mubr.bf16.mxu1 %v4625_v7 }
  0xfa   : > { %3589 = vmatmul.mubr.msk.bf16.gmra.mrb[32].mxu0 %vm459_vm0, %v3840_v26  ;;  %3601 = vmatmul.mubr.msk.bf16.gmra.mrb[32].mxu1 %vm459_vm0, %v3849_v33 }
  0xfb   : > { %654 = vmatprep.mubr.bf16.mxu0 %v4625_v7  ;;  %774 = vmatprep.mubr.bf16.mxu1 %v4625_v7 }
 0x102   : > { %3590 = vmatmul.mubr.msk.bf16.gmra.mrb[36].mxu0 %vm459_vm0, %v3841_v27  ;;  %3602 = vmatmul.mubr.msk.bf16.gmra.mrb[36].mxu1 %vm459_vm0, %v3850_v34 }
 0x103   : > { %664 = vmatprep.mubr.bf16.mxu0 %v4625_v7  ;;  %784 = vmatprep.mubr.bf16.mxu1 %v4625_v7 }
 0x10a   : > { %3591 = vmatmul.mubr.msk.bf16.gmra.mrb[40].mxu0 %vm459_vm0, %v3842_v28  ;;  %3603 = vmatmul.mubr.msk.bf16.gmra.mrb[40].mxu1 %vm459_vm0, %v3851_v35 }
 0x10b   : > { %674 = vmatprep.mubr.bf16.mxu0 %v4625_v7  ;;  %794 = vmatprep.mubr.bf16.mxu1 %v4625_v7 }
 0x112   : > { %3592 = vmatmul.mubr.msk.bf16.gmra.mrb[44].mxu0 %vm459_vm0, %v3843_v29  ;;  %3604 = vmatmul.mubr.msk.bf16.gmra.mrb[44].mxu1 %vm459_vm0, %v3852_v36 }
 0x18d   : > { %v4968_v37 = vpop.f32.mrb[0].mxu0  ;;  %v4970_v38 = vpop.f32.mrb[0].mxu1 }
 0x18e   : > { %v805_v39 = vmul.f32 %v4968_v37, %v4968_v37  ;;  %v1013_v40 = vmul.f32 %v4970_v38, %v4970_v38  ;;  %v4976_v41 = vpop.f32.mrb[1].mxu0  ;;  %v4978_v42 = vpop.f32.mrb[1].mxu1 }
 0x18f   : > { %v806_v43 = vmul.f32 %v4976_v41, %v4976_v41  ;;  %v1014_v44 = vmul.f32 %v4978_v42, %v4978_v42  ;;  %v4984_v45 = vpop.f32.mrb[2].mxu0  ;;  %v4986_v46 = vpop.f32.mrb[2].mxu1 }
 0x190   : > { %v807_v47 = vmul.f32 %v4984_v45, %v4984_v45  ;;  %v1015_v48 = vmul.f32 %v4986_v46, %v4986_v46  ;;  %v4992_v49 = vpop.f32.mrb[3].mxu0  ;;  %v4994_v50 = vpop.f32.mrb[3].mxu1 }
 0x191   : > { %v808_v51 = vmul.f32 %v4992_v49, %v4992_v49  ;;  %v1016_v52 = vmul.f32 %v4994_v50, %v4994_v50  ;;  %v837_v53 = vadd.f32 %v806_v43, %v805_v39  ;;  %v1053_v54 = vadd.f32 %v1014_v44, %v1013_v40 }
 0x193   : > { %838 = vadd.xlane.f32.xlu0 %v837_v53  ;;  %v1056_v55 = vadd.f32 %v1016_v52, %v1015_v48  ;;  %v840_v56 = vadd.f32 %v808_v51, %v807_v47 }
 0x195   : > { %1057 = vadd.xlane.f32.xlu1 %v1056_v55  ;;  %v5000_v57 = vpop.f32.mrb[4].mxu0  ;;  %v5002_v58 = vpop.f32.mrb[4].mxu1 }
 0x196   : > { %v809_v59 = vmul.f32 %v5000_v57, %v5000_v57  ;;  %v5006_v60 = vpop.f32.mrb[5].mxu0  ;;  %v1017_v61 = vmul.f32 %v5002_v58, %v5002_v58  ;;  %v5010_v62 = vpop.f32.mrb[5].mxu1 }
 0x197   : > { %v810_v63 = vmul.f32 %v5006_v60, %v5006_v60  ;;  %1054 = vadd.xlane.f32.xlu0 %v1053_v54  ;;  %v5014_v0 = vpop.f32.mrb[6].mxu0  ;;  %v1018_v1 = vmul.f32 %v5010_v62, %v5010_v62  ;;  %v5018_v2 = vpop.f32.mrb[6].mxu1 }
 0x198   : > { %v811_v3 = vmul.f32 %v5014_v0, %v5014_v0  ;;  %v5022_v4 = vpop.f32.mrb[7].mxu0  ;;  %v1019_v5 = vmul.f32 %v5018_v2, %v5018_v2  ;;  %v5026_v6 = vpop.f32.mrb[7].mxu1 }
 0x199   : > { %v812_v7 = vmul.f32 %v5022_v4, %v5022_v4  ;;  %v843_v8 = vadd.f32 %v810_v63, %v809_v59  ;;  %v1020_v9 = vmul.f32 %v5026_v6, %v5026_v6  ;;  %v1059_v10 = vadd.f32 %v1018_v1, %v1017_v61 }
 0x19b   : > { %841 = vadd.xlane.f32.xlu0 %v840_v56  ;;  %844 = vadd.xlane.f32.xlu1 %v843_v8  ;;  %v846_v11 = vadd.f32 %v812_v7, %v811_v3  ;;  %v1062_v12 = vadd.f32 %v1020_v9, %v1019_v5 }
 0x19d   : > { %v5032_v13 = vpop.f32.mrb[8].mxu0  ;;  %v5034_v14 = vpop.f32.mrb[8].mxu1 }
 0x19e   : > { %v813_v15 = vmul.f32 %v5032_v13, %v5032_v13  ;;  %v5038_v16 = vpop.f32.mrb[9].mxu0  ;;  %v1021_v17 = vmul.f32 %v5034_v14, %v5034_v14  ;;  %v5042_v18 = vpop.f32.mrb[9].mxu1 }
 0x19f   : > { %v814_v19 = vmul.f32 %v5038_v16, %v5038_v16  ;;  %1060 = vadd.xlane.f32.xlu0 %v1059_v10  ;;  %847 = vadd.xlane.f32.xlu1 %v846_v11  ;;  %v5046_v20 = vpop.f32.mrb[10].mxu0  ;;  %v1022_v21 = vmul.f32 %v5042_v18, %v5042_v18  ;;  %v5050_v22 = vpop.f32.mrb[10].mxu1 }
 0x1a0   : > { %v815_v23 = vmul.f32 %v5046_v20, %v5046_v20  ;;  %v5054_v24 = vpop.f32.mrb[11].mxu0  ;;  %v1023_v25 = vmul.f32 %v5050_v22, %v5050_v22  ;;  %v5058_v26 = vpop.f32.mrb[11].mxu1 }
 0x1a1   : > { %v816_v27 = vmul.f32 %v5054_v24, %v5054_v24  ;;  %v849_v28 = vadd.f32 %v814_v19, %v813_v15  ;;  %v1024_v29 = vmul.f32 %v5058_v26, %v5058_v26  ;;  %v1065_v30 = vadd.f32 %v1022_v21, %v1021_v17 }
 0x1a3   : > { %1063 = vadd.xlane.f32.xlu1 %v1062_v12  ;;  %850 = vadd.xlane.f32.xlu0 %v849_v28  ;;  %v852_v31 = vadd.f32 %v816_v27, %v815_v23  ;;  %v1068_v32 = vadd.f32 %v1024_v29, %v1023_v25 }
 0x1a5   : > { %v5064_v33 = vpop.f32.mrb[12].mxu0  ;;  %v5066_v34 = vpop.f32.mrb[12].mxu1 }
 0x1a6   : > { %7061 = vst [vmem:[#allocation22_spill] sm:$0xff] %v5066_v34  ;;  %v817_v35 = vmul.f32 %v5064_v33, %v5064_v33  ;;  %v5070_v36 = vpop.f32.mrb[13].mxu0  ;;  %v1025_v39 = vmul.f32 %v5066_v34, %v5066_v34  ;;  %v5074_v40 = vpop.f32.mrb[13].mxu1 }
 0x1a7   : > { %7062 = vst [vmem:[#allocation23_spill] sm:$0xff] %v5074_v40  ;;  %v818_v43 = vmul.f32 %v5070_v36, %v5070_v36  ;;  %1066 = vadd.xlane.f32.xlu0 %v1065_v30  ;;  %853 = vadd.xlane.f32.xlu1 %v852_v31  ;;  %v5078_v44 = vpop.f32.mrb[14].mxu0  ;;  %v1026_v47 = vmul.f32 %v5074_v40, %v5074_v40  ;;  %v5082_v48 = vpop.f32.mrb[14].mxu1 }
 0x1a8   : > { %7063 = vst [vmem:[#allocation24_spill] sm:$0xff] %v5082_v48  ;;  %v819_v51 = vmul.f32 %v5078_v44, %v5078_v44  ;;  %v5086_v52 = vpop.f32.mrb[15].mxu0  ;;  %v1027_v53 = vmul.f32 %v5082_v48, %v5082_v48  ;;  %v5090_v54 = vpop.f32.mrb[15].mxu1 }
 0x1a9   : > { %7064 = vst [vmem:[#allocation25_spill] sm:$0xff] %v5090_v54  ;;  %v820_v55 = vmul.f32 %v5086_v52, %v5086_v52  ;;  %v855_v56 = vadd.f32 %v818_v43, %v817_v35  ;;  %v1028_v59 = vmul.f32 %v5090_v54, %v5090_v54  ;;  %v5096_v61 = vadd.f32 %v1026_v47, %v1025_v39 }
 0x1ab   : > { %1069 = vadd.xlane.f32.xlu1 %v1068_v32  ;;  %856 = vadd.xlane.f32.xlu0 %v855_v56  ;;  %v858_v63 = vadd.f32 %v820_v55, %v819_v51  ;;  %v5098_v1 = vadd.f32 %v1028_v59, %v1027_v53 }
 0x1ad   : > { %v5100_v3 = vpop.f32.mrb[16].mxu0 }
 0x1ae   : > { %v821_v5 = vmul.f32 %v5100_v3, %v5100_v3  ;;  %v5104_v7 = vpop.f32.mrb[17].mxu0 }
 0x1af   : > { %v822_v8 = vmul.f32 %v5104_v7, %v5104_v7  ;;  %859 = vadd.xlane.f32.xlu1 %v858_v63  ;;  %v5108_v9 = vpop.f32.mrb[18].mxu0 }
 0x1b0   : > { %v823_v10 = vmul.f32 %v5108_v9, %v5108_v9  ;;  %v5112_v11 = vpop.f32.mrb[19].mxu0 }
 0x1b1   : > { %v824_v12 = vmul.f32 %v5112_v11, %v5112_v11  ;;  %v861_v15 = vadd.f32 %v822_v8, %v821_v5 }
 0x1b3   : > { %862 = vadd.xlane.f32.xlu0 %v861_v15  ;;  %v864_v17 = vadd.f32 %v824_v12, %v823_v10 }
 0x1b5   : > { %865 = vadd.xlane.f32.xlu1 %v864_v17  ;;  %v5116_v19 = vpop.f32.mrb[20].mxu0 }
 0x1b6   : > { %v825_v21 = vmul.f32 %v5116_v19, %v5116_v19  ;;  %v5120_v23 = vpop.f32.mrb[21].mxu0 }
 0x1b7   : > { %v826_v25 = vmul.f32 %v5120_v23, %v5120_v23  ;;  %v5124_v27 = vpop.f32.mrb[22].mxu0 }
 0x1b8   : > { %v827_v28 = vmul.f32 %v5124_v27, %v5124_v27  ;;  %v5128_v29 = vpop.f32.mrb[23].mxu0 }
 0x1b9   : > { %v828_v30 = vmul.f32 %v5128_v29, %v5128_v29  ;;  %v867_v31 = vadd.f32 %v826_v25, %v825_v21 }
 0x1bb   : > { %868 = vadd.xlane.f32.xlu0 %v867_v31  ;;  %v870_v32 = vadd.f32 %v828_v30, %v827_v28 }
 0x1bd   : > { %871 = vadd.xlane.f32.xlu1 %v870_v32  ;;  %v5132_v35 = vpop.f32.mrb[24].mxu0 }
 0x1be   : > { %v829_v39 = vmul.f32 %v5132_v35, %v5132_v35  ;;  %v5136_v43 = vpop.f32.mrb[25].mxu0 }
 0x1bf   : > { %7065 = vst [vmem:[#allocation26_spill] sm:$0xff] %v5136_v43  ;;  %v830_v47 = vmul.f32 %v5136_v43, %v5136_v43  ;;  %v5140_v51 = vpop.f32.mrb[26].mxu0 }
 0x1c0   : > { %7066 = vst [vmem:[#allocation27_spill] sm:$0xff] %v5140_v51  ;;  %v831_v53 = vmul.f32 %v5140_v51, %v5140_v51  ;;  %v5144_v55 = vpop.f32.mrb[27].mxu0 }
 0x1c1   : > { %7067 = vst [vmem:[#allocation28_spill] sm:$0xff] %v5144_v55  ;;  %v832_v56 = vmul.f32 %v5144_v55, %v5144_v55  ;;  %v873_v59 = vadd.f32 %v830_v47, %v829_v39 }
 0x1c3   : > { %874 = vadd.xlane.f32.xlu0 %v873_v59  ;;  %v876_v63 = vadd.f32 %v832_v56, %v831_v53 }
 0x1c5   : > { %877 = vadd.xlane.f32.xlu1 %v876_v63  ;;  %v5148_v5 = vpop.f32.mrb[28].mxu0 }
 0x1c6   : > { %7068 = vst [vmem:[#allocation29_spill] sm:$0xff] %v5148_v5  ;;  %v833_v8 = vmul.f32 %v5148_v5, %v5148_v5  ;;  %v5152_v10 = vpop.f32.mrb[29].mxu0 }
 0x1c7   : > { %7069 = vst [vmem:[#allocation30_spill] sm:$0xff] %v5152_v10  ;;  %v834_v12 = vmul.f32 %v5152_v10, %v5152_v10  ;;  %v5156_v15 = vpop.f32.mrb[30].mxu0 }
 0x1c8   : > { %7070 = vst [vmem:[#allocation31_spill] sm:$0xff] %v5156_v15  ;;  %v835_v17 = vmul.f32 %v5156_v15, %v5156_v15  ;;  %v5160_v21 = vpop.f32.mrb[31].mxu0 }
 0x1c9   : > { %7071 = vst [vmem:[#allocation32_spill] sm:$0xff] %v5160_v21  ;;  %v836_v25 = vmul.f32 %v5160_v21, %v5160_v21  ;;  %v879_v28 = vadd.f32 %v834_v12, %v833_v8 }
 0x1cb   : > { %880 = vadd.xlane.f32.xlu0 %v879_v28  ;;  %v882_v30 = vadd.f32 %v836_v25, %v835_v17 }
 0x1cd   : > { %883 = vadd.xlane.f32.xlu1 %v882_v30  ;;  %v5164_v31 = vpop.f32.mrb[32].mxu0 }
 0x1ce   : > { %7072 = vst [vmem:[#allocation33_spill] sm:$0xff] %v5164_v31  ;;  %v997_v32 = vmul.f32 %v5164_v31, %v5164_v31  ;;  %v5168_v39 = vpop.f32.mrb[33].mxu0 }
 0x1cf   : > { %7073 = vst [vmem:[#allocation34_spill] sm:$0xff] %v5168_v39  ;;  %v998_v47 = vmul.f32 %v5168_v39, %v5168_v39  ;;  %v5172_v53 = vpop.f32.mrb[34].mxu0 }
 0x1d0   : > { %7074 = vst [vmem:[#allocation35_spill] sm:$0xff] %v5172_v53  ;;  %v999_v56 = vmul.f32 %v5172_v53, %v5172_v53  ;;  %v5176_v59 = vpop.f32.mrb[35].mxu0 }
 0x1d1   : > { %7075 = vst [vmem:[#allocation36_spill] sm:$0xff] %v5176_v59  ;;  %v1000_v63 = vmul.f32 %v5176_v59, %v5176_v59  ;;  %v1029_v8 = vadd.f32 %v998_v47, %v997_v32 }
 0x1d3   : > { %1030 = vadd.xlane.f32.xlu0 %v1029_v8  ;;  %v1032_v12 = vadd.f32 %v1000_v63, %v999_v56 }
 0x1d5   : > { %1033 = vadd.xlane.f32.xlu1 %v1032_v12  ;;  %v5180_v17 = vpop.f32.mrb[36].mxu0 }
 0x1d6   : > { %7076 = vst [vmem:[#allocation37_spill] sm:$0xff] %v5180_v17  ;;  %v1001_v25 = vmul.f32 %v5180_v17, %v5180_v17  ;;  %v5184_v28 = vpop.f32.mrb[37].mxu0 }
 0x1d7   : > { %7077 = vst [vmem:[#allocation38_spill] sm:$0xff] %v5184_v28  ;;  %v1002_v30 = vmul.f32 %v5184_v28, %v5184_v28  ;;  %v5188_v54 = vpop.f32.mrb[38].mxu0 }
 0x1d8   : > { %7078 = vst [vmem:[#allocation39_spill] sm:$0xff] %v5188_v54  ;;  %v1003_v48 = vmul.f32 %v5188_v54, %v5188_v54  ;;  %v5192_v40 = vpop.f32.mrb[39].mxu0 }
 0x1d9   : > { %7079 = vst [vmem:[#allocation40_spill] sm:$0xff] %v5192_v40  ;;  %v1004_v32 = vmul.f32 %v5192_v40, %v5192_v40  ;;  %v1035_v47 = vadd.f32 %v1002_v30, %v1001_v25 }
 0x1db   : > { %1036 = vadd.xlane.f32.xlu0 %v1035_v47  ;;  %v1038_v56 = vadd.f32 %v1004_v32, %v1003_v48 }
 0x1dd   : > { %1039 = vadd.xlane.f32.xlu1 %v1038_v56  ;;  %v5196_v63 = vpop.f32.mrb[40].mxu0 }
 0x1de   : > { %7080 = vst [vmem:[#allocation41_spill] sm:$0xff] %v5196_v63  ;;  %v1005_v8 = vmul.f32 %v5196_v63, %v5196_v63  ;;  %v5200_v12 = vpop.f32.mrb[41].mxu0 }
 0x1df   : > { %7081 = vst [vmem:[#allocation42_spill] sm:$0xff] %v5200_v12  ;;  %v1006_v34 = vmul.f32 %v5200_v12, %v5200_v12  ;;  %v5204_v54 = vpop.f32.mrb[42].mxu0 }
 0x1e0   : > { %7082 = vst [vmem:[#allocation43_spill] sm:$0xff] %v5204_v54  ;;  %v1007_v28 = vmul.f32 %v5204_v54, %v5204_v54  ;;  %v5208_v40 = vpop.f32.mrb[43].mxu0 }
 0x1e1   : > { %7083 = vst [vmem:[#allocation44_spill] sm:$0xff] %v5208_v40  ;;  %v1008_v48 = vmul.f32 %v5208_v40, %v5208_v40  ;;  %v1041_v25 = vadd.f32 %v1006_v34, %v1005_v8  ;;  %v726_v34 = vpop.f32.mrb[16].mxu1 }
 0x1e3   : > { %1042 = vadd.xlane.f32.xlu0 %v1041_v25  ;;  %v1044_v30 = vadd.f32 %v1008_v48, %v1007_v28  ;;  %v728_v48 = vpop.f32.mrb[17].mxu1 }
 0x1e4   : > { %v730_v25 = vpop.f32.mrb[18].mxu1 }
 0x1e5   : > { %1045 = vadd.xlane.f32.xlu1 %v1044_v30  ;;  %v5212_v32 = vpop.f32.mrb[44].mxu0  ;;  %v1397_v17 = vpack.c.bf16 %v730_v25, %v726_v34 }
 0x1e6   : > { %7084 = vst [vmem:[#allocation45_spill] sm:$0xff] %v5212_v32  ;;  %v1009_v47 = vmul.f32 %v5212_v32, %v5212_v32  ;;  %v5216_v56 = vpop.f32.mrb[45].mxu0  ;;  %v732_v32 = vpop.f32.mrb[19].mxu1 }
 0x1e7   : > { %7085 = vst [vmem:[#allocation46_spill] sm:$0xff] %v5216_v56  ;;  %v1010_v12 = vmul.f32 %v5216_v56, %v5216_v56  ;;  %v5220_v54 = vpop.f32.mrb[46].mxu0  ;;  %v1398_v59 = vpack.c.bf16 %v732_v32, %v728_v48  ;;  %1413 = vst [vmem:[#allocation4] sm:$0xff] %v1397_v17 }
 0x1e8   : > { %7086 = vst [vmem:[#allocation47_spill] sm:$0xff] %v5220_v54  ;;  %v1011_v63 = vmul.f32 %v5220_v54, %v5220_v54  ;;  %v5224_v40 = vpop.f32.mrb[47].mxu0  ;;  %v736_v54 = vpop.f32.mrb[20].mxu1 }
 0x1e9   : > { %7087 = vst [vmem:[#allocation48_spill] sm:$0xff] %v5224_v40  ;;  %v1012_v28 = vmul.f32 %v5224_v40, %v5224_v40  ;;  %v1047_v8 = vadd.f32 %v1010_v12, %v1009_v47  ;;  %1414 = vst [vmem:[#allocation4 + $0x8] sm:$0xff] %v1398_v59  ;;  %v738_v56 = vpop.f32.mrb[21].mxu1 }
 0x1ea   : > { %v740_v53 = vpop.f32.mrb[22].mxu1 }
 0x1eb   : > { %1048 = vadd.xlane.f32.xlu0 %v1047_v8  ;;  %v1050_v30 = vadd.f32 %v1012_v28, %v1011_v63  ;;  %v742_v39 = vpop.f32.mrb[23].mxu1  ;;  %v1399_v40 = vpack.c.bf16 %v740_v53, %v736_v54 }
 0x1ec   : > { %v1400_v12 = vpack.c.bf16 %v742_v39, %v738_v56  ;;  %v746_v47 = vpop.f32.mrb[24].mxu1 }
 0x1ed   : > { %1051 = vadd.xlane.f32.xlu1 %v1050_v30  ;;  %1415 = vst [vmem:[#allocation4 + $0x10] sm:$0xff] %v1399_v40  ;;  %v748_v63 = vpop.f32.mrb[25].mxu1 }
 0x1ee   : > { %1416 = vst [vmem:[#allocation4 + $0x18] sm:$0xff] %v1400_v12  ;;  %v750_v28 = vpop.f32.mrb[26].mxu1 }
 0x1ef   : > { %1072 = vadd.xlane.f32.xlu0 %v5096_v61  ;;  %v752_v34 = vpop.f32.mrb[27].mxu1  ;;  %v1401_v32 = vpack.c.bf16 %v750_v28, %v746_v47 }
 0x1f0   : > { %v1402_v8 = vpack.c.bf16 %v752_v34, %v748_v63  ;;  %v756_v59 = vpop.f32.mrb[28].mxu1 }
 0x1f1   : > { %1075 = vadd.xlane.f32.xlu1 %v5098_v1  ;;  %1417 = vst [vmem:[#allocation4 + $0x20] sm:$0xff] %v1401_v32  ;;  %v758_v61 = vpop.f32.mrb[29].mxu1 }
 0x1f2   : > { %1418 = vst [vmem:[#allocation4 + $0x28] sm:$0xff] %v1402_v8  ;;  %v760_v17 = vpop.f32.mrb[30].mxu1 }
 0x1f3   : > { %v762_v48 = vpop.f32.mrb[31].mxu1  ;;  %v1403_v1 = vpack.c.bf16 %v760_v17, %v756_v59 }
 0x1f4   : > { %v1404_v25 = vpack.c.bf16 %v762_v48, %v758_v61  ;;  %v766_v54 = vpop.f32.mrb[32].mxu1 }
 0x1f5   : > { %1419 = vst [vmem:[#allocation4 + $0x30] sm:$0xff] %v1403_v1  ;;  %v768_v39 = vpop.f32.mrb[33].mxu1 }
 0x1f6   : > { %1420 = vst [vmem:[#allocation4 + $0x38] sm:$0xff] %v1404_v25  ;;  %v770_v40 = vpop.f32.mrb[34].mxu1 }
 0x1f7   : > { %v772_v53 = vpop.f32.mrb[35].mxu1  ;;  %v1405_v56 = vpack.c.bf16 %v770_v40, %v766_v54 }
 0x1f8   : > { %v1406_v30 = vpack.c.bf16 %v772_v53, %v768_v39  ;;  %v776_v12 = vpop.f32.mrb[36].mxu1 }
 0x1f9   : > { %1421 = vst [vmem:[#allocation4 + $0x40] sm:$0xff] %v1405_v56  ;;  %v778_v47 = vpop.f32.mrb[37].mxu1 }
 0x1fa   : > { %1422 = vst [vmem:[#allocation4 + $0x48] sm:$0xff] %v1406_v30  ;;  %v780_v63 = vpop.f32.mrb[38].mxu1 }
 0x1fb   : > { %v782_v28 = vpop.f32.mrb[39].mxu1  ;;  %v1407_v34 = vpack.c.bf16 %v780_v63, %v776_v12 }
 0x1fc   : > { %v1408_v32 = vpack.c.bf16 %v782_v28, %v778_v47  ;;  %v786_v8 = vpop.f32.mrb[40].mxu1 }
 0x1fd   : > { %1423 = vst [vmem:[#allocation4 + $0x50] sm:$0xff] %v1407_v34  ;;  %v788_v59 = vpop.f32.mrb[41].mxu1 }
 0x1fe   : > { %1424 = vst [vmem:[#allocation4 + $0x58] sm:$0xff] %v1408_v32  ;;  %v790_v61 = vpop.f32.mrb[42].mxu1 }
 0x1ff   : > { %v792_v17 = vpop.f32.mrb[43].mxu1  ;;  %v1409_v48 = vpack.c.bf16 %v790_v61, %v786_v8 }
 0x200   : > { %v1410_v1 = vpack.c.bf16 %v792_v17, %v788_v59  ;;  %v796_v54 = vpop.f32.mrb[44].mxu1 }
 0x201   : > { %1425 = vst [vmem:[#allocation4 + $0x60] sm:$0xff] %v1409_v48  ;;  %v798_v39 = vpop.f32.mrb[45].mxu1 }
 0x202   : > { %1426 = vst [vmem:[#allocation4 + $0x68] sm:$0xff] %v1410_v1  ;;  %v800_v53 = vpop.f32.mrb[46].mxu1 }
 0x203   : > { %v802_v56 = vpop.f32.mrb[47].mxu1  ;;  %v1411_v12 = vpack.c.bf16 %v800_v53, %v796_v54 }
 0x204   : > { %v1412_v47 = vpack.c.bf16 %v802_v56, %v798_v39 }
 0x205   : > { %1427 = vst [vmem:[#allocation4 + $0x70] sm:$0xff] %v1411_v12 }
 0x206   : > { %1428 = vst [vmem:[#allocation4 + $0x78] sm:$0xff] %v1412_v47 }
 0x220   : > { %v839_v25 = vpop.xlane.xlu0 %838 }
 0x221   : > { %3853 = vrsqrt.f32 %v839_v25  ;;  %vm887_vm1 = vcmp.eq.f32.partialorder %v839_v25, inf  ;;  %vm889_vm2 = vcmp.eq.f32.partialorder %v839_v25, 0.0  ;;  %v890_v32 = vand.u32 2147483648, %v839_v25 }
 0x222   : > { %v1058_v40 = vpop.xlane.xlu1 %1057 }
 0x223   : > { %3855 = vrsqrt.f32 %v1058_v40  ;;  %vm1142_vm3 = vcmp.eq.f32.partialorder %v1058_v40, inf  ;;  %vm1144_vm4 = vcmp.eq.f32.partialorder %v1058_v40, 0.0  ;;  %v1145_v59 = vand.u32 2147483648, %v1058_v40 }
 0x224   : > { %v1055_v30 = vpop.xlane.xlu0 %1054 }
 0x225   : > { %3857 = vrsqrt.f32 %v1055_v30  ;;  %vm1135_vm5 = vcmp.eq.f32.partialorder %v1055_v30, inf  ;;  %vm1137_vm6 = vcmp.eq.f32.partialorder %v1055_v30, 0.0  ;;  %v1138_v1 = vand.u32 2147483648, %v1055_v30 }
 0x228   : > { %v5230_v63 = vpop.xlane.xlu0 %841  ;;  %v5232_v28 = vpop.xlane.xlu1 %844 }
 0x229   : > { %3859 = vrsqrt.f32 %v5230_v63  ;;  %vm894_vm7 = vcmp.eq.f32.partialorder %v5230_v63, inf  ;;  %vm896_vm8 = vcmp.eq.f32.partialorder %v5230_v63, 0.0  ;;  %v897_v12 = vand.u32 2147483648, %v5230_v63 }
 0x22a   : > { %3861 = vrsqrt.f32 %v5232_v28  ;;  %vm901_vm9 = vcmp.eq.f32.partialorder %v5232_v28, inf  ;;  %vm903_vm10 = vcmp.eq.f32.partialorder %v5232_v28, 0.0 }
 0x22b   : > { %v3854_v34 = vpop.eup %3853 }
 0x22c   : > { %v886_v8 = vmul.f32 %v3854_v34, %v839_v25  ;;  %v5236_v61 = vpop.xlane.xlu0 %1060  ;;  %v5238_v17 = vpop.xlane.xlu1 %847 }
 0x22d   : > { %v3856_v48 = vpop.eup %3855  ;;  %3863 = vrsqrt.f32 %v5236_v61  ;;  %vm1149_vm11 = vcmp.eq.f32.partialorder %v5236_v61, inf  ;;  %vm1151_vm12 = vcmp.eq.f32.partialorder %v5236_v61, 0.0  ;;  %vm908_vm13 = vcmp.eq.f32.partialorder %v5238_v17, inf }
 0x22e   : > { %v888_v54 = vsel %vm887_vm1, %v839_v25, %v886_v8  ;;  %v1141_v39 = vmul.f32 %v3856_v48, %v1058_v40  ;;  %3865 = vrsqrt.f32 %v5238_v17  ;;  %v904_v25 = vand.u32 2147483648, %v5232_v28 }
 0x22f   : > { %v3858_v53 = vpop.eup %3857  ;;  %v891_v56 = vsel %vm889_vm2, %v890_v32, %v888_v54  ;;  %vm910_vm14 = vcmp.eq.f32.partialorder %v5238_v17, 0.0 }
 0x230   : > { %v1189_v47 = vmax.f32 %v891_v56, 1e-12  ;;  %v1143_v34 = vsel %vm1142_vm3, %v1058_v40, %v1141_v39  ;;  %v1134_v31 = vmul.f32 %v3858_v53, %v1055_v30  ;;  %v5249_v8 = vpop.xlane.xlu1 %1063  ;;  %v5251_v48 = vpop.xlane.xlu0 %850  ;;  %v1152_v56 = vand.u32 2147483648, %v5236_v61 }
 0x231   : > { %v1146_v21 = vsel %vm1144_vm4, %v1145_v59, %v1143_v34  ;;  %3867 = vrsqrt.f32 %v5249_v8  ;;  %vm1156_vm15 = vcmp.eq.f32.partialorder %v5249_v8, inf  ;;  %vm1158_vm0 = vcmp.eq.f32.partialorder %v5249_v8, 0.0 }
 0x232   : > { %3869 = vrcp.f32 %v1189_v47  ;;  %v1310_v32 = vmax.f32 %v1146_v21, 1e-12  ;;  %v1136_v54 = vsel %vm1135_vm5, %v1055_v30, %v1134_v31  ;;  %vm915_vm1 = vcmp.eq.f32.partialorder %v5251_v48, inf }
 0x233   : > { %v3860_v39 = vpop.eup %3859  ;;  %v1139_v53 = vsel %vm1137_vm6, %v1138_v1, %v1136_v54  ;;  %3871 = vrsqrt.f32 %v5251_v48  ;;  %v911_v1 = vand.u32 2147483648, %v5238_v17  ;;  %vm917_vm2 = vcmp.eq.f32.partialorder %v5251_v48, 0.0 }
 0x234   : > { %v3862_v40 = vpop.eup %3861  ;;  %3873 = vrcp.f32 %v1310_v32  ;;  %v1309_v59 = vmax.f32 %v1139_v53, 1e-12  ;;  %v893_v34 = vmul.f32 %v3860_v39, %v5230_v63  ;;  %v5265_v21 = vpop.xlane.xlu0 %1066  ;;  %v1159_v32 = vand.u32 2147483648, %v5249_v8 }
 0x235   : > { %v5267_v31 = vpop.xlane.xlu1 %853  ;;  %v900_v30 = vmul.f32 %v3862_v40, %v5232_v28  ;;  %3875 = vrsqrt.f32 %v5265_v21  ;;  %vm1163_vm3 = vcmp.eq.f32.partialorder %v5265_v21, inf  ;;  %vm1165_vm4 = vcmp.eq.f32.partialorder %v5265_v21, 0.0 }
 0x236   : > { %3877 = vrcp.f32 %v1309_v59  ;;  %v895_v47 = vsel %vm894_vm7, %v5230_v63, %v893_v34  ;;  %v918_v63 = vand.u32 2147483648, %v5251_v48  ;;  %vm922_vm5 = vcmp.eq.f32.partialorder %v5267_v31, inf }
 0x237   : > { %v3864_v54 = vpop.eup %3863  ;;  %v898_v39 = vsel %vm896_vm8, %v897_v12, %v895_v47  ;;  %v902_v53 = vsel %vm901_vm9, %v5232_v28, %v900_v30  ;;  %3879 = vrsqrt.f32 %v5267_v31  ;;  %vm924_vm6 = vcmp.eq.f32.partialorder %v5267_v31, 0.0 }
 0x238   : > { %v3866_v40 = vpop.eup %3865  ;;  %v1190_v59 = vmax.f32 %v898_v39, 1e-12  ;;  %v905_v34 = vsel %vm903_vm10, %v904_v25, %v902_v53  ;;  %v1148_v15 = vmul.f32 %v3864_v54, %v5236_v61  ;;  %v5295_v10 = vpop.xlane.xlu0 %856  ;;  %v1166_v25 = vand.u32 2147483648, %v5265_v21 }
 0x239   : > { %v5290_v12 = vpop.xlane.xlu1 %1069  ;;  %v1191_v47 = vmax.f32 %v905_v34, 1e-12  ;;  %v907_v30 = vmul.f32 %v3866_v40, %v5238_v17  ;;  %vm929_vm9 = vcmp.eq.f32.partialorder %v5295_v10, inf  ;;  %vm931_vm10 = vcmp.eq.f32.partialorder %v5295_v10, 0.0 }
 0x23a   : > { %3881 = vrsqrt.f32 %v5290_v12  ;;  %v1150_v28 = vsel %vm1149_vm11, %v5236_v61, %v1148_v15  ;;  %v925_v61 = vand.u32 2147483648, %v5267_v31  ;;  %vm1170_vm7 = vcmp.eq.f32.partialorder %v5290_v12, inf }
 0x23b   : > { %3883 = vrcp.f32 %v1190_v59  ;;  %v3868_v54 = vpop.eup %3867  ;;  %v1153_v39 = vsel %vm1151_vm12, %v1152_v56, %v1150_v28  ;;  %v909_v53 = vsel %vm908_vm13, %v5238_v17, %v907_v30  ;;  %vm1172_vm8 = vcmp.eq.f32.partialorder %v5290_v12, 0.0 }
 0x23c   : > { %3885 = vrcp.f32 %v1191_v47  ;;  %v3870_v40 = vpop.eup %3869  ;;  %v1311_v59 = vmax.f32 %v1153_v39, 1e-12  ;;  %v912_v15 = vsel %vm910_vm14, %v911_v1, %v909_v53  ;;  %v1155_v34 = vmul.f32 %v3868_v54, %v5249_v8 }
 0x23d   : > { %3887 = vrsqrt.f32 %v5295_v10  ;;  %v3872_v5 = vpop.eup %3871  ;;  %v1192_v47 = vmax.f32 %v912_v15, 1e-12  ;;  %v1173_v1 = vand.u32 2147483648, %v5290_v12  ;;  %v1206_v54 = vmul.f32 10.0, %v3870_v40  ;;  %v5323_v15 = vpop.xlane.xlu1 %859 }
 0x23e   : > { %v3874_v56 = vpop.eup %3873  ;;  %v1157_v30 = vsel %vm1156_vm15, %v5249_v8, %v1155_v34  ;;  %v914_v17 = vmul.f32 %v3872_v5, %v5251_v48  ;;  %3889 = vrcp.f32 %v1311_v59  ;;  %vm936_vm11 = vcmp.eq.f32.partialorder %v5323_v15, inf }
 0x23f   : > { %v3876_v28 = vpop.eup %3875  ;;  %v1345_v39 = vmul.f32 %v3874_v56, %v4986_v46  ;;  %v1346_v53 = vmul.f32 %v3874_v56, %v4994_v50  ;;  %3891 = vrcp.f32 %v1192_v47  ;;  %v1160_v34 = vsel %vm1158_vm0, %v1159_v32, %v1157_v30 }
 0x240   : > { %v3878_v55 = vpop.eup %3877  ;;  %v916_v5 = vsel %vm915_vm1, %v5251_v48, %v914_v17  ;;  %v1162_v51 = vmul.f32 %v3876_v28, %v5265_v21  ;;  %v1312_v50 = vmax.f32 %v1160_v34, 1e-12  ;;  %3893 = vrsqrt.f32 %v5323_v15 }
 0x241   : > { %v3880_v43 = vpop.eup %3879  ;;  %v1342_v40 = vmul.f32 %v3878_v55, %v4970_v38  ;;  %v1343_v46 = vmul.f32 %v3878_v55, %v4978_v42  ;;  %v919_v59 = vsel %vm917_vm2, %v918_v63, %v916_v5  ;;  %vm938_vm12 = vcmp.eq.f32.partialorder %v5323_v15, 0.0 }
 0x242   : > { %v1193_v56 = vmax.f32 %v919_v59, 1e-12  ;;  %v1164_v8 = vsel %vm1163_vm3, %v5265_v21, %v1162_v51  ;;  %v921_v32 = vmul.f32 %v3880_v43, %v5267_v31  ;;  %3895 = vrcp.f32 %v1312_v50 }
 0x243   : > { %v1373_v30 = vpack.c.bf16 %v1345_v39, %v1342_v40  ;;  %v1374_v17 = vpack.c.bf16 %v1346_v53, %v1343_v46  ;;  %v1167_v38 = vsel %vm1165_vm4, %v1166_v25, %v1164_v8  ;;  %v1237_v43 = vmul.f32 %v1206_v54, %v4968_v37 }
 0x244   : > { %v3882_v47 = vpop.eup %3881  ;;  %3897 = vrcp.f32 %v1193_v56  ;;  %v1313_v55 = vmax.f32 %v1167_v38, 1e-12  ;;  %v923_v48 = vsel %vm922_vm5, %v5267_v31, %v921_v32  ;;  %v1238_v25 = vmul.f32 %v1206_v54, %v4976_v41  ;;  %v5359_v41 = vpop.xlane.xlu0 %862 }
 0x245   : > { %v3884_v42 = vpop.eup %3883  ;;  %v1169_v51 = vmul.f32 %v3882_v47, %v5290_v12  ;;  %1389 = vst [vmem:[#allocation3 + $0x40] sm:$0xff] %v1373_v30  ;;  %1390 = vst [vmem:[#allocation3 + $0x48] sm:$0xff] %v1374_v17  ;;  %v926_v39 = vsel %vm924_vm6, %v925_v61, %v923_v48  ;;  %v939_v32 = vand.u32 2147483648, %v5323_v15  ;;  %vm943_vm13 = vcmp.eq.f32.partialorder %v5359_v41, inf }
 0x246   : > { %v3886_v63 = vpop.eup %3885  ;;  %v1208_v28 = vmul.f32 10.0, %v3884_v42  ;;  %3899 = vrcp.f32 %v1313_v55  ;;  %v1194_v53 = vmax.f32 %v926_v39, 1e-12  ;;  %vm945_vm14 = vcmp.eq.f32.partialorder %v5359_v41, 0.0 }
 0x247   : > { %v3888_v21 = vpop.eup %3887  ;;  %v1171_v34 = vsel %vm1170_vm7, %v5290_v12, %v1169_v51  ;;  %v1210_v31 = vmul.f32 10.0, %v3886_v63 }
 0x248   : > { %v1239_v5 = vmul.f32 %v1208_v28, %v4984_v45  ;;  %v1240_v40 = vmul.f32 %v1208_v28, %v4992_v49  ;;  %v1174_v37 = vsel %vm1172_vm8, %v1173_v1, %v1171_v34  ;;  %v928_v46 = vmul.f32 %v3888_v21, %v5295_v10  ;;  %v3890_v54 = vpop.eup %3889  ;;  %v5363_v49 = vpop.xlane.xlu1 %865 }
 0x249   : > { %3901 = vrcp.f32 %v1194_v53  ;;  %v1314_v61 = vmax.f32 %v1174_v37, 1e-12  ;;  %v932_v45 = vand.u32 2147483648, %v5295_v10  ;;  %v3892_v12 = vpop.eup %3891  ;;  %v1241_v30 = vmul.f32 %v1210_v31, %v5000_v57  ;;  %v5377_v63 = vpop.xlane.xlu0 %868 }
 0x24a   : > { %v1269_v50 = vpack.c.bf16 %v1239_v5, %v1237_v43  ;;  %v1270_v59 = vpack.c.bf16 %v1240_v40, %v1238_v25  ;;  %v930_v1 = vsel %vm929_vm9, %v5295_v10, %v928_v46  ;;  %v1212_v56 = vmul.f32 10.0, %v3892_v12  ;;  %v3894_v47 = vpop.eup %3893 }
 0x24b   : > { %3903 = vrcp.f32 %v1314_v61  ;;  %v933_v8 = vsel %vm931_vm10, %v932_v45, %v930_v1  ;;  %v1242_v17 = vmul.f32 %v1210_v31, %v5006_v60  ;;  %v1348_v42 = vmul.f32 %v3890_v54, %v5002_v58 }
 0x24c   : > { %1285 = vst [vmem:[#allocation2] sm:$0xff] %v1269_v50  ;;  %1286 = vst [vmem:[#allocation2 + $0x8] sm:$0xff] %v1270_v59  ;;  %3905 = vrsqrt.f32 %v5359_v41  ;;  %v1195_v38 = vmax.f32 %v933_v8, 1e-12  ;;  %v3896_v10 = vpop.eup %3895  ;;  %v1243_v55 = vmul.f32 %v1212_v56, %v5014_v0  ;;  %v1244_v48 = vmul.f32 %v1212_v56, %v5022_v4  ;;  %v5385_v0 = vpop.xlane.xlu1 %871 }
 0x24d   : > { %3907 = vrsqrt.f32 %v5363_v49  ;;  %v935_v51 = vmul.f32 %v3894_v47, %v5323_v15  ;;  %v1349_v28 = vmul.f32 %v3890_v54, %v5010_v62  ;;  %v1351_v57 = vmul.f32 %v3896_v10, %v5018_v2 }
 0x24e   : > { %v3898_v43 = vpop.eup %3897  ;;  %v1352_v60 = vmul.f32 %v3896_v10, %v5026_v6  ;;  %3909 = vrcp.f32 %v1195_v38  ;;  %v1271_v39 = vpack.c.bf16 %v1243_v55, %v1241_v30  ;;  %v1272_v21 = vpack.c.bf16 %v1244_v48, %v1242_v17 }
 0x24f   : > { %v1214_v25 = vmul.f32 10.0, %v3898_v43  ;;  %v937_v58 = vsel %vm936_vm11, %v5323_v15, %v935_v51  ;;  %v1375_v53 = vpack.c.bf16 %v1351_v57, %v1348_v42  ;;  %3911 = vrsqrt.f32 %v5377_v63 }
 0x250   : > { %v3900_v4 = vpop.eup %3899  ;;  %v1376_v34 = vpack.c.bf16 %v1352_v60, %v1349_v28  ;;  %v940_v62 = vsel %vm938_vm12, %v939_v32, %v937_v58  ;;  %1287 = vst [vmem:[#allocation2 + $0x10] sm:$0xff] %v1271_v39  ;;  %1288 = vst [vmem:[#allocation2 + $0x18] sm:$0xff] %v1272_v21  ;;  %3913 = vrsqrt.f32 %v5385_v0  ;;  %v5392_v37 = vpop.xlane.xlu0 %874  ;;  %vm950_vm15 = vcmp.eq.f32.partialorder %v5363_v49, inf }
 0x251   : > { %1391 = vst [vmem:[#allocation3 + $0x50] sm:$0xff] %v1375_v53  ;;  %v1196_v6 = vmax.f32 %v940_v62, 1e-12  ;;  %v1245_v5 = vmul.f32 %v1214_v25, %v5032_v13  ;;  %v1246_v31 = vmul.f32 %v1214_v25, %v5038_v16  ;;  %v1354_v15 = vmul.f32 %v3900_v4, %v5034_v14 }
 0x252   : > { %1392 = vst [vmem:[#allocation3 + $0x58] sm:$0xff] %v1376_v34  ;;  %v1355_v61 = vmul.f32 %v3900_v4, %v5042_v18  ;;  %v5401_v12 = vpop.xlane.xlu1 %877  ;;  %v946_v14 = vand.u32 2147483648, %v5359_v41  ;;  %v953_v30 = vand.u32 2147483648, %v5363_v49  ;;  %vm952_vm0 = vcmp.eq.f32.partialorder %v5363_v49, 0.0 }
 0x253   : > { %v3902_v2 = vpop.eup %3901  ;;  %3915 = vrcp.f32 %v1196_v6  ;;  %vm957_vm1 = vcmp.eq.f32.partialorder %v5377_v63, inf  ;;  %vm959_vm2 = vcmp.eq.f32.partialorder %v5377_v63, 0.0  ;;  %v960_v48 = vand.u32 2147483648, %v5377_v63 }
 0x254   : > { %v1216_v40 = vmul.f32 10.0, %v3902_v2  ;;  %3917 = vrsqrt.f32 %v5392_v37  ;;  %vm964_vm3 = vcmp.eq.f32.partialorder %v5385_v0, inf  ;;  %vm966_vm4 = vcmp.eq.f32.partialorder %v5385_v0, 0.0 }
 0x255   : > { %v3904_v46 = vpop.eup %3903  ;;  %3919 = vrsqrt.f32 %v5401_v12  ;;  %v967_v21 = vand.u32 2147483648, %v5385_v0  ;;  %vm971_vm5 = vcmp.eq.f32.partialorder %v5392_v37, inf  ;;  %vm973_vm6 = vcmp.eq.f32.partialorder %v5392_v37, 0.0 }
 0x256   : > { %v3906_v54 = vpop.eup %3905  ;;  %v1247_v50 = vmul.f32 %v1216_v40, %v5046_v20  ;;  %v1248_v59 = vmul.f32 %v1216_v40, %v5054_v24  ;;  %v1357_v45 = vmul.f32 %v3904_v46, %v5050_v22  ;;  %v1358_v13 = vmul.f32 %v3904_v46, %v5058_v26 }
 0x257   : > { %v3908_v1 = vpop.eup %3907  ;;  %v942_v56 = vmul.f32 %v3906_v54, %v5359_v41  ;;  %v974_v2 = vand.u32 2147483648, %v5392_v37  ;;  %vm978_vm7 = vcmp.eq.f32.partialorder %v5401_v12, inf  ;;  %vm980_vm8 = vcmp.eq.f32.partialorder %v5401_v12, 0.0 }
 0x258   : > { %v1273_v16 = vpack.c.bf16 %v1247_v50, %v1245_v5  ;;  %v1274_v18 = vpack.c.bf16 %v1248_v59, %v1246_v31  ;;  %v1377_v20 = vpack.c.bf16 %v1357_v45, %v1354_v15  ;;  %v1378_v8 = vpack.c.bf16 %v1358_v13, %v1355_v61  ;;  %v3910_v24 = vpop.eup %3909  ;;  %v5411_v32 = vpop.xlane.xlu0 %880 }
 0x259   : > { %v944_v22 = vsel %vm943_vm13, %v5359_v41, %v942_v56  ;;  %v949_v26 = vmul.f32 %v3908_v1, %v5363_v49  ;;  %3921 = vrsqrt.f32 %v5411_v32  ;;  %v3912_v17 = vpop.eup %3911  ;;  %v1218_v43 = vmul.f32 10.0, %v3910_v24 }
 0x25a   : > { %1289 = vst [vmem:[#allocation2 + $0x20] sm:$0xff] %v1273_v16  ;;  %1290 = vst [vmem:[#allocation2 + $0x28] sm:$0xff] %v1274_v18  ;;  %v947_v47 = vsel %vm945_vm14, %v946_v14, %v944_v22  ;;  %v5419_v10 = vpop.xlane.xlu1 %883  ;;  %v956_v55 = vmul.f32 %v3912_v17, %v5377_v63  ;;  %v3914_v51 = vpop.eup %3913  ;;  %v981_v54 = vand.u32 2147483648, %v5401_v12  ;;  %vm985_vm9 = vcmp.eq.f32.partialorder %v5411_v32, inf }
 0x25b   : > { %1393 = vst [vmem:[#allocation3 + $0x60] sm:$0xff] %v1377_v20  ;;  %1394 = vst [vmem:[#allocation3 + $0x68] sm:$0xff] %v1378_v8  ;;  %v1197_v38 = vmax.f32 %v947_v47, 1e-12  ;;  %v951_v41 = vsel %vm950_vm15, %v5363_v49, %v949_v26  ;;  %v963_v49 = vmul.f32 %v3914_v51, %v5385_v0  ;;  %v1249_v53 = vmul.f32 %v1218_v43, %v5064_v33 }
 0x25c   : > { %v954_v42 = vsel %vm952_vm0, %v953_v30, %v951_v41  ;;  %v958_v57 = vsel %vm957_vm1, %v5377_v63, %v956_v55  ;;  %v1250_v34 = vmul.f32 %v1218_v43, %v5070_v36  ;;  %v988_v13 = vand.u32 2147483648, %v5411_v32 }
 0x25d   : > { %3923 = vrcp.f32 %v1197_v38  ;;  %v1198_v28 = vmax.f32 %v954_v42, 1e-12  ;;  %v3916_v60 = vpop.eup %3915  ;;  %v961_v39 = vsel %vm959_vm2, %v960_v48, %v958_v57  ;;  %v965_v4 = vsel %vm964_vm3, %v5385_v0, %v963_v49 }
 0x25e   : > { %3925 = vrsqrt.f32 %v5419_v10  ;;  %v1220_v25 = vmul.f32 10.0, %v3916_v60  ;;  %v1199_v58 = vmax.f32 %v961_v39, 1e-12  ;;  %v3918_v63 = vpop.eup %3917  ;;  %v968_v62 = vsel %vm966_vm4, %v967_v21, %v965_v4 }
 0x25f   : > { %3927 = vrcp.f32 %v1198_v28  ;;  %v1200_v46 = vmax.f32 %v968_v62, 1e-12  ;;  %v3920_v31 = vpop.eup %3919  ;;  %v970_v0 = vmul.f32 %v3918_v63, %v5392_v37  ;;  %vm987_vm10 = vcmp.eq.f32.partialorder %v5411_v32, 0.0 }
 0x260   : > { %v5436_v6 = vpop.xlane.xlu0 %1030  ;;  %v1251_v5 = vmul.f32 %v1220_v25, %v5078_v44  ;;  %v1252_v40 = vmul.f32 %v1220_v25, %v5086_v52  ;;  %3929 = vrcp.f32 %v1199_v58  ;;  %v977_v44 = vmul.f32 %v3920_v31, %v5401_v12 }
 0x261   : > { %3931 = vrsqrt.f32 %v5436_v6  ;;  %v972_v52 = vsel %vm971_vm5, %v5392_v37, %v970_v0  ;;  %vm992_vm11 = vcmp.eq.f32.partialorder %v5419_v10, inf  ;;  %vm994_vm12 = vcmp.eq.f32.partialorder %v5419_v10, 0.0 }
 0x262   : > { %v5444_v33 = vpop.xlane.xlu1 %1033  ;;  %v1275_v15 = vpack.c.bf16 %v1251_v5, %v1249_v53  ;;  %v1276_v61 = vpack.c.bf16 %v1252_v40, %v1250_v34  ;;  %3933 = vrcp.f32 %v1200_v46  ;;  %v975_v59 = vsel %vm973_vm6, %v974_v2, %v972_v52 }
 0x263   : > { %v3922_v36 = vpop.eup %3921  ;;  %3935 = vrsqrt.f32 %v5444_v33  ;;  %v979_v45 = vsel %vm978_vm7, %v5401_v12, %v977_v44  ;;  %v1201_v56 = vmax.f32 %v975_v59, 1e-12  ;;  %v995_v12 = vand.u32 2147483648, %v5419_v10  ;;  %v7090_v59 = vld [vmem:[#allocation28_spill] sm:$0xff] }
 0x264   : > { %v984_v50 = vmul.f32 %v3922_v36, %v5411_v32  ;;  %1291 = vst [vmem:[#allocation2 + $0x30] sm:$0xff] %v1275_v15  ;;  %1292 = vst [vmem:[#allocation2 + $0x38] sm:$0xff] %v1276_v61  ;;  %v982_v14 = vsel %vm980_vm8, %v981_v54, %v979_v45  ;;  %vm1079_vm13 = vcmp.eq.f32.partialorder %v5436_v6, inf  ;;  %vm1081_vm14 = vcmp.eq.f32.partialorder %v5436_v6, 0.0  ;;  %v7088_v61 = vld [vmem:[#allocation26_spill] sm:$0xff]  ;;  %v7089_v54 = vld [vmem:[#allocation27_spill] sm:$0xff] }
 0x265   : > { %v1202_v20 = vmax.f32 %v982_v14, 1e-12  ;;  %3937 = vrcp.f32 %v1201_v56  ;;  %vm1086_vm15 = vcmp.eq.f32.partialorder %v5444_v33, inf  ;;  %v1089_v58 = vand.u32 2147483648, %v5444_v33 }
 0x266   : > { %v986_v16 = vsel %vm985_vm9, %v5411_v32, %v984_v50  ;;  %vm1088_vm0 = vcmp.eq.f32.partialorder %v5444_v33, 0.0 }
 0x267   : > { %v3924_v1 = vpop.eup %3923  ;;  %v989_v8 = vsel %vm987_vm10, %v988_v13, %v986_v16  ;;  %3939 = vrcp.f32 %v1202_v20 }
 0x268   : > { %v3926_v18 = vpop.eup %3925  ;;  %v1222_v37 = vmul.f32 10.0, %v3924_v1  ;;  %v1203_v22 = vmax.f32 %v989_v8, 1e-12  ;;  %v5466_v47 = vpop.xlane.xlu0 %1036 }
 0x269   : > { %v3928_v24 = vpop.eup %3927  ;;  %v991_v26 = vmul.f32 %v3926_v18, %v5419_v10  ;;  %vm1093_vm1 = vcmp.eq.f32.partialorder %v5466_v47, inf  ;;  %vm1095_vm2 = vcmp.eq.f32.partialorder %v5466_v47, 0.0  ;;  %v1096_v56 = vand.u32 2147483648, %v5466_v47 }
 0x26a   : > { %v1224_v30 = vmul.f32 10.0, %v3928_v24  ;;  %v1253_v32 = vmul.f32 %v1222_v37, %v5100_v3  ;;  %v1254_v17 = vmul.f32 %v1222_v37, %v5104_v7  ;;  %3941 = vrcp.f32 %v1203_v22  ;;  %v5473_v41 = vpop.xlane.xlu1 %1039  ;;  %v3930_v42 = vpop.eup %3929 }
 0x26b   : > { %v993_v38 = vsel %vm992_vm11, %v5419_v10, %v991_v26  ;;  %3943 = vrsqrt.f32 %v5466_v47  ;;  %v3932_v43 = vpop.eup %3931  ;;  %v1226_v28 = vmul.f32 10.0, %v3930_v42  ;;  %vm1100_vm3 = vcmp.eq.f32.partialorder %v5473_v41, inf }
 0x26c   : > { %v1255_v55 = vmul.f32 %v1224_v30, %v5108_v9  ;;  %v1256_v48 = vmul.f32 %v1224_v30, %v5112_v11  ;;  %v996_v51 = vsel %vm994_vm12, %v995_v12, %v993_v38  ;;  %3945 = vrsqrt.f32 %v5473_v41  ;;  %v3934_v3 = vpop.eup %3933  ;;  %v7091_v30 = vld [vmem:[#allocation29_spill] sm:$0xff] }
 0x26d   : > { %v1204_v57 = vmax.f32 %v996_v51, 1e-12  ;;  %v1078_v49 = vmul.f32 %v3932_v43, %v5436_v6  ;;  %v3936_v9 = vpop.eup %3935  ;;  %v1228_v60 = vmul.f32 10.0, %v3934_v3  ;;  %v1082_v11 = vand.u32 2147483648, %v5436_v6  ;;  %v7093_v51 = vld [vmem:[#allocation31_spill] sm:$0xff] }
 0x26e   : > { %v1277_v7 = vpack.c.bf16 %v1255_v55, %v1253_v32  ;;  %v1278_v10 = vpack.c.bf16 %v1256_v48, %v1254_v17  ;;  %v1257_v39 = vmul.f32 %v1226_v28, %v5116_v19  ;;  %v1085_v25 = vmul.f32 %v3936_v9, %v5444_v33  ;;  %v7092_v55 = vld [vmem:[#allocation30_spill] sm:$0xff] }
 0x26f   : > { %3947 = vrcp.f32 %v1204_v57  ;;  %v1080_v21 = vsel %vm1079_vm13, %v5436_v6, %v1078_v49  ;;  %v1258_v4 = vmul.f32 %v1226_v28, %v5120_v23  ;;  %v1259_v63 = vmul.f32 %v1228_v60, %v5124_v27  ;;  %v3938_v19 = vpop.eup %3937  ;;  %v7094_v28 = vld [vmem:[#allocation32_spill] sm:$0xff] }
 0x270   : > { %1293 = vst [vmem:[#allocation2 + $0x40] sm:$0xff] %v1277_v7  ;;  %1294 = vst [vmem:[#allocation2 + $0x48] sm:$0xff] %v1278_v10  ;;  %v1260_v53 = vmul.f32 %v1228_v60, %v5128_v29  ;;  %v1083_v34 = vsel %vm1081_vm14, %v1082_v11, %v1080_v21  ;;  %v5491_v62 = vpop.xlane.xlu0 %1042  ;;  %v1087_v5 = vsel %vm1086_vm15, %v5444_v33, %v1085_v25  ;;  %v1230_v27 = vmul.f32 10.0, %v3938_v19 }
 0x271   : > { %v1301_v2 = vmax.f32 %v1083_v34, 1e-12  ;;  %3949 = vrsqrt.f32 %v5491_v62  ;;  %v1279_v6 = vpack.c.bf16 %v1259_v63, %v1257_v39  ;;  %v1090_v46 = vsel %vm1088_vm0, %v1089_v58, %v1087_v5  ;;  %v3940_v23 = vpop.eup %3939  ;;  %v7095_v58 = vld [vmem:[#allocation33_spill] sm:$0xff]  ;;  %v7096_v34 = vld [vmem:[#allocation34_spill] sm:$0xff]  ;;  %v7097_v5 = vld [vmem:[#allocation35_spill] sm:$0xff] }
 0x272   : > { %v1280_v40 = vpack.c.bf16 %v1260_v53, %v1258_v4  ;;  %v5496_v31 = vpop.xlane.xlu1 %1045  ;;  %v1302_v29 = vmax.f32 %v1090_v46, 1e-12  ;;  %v1232_v36 = vmul.f32 10.0, %v3940_v23  ;;  %v1261_v15 = vmul.f32 %v1230_v27, %v5132_v35 }
 0x273   : > { %3951 = vrcp.f32 %v1301_v2  ;;  %1295 = vst [vmem:[#allocation2 + $0x50] sm:$0xff] %v1279_v6  ;;  %v1262_v44 = vmul.f32 %v1230_v27, %v7088_v61  ;;  %vm1102_vm4 = vcmp.eq.f32.partialorder %v5473_v41, 0.0  ;;  %v1103_v20 = vand.u32 2147483648, %v5473_v41  ;;  %v7098_v6 = vld [vmem:[#allocation36_spill] sm:$0xff] }
 0x274   : > { %v3942_v0 = vpop.eup %3941  ;;  %1296 = vst [vmem:[#allocation2 + $0x58] sm:$0xff] %v1280_v40  ;;  %3953 = vrsqrt.f32 %v5496_v31  ;;  %v1263_v50 = vmul.f32 %v1232_v36, %v7089_v54  ;;  %v1264_v45 = vmul.f32 %v1232_v36, %v7090_v59  ;;  %vm1107_vm5 = vcmp.eq.f32.partialorder %v5491_v62, inf }
 0x275   : > { %v3944_v33 = vpop.eup %3943  ;;  %3955 = vrcp.f32 %v1302_v29  ;;  %v1234_v13 = vmul.f32 10.0, %v3942_v0  ;;  %vm1109_vm6 = vcmp.eq.f32.partialorder %v5491_v62, 0.0  ;;  %v1110_v9 = vand.u32 2147483648, %v5491_v62 }
 0x276   : > { %v3946_v52 = vpop.eup %3945  ;;  %v1092_v1 = vmul.f32 %v3944_v33, %v5466_v47  ;;  %v1281_v16 = vpack.c.bf16 %v1263_v50, %v1261_v15  ;;  %v1282_v18 = vpack.c.bf16 %v1264_v45, %v1262_v44  ;;  %vm1114_vm7 = vcmp.eq.f32.partialorder %v5496_v31, inf  ;;  %v7099_v50 = vld [vmem:[#allocation37_spill] sm:$0xff]  ;;  %v7100_v45 = vld [vmem:[#allocation38_spill] sm:$0xff] }
 0x277   : > { %v1099_v14 = vmul.f32 %v3946_v52, %v5473_v41  ;;  %v1265_v12 = vmul.f32 %v1234_v13, %v7091_v30  ;;  %v1266_v48 = vmul.f32 %v1234_v13, %v7092_v55  ;;  %v1117_v39 = vand.u32 2147483648, %v5496_v31 }
 0x278   : > { %v1094_v37 = vsel %vm1093_vm1, %v5466_v47, %v1092_v1  ;;  %v5514_v8 = vpop.xlane.xlu0 %1048  ;;  %1297 = vst [vmem:[#allocation2 + $0x60] sm:$0xff] %v1281_v16  ;;  %1298 = vst [vmem:[#allocation2 + $0x68] sm:$0xff] %v1282_v18  ;;  %vm1116_vm8 = vcmp.eq.f32.partialorder %v5496_v31, 0.0  ;;  %v7101_v1 = vld [vmem:[#allocation39_spill] sm:$0xff] }
 0x279   : > { %v3948_v35 = vpop.eup %3947  ;;  %v1097_v22 = vsel %vm1095_vm2, %v1096_v56, %v1094_v37  ;;  %v1101_v26 = vsel %vm1100_vm3, %v5473_v41, %v1099_v14  ;;  %3957 = vrsqrt.f32 %v5514_v8  ;;  %vm1121_vm9 = vcmp.eq.f32.partialorder %v5514_v8, inf  ;;  %v7102_v14 = vld [vmem:[#allocation40_spill] sm:$0xff] }
 0x27a   : > { %v1236_v24 = vmul.f32 10.0, %v3948_v35  ;;  %v1303_v32 = vmax.f32 %v1097_v22, 1e-12  ;;  %v1104_v17 = vsel %vm1102_vm4, %v1103_v20, %v1101_v26  ;;  %v5521_v38 = vpop.xlane.xlu1 %1051  ;;  %v1124_v15 = vand.u32 2147483648, %v5514_v8 }
 0x27b   : > { %v3950_v42 = vpop.eup %3949  ;;  %v1304_v57 = vmax.f32 %v1104_v17, 1e-12  ;;  %vm1123_vm10 = vcmp.eq.f32.partialorder %v5514_v8, 0.0  ;;  %vm1128_vm11 = vcmp.eq.f32.partialorder %v5521_v38, inf  ;;  %vm1130_vm12 = vcmp.eq.f32.partialorder %v5521_v38, 0.0 }
 0x27c   : > { %v1267_v43 = vmul.f32 %v1236_v24, %v7093_v51  ;;  %v1268_v47 = vmul.f32 %v1236_v24, %v7094_v28  ;;  %3959 = vrcp.f32 %v1303_v32  ;;  %v1106_v41 = vmul.f32 %v3950_v42, %v5491_v62  ;;  %v5529_v3 = vpop.xlane.xlu0 %1072 }
 0x27d   : > { %v3952_v7 = vpop.eup %3951  ;;  %3961 = vrcp.f32 %v1304_v57  ;;  %v1131_v24 = vand.u32 2147483648, %v5521_v38  ;;  %vm1177_vm13 = vcmp.eq.f32.partialorder %v5529_v3, inf  ;;  %vm1179_vm14 = vcmp.eq.f32.partialorder %v5529_v3, 0.0  ;;  %v7103_v57 = vld [vmem:[#allocation41_spill] sm:$0xff] }
 0x27e   : > { %v1283_v10 = vpack.c.bf16 %v1267_v43, %v1265_v12  ;;  %v1284_v49 = vpack.c.bf16 %v1268_v47, %v1266_v48  ;;  %v3954_v60 = vpop.eup %3953  ;;  %v1108_v11 = vsel %vm1107_vm5, %v5491_v62, %v1106_v41  ;;  %3963 = vrsqrt.f32 %v5521_v38  ;;  %v5536_v21 = vpop.xlane.xlu1 %1075 }
 0x27f   : > { %v3956_v25 = vpop.eup %3955  ;;  %v1318_v4 = vmul.f32 %v3952_v7, %v7095_v58  ;;  %v1111_v63 = vsel %vm1109_vm6, %v1110_v9, %v1108_v11  ;;  %v1113_v53 = vmul.f32 %v3954_v60, %v5496_v31  ;;  %3965 = vrsqrt.f32 %v5529_v3  ;;  %v7106_v60 = vld [vmem:[#allocation44_spill] sm:$0xff] }
 0x280   : > { %1299 = vst [vmem:[#allocation2 + $0x70] sm:$0xff] %v1283_v10  ;;  %1300 = vst [vmem:[#allocation2 + $0x78] sm:$0xff] %v1284_v49  ;;  %v1319_v2 = vmul.f32 %v3952_v7, %v7096_v34  ;;  %v1321_v19 = vmul.f32 %v3956_v25, %v7097_v5  ;;  %v1322_v40 = vmul.f32 %v3956_v25, %v7098_v6  ;;  %v1305_v46 = vmax.f32 %v1111_v63, 1e-12  ;;  %v7104_v7 = vld [vmem:[#allocation42_spill] sm:$0xff]  ;;  %v7105_v49 = vld [vmem:[#allocation43_spill] sm:$0xff] }
 0x281   : > { %v1115_v23 = vsel %vm1114_vm7, %v5496_v31, %v1113_v53  ;;  %3967 = vrsqrt.f32 %v5536_v21  ;;  %v1180_v12 = vand.u32 2147483648, %v5529_v3  ;;  %vm1184_vm15 = vcmp.eq.f32.partialorder %v5536_v21, inf  ;;  %v7107_v53 = vld [vmem:[#allocation45_spill] sm:$0xff] }
 0x282   : > { %v1365_v27 = vpack.c.bf16 %v1321_v19, %v1318_v4  ;;  %v1366_v62 = vpack.c.bf16 %v1322_v40, %v1319_v2  ;;  %3969 = vrcp.f32 %v1305_v46  ;;  %v1118_v29 = vsel %vm1116_vm8, %v1117_v39, %v1115_v23  ;;  %v7108_v2 = vld [vmem:[#allocation46_spill] sm:$0xff]  ;;  %v7109_v19 = vld [vmem:[#allocation47_spill] sm:$0xff]  ;;  %v7110_v40 = vld [vmem:[#allocation48_spill] sm:$0xff] }
 0x283   : > { %v3958_v0 = vpop.eup %3957  ;;  %v1306_v36 = vmax.f32 %v1118_v29, 1e-12  ;;  %vm1186_vm0 = vcmp.eq.f32.partialorder %v5536_v21, 0.0  ;;  %v7111_v29 = vld [vmem:[#allocation22_spill] sm:$0xff] }
 0x284   : > { %1381 = vst [vmem:[#allocation3] sm:$0xff] %v1365_v27  ;;  %1382 = vst [vmem:[#allocation3 + $0x8] sm:$0xff] %v1366_v62  ;;  %v1120_v33 = vmul.f32 %v3958_v0, %v5514_v8 }
 0x285   : > { %3971 = vrcp.f32 %v1306_v36  ;;  %v7112_v36 = vld [vmem:[#allocation23_spill] sm:$0xff] }
 0x286   : > { %v3960_v61 = vpop.eup %3959  ;;  %v1122_v31 = vsel %vm1121_vm9, %v5514_v8, %v1120_v33 }
 0x287   : > { %v3962_v44 = vpop.eup %3961  ;;  %v1125_v52 = vsel %vm1123_vm10, %v1124_v15, %v1122_v31  ;;  %v1324_v59 = vmul.f32 %v3960_v61, %v7099_v50  ;;  %v1325_v13 = vmul.f32 %v3960_v61, %v7100_v45  ;;  %v7113_v15 = vld [vmem:[#allocation24_spill] sm:$0xff]  ;;  %v7114_v31 = vld [vmem:[#allocation25_spill] sm:$0xff] }
 0x288   : > { %v3964_v54 = vpop.eup %3963  ;;  %v1327_v56 = vmul.f32 %v3962_v44, %v7101_v1  ;;  %v1328_v35 = vmul.f32 %v3962_v44, %v7102_v14  ;;  %v1307_v18 = vmax.f32 %v1125_v52, 1e-12 }
 0x289   : > { %v3966_v16 = vpop.eup %3965  ;;  %v1127_v37 = vmul.f32 %v3964_v54, %v5521_v38 }
 0x28a   : > { %v1367_v20 = vpack.c.bf16 %v1327_v56, %v1324_v59  ;;  %v1368_v8 = vpack.c.bf16 %v1328_v35, %v1325_v13  ;;  %v1176_v22 = vmul.f32 %v3966_v16, %v5529_v3  ;;  %3973 = vrcp.f32 %v1307_v18 }
 0x28b   : > { %v3968_v26 = vpop.eup %3967  ;;  %v1129_v30 = vsel %vm1128_vm11, %v5521_v38, %v1127_v37  ;;  %v1187_v38 = vand.u32 2147483648, %v5536_v21 }
 0x28c   : > { %v3970_v32 = vpop.eup %3969  ;;  %1383 = vst [vmem:[#allocation3 + $0x10] sm:$0xff] %v1367_v20  ;;  %1384 = vst [vmem:[#allocation3 + $0x18] sm:$0xff] %v1368_v8  ;;  %v1132_v17 = vsel %vm1130_vm12, %v1131_v24, %v1129_v30  ;;  %v1178_v42 = vsel %vm1177_vm13, %v5529_v3, %v1176_v22  ;;  %v1183_v55 = vmul.f32 %v3968_v26, %v5536_v21 }
 0x28d   : > { %v1308_v48 = vmax.f32 %v1132_v17, 1e-12  ;;  %v1181_v51 = vsel %vm1179_vm14, %v1180_v12, %v1178_v42  ;;  %v1330_v41 = vmul.f32 %v3970_v32, %v7103_v57  ;;  %v1331_v10 = vmul.f32 %v3970_v32, %v7104_v7 }
 0x28e   : > { %v1315_v43 = vmax.f32 %v1181_v51, 1e-12  ;;  %v1185_v28 = vsel %vm1184_vm15, %v5536_v21, %v1183_v55 }
 0x28f   : > { %v3972_v47 = vpop.eup %3971  ;;  %3975 = vrcp.f32 %v1308_v48  ;;  %v1188_v3 = vsel %vm1186_vm0, %v1187_v38, %v1185_v28 }
 0x290   : > { %v1333_v9 = vmul.f32 %v3972_v47, %v7105_v49  ;;  %v1334_v11 = vmul.f32 %v3972_v47, %v7106_v60  ;;  %3977 = vrcp.f32 %v1315_v43  ;;  %v1316_v39 = vmax.f32 %v1188_v3, 1e-12 }
 0x292   : > { %v1369_v25 = vpack.c.bf16 %v1333_v9, %v1330_v41  ;;  %v1370_v58 = vpack.c.bf16 %v1334_v11, %v1331_v10  ;;  %3979 = vrcp.f32 %v1316_v39 }
 0x294   : > { %1385 = vst [vmem:[#allocation3 + $0x20] sm:$0xff] %v1369_v25  ;;  %1386 = vst [vmem:[#allocation3 + $0x28] sm:$0xff] %v1370_v58  ;;  %v3974_v4 = vpop.eup %3973 }
 0x295   : > { %v1336_v34 = vmul.f32 %v3974_v4, %v7107_v53  ;;  %v1337_v5 = vmul.f32 %v3974_v4, %v7108_v2 }
 0x299   : > { %v3976_v21 = vpop.eup %3975 }
 0x29a   : > { %v3978_v63 = vpop.eup %3977  ;;  %v1339_v6 = vmul.f32 %v3976_v21, %v7109_v19  ;;  %v1340_v46 = vmul.f32 %v3976_v21, %v7110_v40 }
 0x29b   : > { %v1360_v0 = vmul.f32 %v3978_v63, %v7111_v29  ;;  %v1361_v33 = vmul.f32 %v3978_v63, %v7112_v36 }
 0x29c   : > { %v3980_v23 = vpop.eup %3979  ;;  %v1371_v27 = vpack.c.bf16 %v1339_v6, %v1336_v34  ;;  %v1372_v62 = vpack.c.bf16 %v1340_v46, %v1337_v5 }
 0x29d   : > { %v1363_v61 = vmul.f32 %v3980_v23, %v7113_v15  ;;  %v1364_v44 = vmul.f32 %v3980_v23, %v7114_v31 }
 0x29e   : > { %1387 = vst [vmem:[#allocation3 + $0x30] sm:$0xff] %v1371_v27  ;;  %1388 = vst [vmem:[#allocation3 + $0x38] sm:$0xff] %v1372_v62 }
 0x29f   : > { %v1379_v52 = vpack.c.bf16 %v1363_v61, %v1360_v0  ;;  %v1380_v54 = vpack.c.bf16 %v1364_v44, %v1361_v33 }
 0x2a1   : > { %1395 = vst [vmem:[#allocation3 + $0x70] sm:$0xff] %v1379_v52  ;;  %1396 = vst [vmem:[#allocation3 + $0x78] sm:$0xff] %v1380_v54 }
 0x2a2 PF: > { %s3605_s28 = sshll.u32 %s4597_s21, 7  ;;  %v1507_v50 = vld [vmem:[#allocation3 + $0x8] sm:$0xff]  ;;  %v1506_v59 = vld [vmem:[#allocation3] sm:$0xff]  ;;  %v1509_v45 = vld [vmem:[#allocation3 + $0x18] sm:$0xff]  ;;  %v4626_v13 = vmov 0   ;;  %vm1522_vm1 = vcmask 261120  }
 0x2a3   : > { %s1430_s30 = sshra.s32 %s3605_s28, 7  ;;  %1547 = vmatprep.subr.bf16.mxu0 %v1507_v50  ;;  %1579 = vmatprep.mubr.bf16.mxu0 %v4626_v13  ;;  %v1508_v1 = vld [vmem:[#allocation3 + $0x10] sm:$0xff]  ;;  %v1511_v18 = vld [vmem:[#allocation3 + $0x28] sm:$0xff]  ;;  %v1514_v26 = vld [vmem:[#allocation3 + $0x40] sm:$0xff]  ;;  %s7421_s5 = sld [smem:[#allocation19_spill]] }
 0x2a4   : > { %s3606_s22 = sshll.u32 %s1430_s30, 3  ;;  %1548 = vmatpush1.bf16.msra.mxu0 %v1506_v59  ;;  %3681 = vmatprep.subr.bf16.mxu1 %v1507_v50  ;;  %v1515_v37 = vld [vmem:[#allocation3 + $0x48] sm:$0xff]  ;;  %v1517_v12 = vld [vmem:[#allocation3 + $0x58] sm:$0xff]  ;;  %v1516_v32 = vld [vmem:[#allocation3 + $0x50] sm:$0xff]  ;;  %s3423_s18 = sshll.u32 %s4917_s26, 4  ;;  %s6771_s18 = int_to_ptr.vmem [resolvable:$true] %s3423_s18 }
 0x2a5   : > { %1549 = vmatprep.subr.bf16.mxu0 %v1509_v45  ;;  %3683 = vmatpush1.bf16.msra.mxu1 %v1506_v59  ;;  %s1433_s10 = scalar_lea.vmem [#allocation2], %s3606_s22  ;;  %v1510_v43 = vld [vmem:[#allocation3 + $0x20] sm:$0xff]  ;;  %v1513_v47 = vld [vmem:[#allocation3 + $0x38] sm:$0xff]  ;;  %v1512_v57 = vld [vmem:[#allocation3 + $0x30] sm:$0xff]  ;;  %s7422_s1 = sld [smem:[#allocation20_spill]] }
 0x2a6   : > { %v1434_v56 = vld [vmem:[%s1433_s10] sm:$0xff]  ;;  %3682 = vmatprep.subr.bf16.mxu1 %v1509_v45  ;;  %1649 = vmatprep.mubr.bf16.mxu1 %v4626_v13  ;;  %v1435_v35 = vld [vmem:[%s1433_s10 + $0x10] sm:$0xff]  ;;  %v1519_v41 = vld [vmem:[#allocation3 + $0x68] sm:$0xff]  ;;  %s7423_s14 = sld [smem:[#allocation141_spill]]  ;;  %s6784_s13 = scalar_lea.sflag [#allocation7], %s271_s2 }
 0x2a7   : > { %v1436_v14 = vld [vmem:[%s1433_s10 + $0x20] sm:$0xff]  ;;  %1442 = vxpose.xlu0.c.b16.start [1/2] (short) %v1434_v56, 128  ;;  %v1437_v16 = vld [vmem:[%s1433_s10 + $0x30] sm:$0xff]  ;;  %s4483_s7 = scalar_lea.vmem %s6771_s18, 512  ;;  %s4627_s28 = smov [#allocation13]  }
 0x2a8   : > { %1458 = vxpose.xlu1.c.b16.start [1/2] (short) %v1436_v14, 128  ;;  %1550 = vmatpush1.bf16.msra.mxu0 %v1508_v1  ;;  %v1438_v20 = vld [vmem:[%s1433_s10 + $0x40] sm:$0xff]  ;;  %v1439_v24 = vld [vmem:[%s1433_s10 + $0x50] sm:$0xff]  ;;  %v1521_v3 = vld [vmem:[#allocation3 + $0x78] sm:$0xff]  ;;  %p4484_p2 = scmp.ne.s32.totalorder %s6771_s18, %s4483_s7  ;;  %s4487_s30 = sshll.u32 %s4627_s28, 4  ;;  %s4488_s30 = int_to_ptr.vmem [resolvable:$false] %s4487_s30 }
 0x2a9   : > { %3684 = vmatpush1.bf16.msra.mxu1 %v1508_v1  ;;  %1821 = vmatprep.subr.bf16.mxu0 %v1515_v37  ;;  %v1440_v8 = vld [vmem:[%s1433_s10 + $0x60] sm:$0xff]  ;;  %v1441_v22 = vld [vmem:[%s1433_s10 + $0x70] sm:$0xff]  ;;  %s3642_s9 = sshll.u32 %s7421_s5, 3  ;;  %s4489_s22 = scalar_lea.vmem %s4488_s30, 1024 }
 0x2aa   : > { %1684 = vmatprep.subr.bf16.mxu1 %v1511_v18  ;;  %v1518_v10 = vld [vmem:[#allocation3 + $0x60] sm:$0xff]  ;;  %v1520_v49 = vld [vmem:[#allocation3 + $0x70] sm:$0xff]  ;;  %s3420_s6 = sadd.s32 %s4597_s21, %s3642_s9  ;;  %p4490_p6 = scmp.lt.s32.totalorder %s6771_s18, %s4488_s30 }
 0x2ab   : > { %1443 = vxpose.xlu0.c.b16.end [2/2] (short) %v1435_v35, 128  ;;  %s3643_s8 = sshll.u32 %s3420_s6, 7  ;;  %p7424_p9 = scmp.ne.s32.totalorder %s7422_s1, 0 }
 0x2ac   : > { %1459 = vxpose.xlu1.c.b16.end [2/2] (short) %v1437_v16, 128  ;;  %s6777_s11 = scalar_lea.hbm %s7423_s14, %s3643_s8  ;;  %p4491_p8 = scmp.lt.s32.totalorder %s4489_s22, %s4483_s7 }
 0x2ad   : > { %p4485_p5 = pnand %p4484_p2, %p7424_p9 }
 0x2ae   : > { %p4492_p12 = por %p4491_p8, %p4490_p6 }
 0x2af   : > { %p4486_p13 = pneg %p4485_p5 }
 0x2b1   : > { %p4493_p4 = pnand %p4492_p12, %p4486_p13 }
 0x2c4   : > { %1474 = vxpose.xlu0.c.b16.start [1/2] (short) %v1438_v20, 128 }
 0x2c5   : > { %1490 = vxpose.xlu1.c.b16.start [1/2] (short) %v1440_v8, 128 }
 0x2c8   : > { %1475 = vxpose.xlu0.c.b16.end [2/2] (short) %v1439_v24, 128 }
 0x2c9   : > { %1491 = vxpose.xlu1.c.b16.end [2/2] (short) %v1441_v22, 128 }
 0x2cd   : > { %3982 = vset.pattern.permute.xlu1 %v4626_v13 }
 0x2d1   : > { %3981 = vset.pattern.permute.xlu0 %v4626_v13 }
 0x30d   : > { %v1450_v30 = vpop.trf.xlu0 }
 0x30e   : > { %3607 = vmatmul.mubr.msk.bf16.vlgmr.msra.gmra.mrb[0].mxu0 %vm1522_vm1, %v1450_v30  ;;  %v1466_v7 = vpop.trf.xlu1 }
 0x30f   : > { %1589 = vmatprep.mubr.bf16.mxu0 %v4626_v13  ;;  %1822 = vmatpush1.bf16.msra.mxu0 %v1514_v26 }
 0x310   : > { %1823 = vmatprep.subr.bf16.mxu0 %v1517_v12 }
 0x311   : > { %v1451_v17 = vpop.trf.xlu0 }
 0x312   : > { %v1467_v9 = vpop.trf.xlu1 }
 0x313   : > { %1824 = vmatpush1.bf16.msra.mxu0 %v1516_v32 }
 0x315   : > { %v1452_v42 = vpop.trf.xlu0 }
 0x316   : > { %3608 = vmatmul.mubr.msk.bf16.gmra.mrb[4].mxu0 %vm1522_vm1, %v1451_v17  ;;  %v1468_v60 = vpop.trf.xlu1 }
 0x317   : > { %1599 = vmatprep.mubr.bf16.mxu0 %v4626_v13 }
 0x319   : > { %v1453_v55 = vpop.trf.xlu0 }
 0x31a   : > { %v1469_v39 = vpop.trf.xlu1 }
 0x31d   : > { %v1454_v48 = vpop.trf.xlu0 }
 0x31e   : > { %3609 = vmatmul.mubr.msk.bf16.gmra.mrb[8].mxu0 %vm1522_vm1, %v1452_v42  ;;  %v1470_v58 = vpop.trf.xlu1 }
 0x31f   : > { %1609 = vmatprep.mubr.bf16.mxu0 %v4626_v13 }
 0x321   : > { %v1455_v51 = vpop.trf.xlu0 }
 0x322   : > { %v1471_v21 = vpop.trf.xlu1 }
 0x325   : > { %v1456_v38 = vpop.trf.xlu0 }
 0x326   : > { %3610 = vmatmul.mubr.msk.bf16.gmra.mrb[12].mxu0 %vm1522_vm1, %v1453_v55  ;;  %v1472_v53 = vpop.trf.xlu1 }
 0x327   : > { %1619 = vmatprep.mubr.bf16.mxu0 %v4626_v13 }
 0x329   : > { %v1457_v28 = vpop.trf.xlu0 }
 0x32a   : > { %3614 = vmatmul.mubr.msk.bf16.vlgmr.msra.gmra.mrb[0].mxu1 %vm1522_vm1, %v1457_v28  ;;  %v1473_v2 = vpop.trf.xlu1 }
 0x32b   : > { %1685 = vmatpush1.bf16.msra.mxu1 %v1510_v43  ;;  %1716 = vmatprep.mubr.bf16.mxu1 %v4626_v13 }
 0x32c   : > { %1686 = vmatprep.subr.bf16.mxu1 %v1513_v47 }
 0x32d   : > { %v1482_v11 = vpop.trf.xlu0 }
 0x32e   : > { %3611 = vmatmul.mubr.msk.bf16.gmra.mrb[16].mxu0 %vm1522_vm1, %v1454_v48  ;;  %v1498_v19 = vpop.trf.xlu1 }
 0x32f   : > { %1687 = vmatpush1.bf16.msra.mxu1 %v1512_v57  ;;  %1629 = vmatprep.mubr.bf16.mxu0 %v4626_v13 }
 0x330   : > { %1958 = vmatprep.subr.bf16.mxu1 %v1519_v41 }
 0x331   : > { %v1483_v25 = vpop.trf.xlu0 }
 0x332   : > { %3615 = vmatmul.mubr.msk.bf16.vlgmr.msra.gmra.mrb[4].mxu1 %vm1522_vm1, %v1466_v7  ;;  %v1499_v40 = vpop.trf.xlu1 }
 0x333   : > { %1726 = vmatprep.mubr.bf16.mxu1 %v4626_v13  ;;  %1959 = vmatpush1.bf16.msra.mxu1 %v1518_v10 }
 0x334   : > { %1960 = vmatprep.subr.bf16.mxu1 %v1521_v3 }
 0x335   : > { %v1484_v4 = vpop.trf.xlu0 }
 0x336   : > { %3612 = vmatmul.mubr.msk.bf16.gmra.mrb[20].mxu0 %vm1522_vm1, %v1455_v51  ;;  %v1500_v23 = vpop.trf.xlu1 }
 0x337   : > { %1639 = vmatprep.mubr.bf16.mxu0 %v4626_v13  ;;  %1961 = vmatpush1.bf16.msra.mxu1 %v1520_v49 }
 0x339   : > { %v1485_v63 = vpop.trf.xlu0 }
 0x33a   : > { %3616 = vmatmul.mubr.msk.bf16.gmra.mrb[8].mxu1 %vm1522_vm1, %v1467_v9  ;;  %v1501_v27 = vpop.trf.xlu1 }
 0x33b   : > { %1736 = vmatprep.mubr.bf16.mxu1 %v4626_v13 }
 0x33d   : > { %v1486_v34 = vpop.trf.xlu0 }
 0x33e   : > { %3613 = vmatmul.mubr.msk.bf16.gmra.mrb[24].mxu0 %vm1522_vm1, %v1456_v38  ;;  %v1502_v62 = vpop.trf.xlu1 }
 0x33f   : > { %1853 = vmatprep.mubr.bf16.mxu0 %v4626_v13 }
 0x341   : > { %v1487_v5 = vpop.trf.xlu0 }
 0x342   : > { %3617 = vmatmul.mubr.msk.bf16.gmra.mrb[12].mxu1 %vm1522_vm1, %v1468_v60  ;;  %v1503_v29 = vpop.trf.xlu1 }
 0x343   : > { %1746 = vmatprep.mubr.bf16.mxu1 %v4626_v13 }
 0x345   : > { %v1488_v6 = vpop.trf.xlu0 }
 0x346   : > { %3623 = vmatmul.mubr.msk.bf16.vlgmr.msra.gmra.mrb[28].mxu0 %vm1522_vm1, %v1482_v11  ;;  %v1504_v0 = vpop.trf.xlu1 }
 0x347   : > { %1863 = vmatprep.mubr.bf16.mxu0 %v4626_v13 }
 0x349   : > { %v1489_v46 = vpop.trf.xlu0 }
 0x34a   : > { %3618 = vmatmul.mubr.msk.bf16.gmra.mrb[16].mxu1 %vm1522_vm1, %v1469_v39  ;;  %v1505_v36 = vpop.trf.xlu1 }
 0x34b   : > { %1756 = vmatprep.mubr.bf16.mxu1 %v4626_v13 }
 0x34e   : > { %3624 = vmatmul.mubr.msk.bf16.gmra.mrb[32].mxu0 %vm1522_vm1, %v1483_v25 }
 0x34f   : > { %1873 = vmatprep.mubr.bf16.mxu0 %v4626_v13 }
 0x352   : > { %3619 = vmatmul.mubr.msk.bf16.gmra.mrb[20].mxu1 %vm1522_vm1, %v1470_v58 }
 0x353   : > { %1766 = vmatprep.mubr.bf16.mxu1 %v4626_v13 }
 0x356   : > { %3625 = vmatmul.mubr.msk.bf16.gmra.mrb[36].mxu0 %vm1522_vm1, %v1484_v4 }
 0x357   : > { %1883 = vmatprep.mubr.bf16.mxu0 %v4626_v13 }
 0x35a   : > { %3620 = vmatmul.mubr.msk.bf16.gmra.mrb[24].mxu1 %vm1522_vm1, %v1471_v21 }
 0x35b   : > { %1776 = vmatprep.mubr.bf16.mxu1 %v4626_v13 }
 0x35e   : > { %3626 = vmatmul.mubr.msk.bf16.gmra.mrb[40].mxu0 %vm1522_vm1, %v1485_v63 }
 0x35f   : > { %1893 = vmatprep.mubr.bf16.mxu0 %v4626_v13 }
 0x362   : > { %3621 = vmatmul.mubr.msk.bf16.gmra.mrb[28].mxu1 %vm1522_vm1, %v1472_v53 }
 0x363   : > { %1786 = vmatprep.mubr.bf16.mxu1 %v4626_v13 }
 0x366   : > { %3627 = vmatmul.mubr.msk.bf16.gmra.mrb[44].mxu0 %vm1522_vm1, %v1486_v34 }
 0x367   : > { %1903 = vmatprep.mubr.bf16.mxu0 %v4626_v13 }
 0x36a   : > { %3622 = vmatmul.mubr.msk.bf16.gmra.mrb[32].mxu1 %vm1522_vm1, %v1473_v2 }
 0x36b   : > { %1990 = vmatprep.mubr.bf16.mxu1 %v4626_v13 }
 0x36e   : > { %3628 = vmatmul.mubr.msk.bf16.gmra.mrb[48].mxu0 %vm1522_vm1, %v1487_v5 }
 0x36f   : > { %1913 = vmatprep.mubr.bf16.mxu0 %v4626_v13 }
 0x372   : > { %3631 = vmatmul.mubr.msk.bf16.vlgmr.msra.gmra.mrb[36].mxu1 %vm1522_vm1, %v1498_v19 }
 0x373   : > { %2000 = vmatprep.mubr.bf16.mxu1 %v4626_v13 }
 0x376   : > { %3629 = vmatmul.mubr.msk.bf16.gmra.mrb[52].mxu0 %vm1522_vm1, %v1488_v6 }
 0x377   : > { %1923 = vmatprep.mubr.bf16.mxu0 %v4626_v13 }
 0x37a   : > { %3632 = vmatmul.mubr.msk.bf16.gmra.mrb[40].mxu1 %vm1522_vm1, %v1499_v40 }
 0x37b   : > { %2010 = vmatprep.mubr.bf16.mxu1 %v4626_v13 }
 0x37e   : > { %3630 = vmatmul.mubr.msk.bf16.gmra.mrb[56].mxu0 %vm1522_vm1, %v1489_v46 }
 0x382   : > { %3633 = vmatmul.mubr.msk.bf16.gmra.mrb[44].mxu1 %vm1522_vm1, %v1500_v23 }
 0x383   : > { %2020 = vmatprep.mubr.bf16.mxu1 %v4626_v13 }
 0x38a   : > { %3634 = vmatmul.mubr.msk.bf16.gmra.mrb[48].mxu1 %vm1522_vm1, %v1501_v27 }
 0x38b   : > { %2030 = vmatprep.mubr.bf16.mxu1 %v4626_v13 }
 0x392   : > { %3635 = vmatmul.mubr.msk.bf16.gmra.mrb[52].mxu1 %vm1522_vm1, %v1502_v62 }
 0x393   : > { %2040 = vmatprep.mubr.bf16.mxu1 %v4626_v13 }
 0x39a   : > { %3636 = vmatmul.mubr.msk.bf16.gmra.mrb[56].mxu1 %vm1522_vm1, %v1503_v29 }
 0x39b   : > { %2050 = vmatprep.mubr.bf16.mxu1 %v4626_v13 }
 0x3a2   : > { %3637 = vmatmul.mubr.msk.bf16.gmra.mrb[60].mxu1 %vm1522_vm1, %v1504_v0 }
 0x3a3   : > { %2060 = vmatprep.mubr.bf16.mxu1 %v4626_v13 }
 0x3aa   : > { %3638 = vmatmul.mubr.msk.bf16.gmra.mrb[64].mxu1 %vm1522_vm1, %v1505_v36 }
 0x3e1   : > { %v5652_v33 = vpop.f32.mrb[0].mxu0 }
 0x3e2   : > { %v5654_v15 = vpop.f32.mrb[1].mxu0 }
 0x3e3   : > { %v5656_v61 = vpop.f32.mrb[2].mxu0  ;;  %v2071_v31 = vmax.f32 %v5652_v33, %v5654_v15 }
 0x3e4   : > { %v5660_v44 = vpop.f32.mrb[3].mxu0 }
 0x3e5   : > { %2072 = vmax.xlane.f32.xlu0 %v2071_v31  ;;  %v2074_v52 = vmax.f32 %v5656_v61, %v5660_v44 }
 0x3e7   : > { %2075 = vmax.xlane.f32.xlu1 %v2074_v52 }
 0x3e9   : > { %v5664_v54 = vpop.f32.mrb[4].mxu0 }
 0x3ea   : > { %v5666_v50 = vpop.f32.mrb[5].mxu0 }
 0x3eb   : > { %v5668_v59 = vpop.f32.mrb[6].mxu0  ;;  %v2077_v45 = vmax.f32 %v5664_v54, %v5666_v50 }
 0x3ec   : > { %v5672_v13 = vpop.f32.mrb[7].mxu0 }
 0x3ed   : > { %2078 = vmax.xlane.f32.xlu0 %v2077_v45  ;;  %v2080_v1 = vmax.f32 %v5668_v59, %v5672_v13 }
 0x3ef   : > { %2081 = vmax.xlane.f32.xlu1 %v2080_v1 }
 0x3f1   : > { %v5676_v56 = vpop.f32.mrb[8].mxu0 }
 0x3f2   : > { %v5678_v14 = vpop.f32.mrb[9].mxu0 }
 0x3f3   : > { %v5680_v35 = vpop.f32.mrb[10].mxu0  ;;  %v2083_v16 = vmax.f32 %v5676_v56, %v5678_v14 }
 0x3f4   : > { %v5684_v18 = vpop.f32.mrb[11].mxu0 }
 0x3f5   : > { %2084 = vmax.xlane.f32.xlu0 %v2083_v16  ;;  %v2086_v37 = vmax.f32 %v5680_v35, %v5684_v18 }
 0x3f7   : > { %2087 = vmax.xlane.f32.xlu1 %v2086_v37 }
 0x3f9   : > { %v5688_v20 = vpop.f32.mrb[12].mxu0 }
 0x3fa   : > { %v5690_v8 = vpop.f32.mrb[13].mxu0 }
 0x3fb   : > { %v5692_v24 = vpop.f32.mrb[14].mxu0  ;;  %v2089_v22 = vmax.f32 %v5688_v20, %v5690_v8 }
 0x3fc   : > { %v5696_v26 = vpop.f32.mrb[15].mxu0 }
 0x3fd   : > { %2090 = vmax.xlane.f32.xlu0 %v2089_v22  ;;  %v5698_v30 = vpop.f32.mrb[0].mxu1  ;;  %v2092_v12 = vmax.f32 %v5692_v24, %v5696_v26 }
 0x3fe   : > { %v5702_v32 = vpop.f32.mrb[1].mxu1 }
 0x3ff   : > { %2093 = vmax.xlane.f32.xlu1 %v2092_v12  ;;  %v5704_v17 = vpop.f32.mrb[2].mxu1  ;;  %v2113_v42 = vmax.f32 %v5698_v30, %v5702_v32 }
 0x400   : > { %v5708_v55 = vpop.f32.mrb[3].mxu1 }
 0x401   : > { %v5710_v48 = vpop.f32.mrb[16].mxu0  ;;  %2114 = vmax.xlane.f32.xlu0 %v2113_v42  ;;  %v2116_v51 = vmax.f32 %v5704_v17, %v5708_v55 }
 0x402   : > { %v5714_v38 = vpop.f32.mrb[17].mxu0 }
 0x403   : > { %v5716_v43 = vpop.f32.mrb[18].mxu0  ;;  %2117 = vmax.xlane.f32.xlu1 %v2116_v51  ;;  %v2095_v28 = vmax.f32 %v5710_v48, %v5714_v38 }
 0x404   : > { %v5720_v47 = vpop.f32.mrb[19].mxu0 }
 0x405   : > { %2096 = vmax.xlane.f32.xlu0 %v2095_v28  ;;  %v5722_v57 = vpop.f32.mrb[4].mxu1  ;;  %v2098_v41 = vmax.f32 %v5716_v43, %v5720_v47 }
 0x406   : > { %v5726_v7 = vpop.f32.mrb[5].mxu1 }
 0x407   : > { %2099 = vmax.xlane.f32.xlu1 %v2098_v41  ;;  %v5728_v10 = vpop.f32.mrb[6].mxu1  ;;  %v2119_v3 = vmax.f32 %v5722_v57, %v5726_v7 }
 0x408   : > { %v5732_v49 = vpop.f32.mrb[7].mxu1 }
 0x409   : > { %v5734_v9 = vpop.f32.mrb[20].mxu0  ;;  %2120 = vmax.xlane.f32.xlu0 %v2119_v3  ;;  %v2122_v60 = vmax.f32 %v5728_v10, %v5732_v49 }
 0x40a   : > { %v5738_v11 = vpop.f32.mrb[21].mxu0 }
 0x40b   : > { %v5740_v39 = vpop.f32.mrb[22].mxu0  ;;  %2123 = vmax.xlane.f32.xlu1 %v2122_v60  ;;  %v2101_v25 = vmax.f32 %v5734_v9, %v5738_v11 }
 0x40c   : > { %v5744_v58 = vpop.f32.mrb[23].mxu0 }
 0x40d   : > { %2102 = vmax.xlane.f32.xlu0 %v2101_v25  ;;  %v5746_v4 = vpop.f32.mrb[8].mxu1  ;;  %v2104_v21 = vmax.f32 %v5740_v39, %v5744_v58 }
 0x40e   : > { %v5750_v63 = vpop.f32.mrb[9].mxu1 }
 0x40f   : > { %2105 = vmax.xlane.f32.xlu1 %v2104_v21  ;;  %v5752_v53 = vpop.f32.mrb[10].mxu1  ;;  %v2125_v34 = vmax.f32 %v5746_v4, %v5750_v63 }
 0x410   : > { %v5756_v2 = vpop.f32.mrb[11].mxu1 }
 0x411   : > { %v5758_v5 = vpop.f32.mrb[24].mxu0  ;;  %2126 = vmax.xlane.f32.xlu0 %v2125_v34  ;;  %v2128_v19 = vmax.f32 %v5752_v53, %v5756_v2 }
 0x412   : > { %v5762_v6 = vpop.f32.mrb[25].mxu0 }
 0x413   : > { %v5764_v40 = vpop.f32.mrb[26].mxu0  ;;  %2129 = vmax.xlane.f32.xlu1 %v2128_v19  ;;  %v2107_v46 = vmax.f32 %v5758_v5, %v5762_v6 }
 0x414   : > { %v5768_v23 = vpop.f32.mrb[27].mxu0 }
 0x415   : > { %2108 = vmax.xlane.f32.xlu0 %v2107_v46  ;;  %v5770_v27 = vpop.f32.mrb[12].mxu1  ;;  %v2110_v62 = vmax.f32 %v5764_v40, %v5768_v23 }
 0x416   : > { %v5774_v29 = vpop.f32.mrb[13].mxu1 }
 0x417   : > { %2111 = vmax.xlane.f32.xlu1 %v2110_v62  ;;  %v5776_v0 = vpop.f32.mrb[14].mxu1  ;;  %v2131_v36 = vmax.f32 %v5770_v27, %v5774_v29 }
 0x418   : > { %v5780_v31 = vpop.f32.mrb[15].mxu1 }
 0x419   : > { %2132 = vmax.xlane.f32.xlu0 %v2131_v36  ;;  %v5782_v52 = vpop.f32.mrb[28].mxu0  ;;  %v2134_v45 = vmax.f32 %v5776_v0, %v5780_v31 }
 0x41a   : > { %v5786_v1 = vpop.f32.mrb[29].mxu0 }
 0x41b   : > { %2135 = vmax.xlane.f32.xlu1 %v2134_v45  ;;  %v5788_v16 = vpop.f32.mrb[30].mxu0  ;;  %v2167_v37 = vmax.f32 %v5782_v52, %v5786_v1 }
 0x41c   : > { %7115 = vst [vmem:[#allocation49_spill] sm:$0xff] %v5788_v16  ;;  %v5792_v22 = vpop.f32.mrb[31].mxu0 }
 0x41d   : > { %7116 = vst [vmem:[#allocation50_spill] sm:$0xff] %v5792_v22  ;;  %v5794_v12 = vpop.f32.mrb[16].mxu1  ;;  %2168 = vmax.xlane.f32.xlu0 %v2167_v37  ;;  %v2170_v42 = vmax.f32 %v5788_v16, %v5792_v22 }
 0x41e   : > { %v5798_v51 = vpop.f32.mrb[17].mxu1 }
 0x41f   : > { %v5800_v28 = vpop.f32.mrb[18].mxu1  ;;  %2171 = vmax.xlane.f32.xlu1 %v2170_v42  ;;  %v2137_v41 = vmax.f32 %v5794_v12, %v5798_v51 }
 0x420   : > { %v5804_v3 = vpop.f32.mrb[19].mxu1 }
 0x421   : > { %2138 = vmax.xlane.f32.xlu0 %v2137_v41  ;;  %v5806_v60 = vpop.f32.mrb[32].mxu0  ;;  %v2140_v25 = vmax.f32 %v5800_v28, %v5804_v3 }
 0x422   : > { %7117 = vst [vmem:[#allocation51_spill] sm:$0xff] %v5806_v60  ;;  %v5810_v21 = vpop.f32.mrb[33].mxu0 }
 0x423   : > { %7118 = vst [vmem:[#allocation52_spill] sm:$0xff] %v5810_v21  ;;  %2141 = vmax.xlane.f32.xlu1 %v2140_v25  ;;  %v5812_v34 = vpop.f32.mrb[34].mxu0  ;;  %v2173_v19 = vmax.f32 %v5806_v60, %v5810_v21 }
 0x424   : > { %7119 = vst [vmem:[#allocation53_spill] sm:$0xff] %v5812_v34  ;;  %v5816_v46 = vpop.f32.mrb[35].mxu0 }
 0x425   : > { %7120 = vst [vmem:[#allocation54_spill] sm:$0xff] %v5816_v46  ;;  %v5818_v62 = vpop.f32.mrb[20].mxu1  ;;  %2174 = vmax.xlane.f32.xlu0 %v2173_v19  ;;  %v2176_v36 = vmax.f32 %v5812_v34, %v5816_v46 }
 0x426   : > { %7121 = vst [vmem:[#allocation55_spill] sm:$0xff] %v5818_v62  ;;  %v5822_v45 = vpop.f32.mrb[21].mxu1 }
 0x427   : > { %7122 = vst [vmem:[#allocation56_spill] sm:$0xff] %v5822_v45  ;;  %v5824_v37 = vpop.f32.mrb[22].mxu1  ;;  %2177 = vmax.xlane.f32.xlu1 %v2176_v36  ;;  %v2143_v42 = vmax.f32 %v5818_v62, %v5822_v45 }
 0x428   : > { %7123 = vst [vmem:[#allocation57_spill] sm:$0xff] %v5824_v37  ;;  %v5828_v41 = vpop.f32.mrb[23].mxu1 }
 0x429   : > { %7124 = vst [vmem:[#allocation58_spill] sm:$0xff] %v5828_v41  ;;  %2144 = vmax.xlane.f32.xlu0 %v2143_v42  ;;  %v5830_v25 = vpop.f32.mrb[36].mxu0  ;;  %v2146_v21 = vmax.f32 %v5824_v37, %v5828_v41 }
 0x42a   : > { %7125 = vst [vmem:[#allocation59_spill] sm:$0xff] %v5830_v25  ;;  %v5834_v19 = vpop.f32.mrb[37].mxu0 }
 0x42b   : > { %7126 = vst [vmem:[#allocation60_spill] sm:$0xff] %v5834_v19  ;;  %2147 = vmax.xlane.f32.xlu1 %v2146_v21  ;;  %v5836_v46 = vpop.f32.mrb[38].mxu0  ;;  %v2179_v34 = vmax.f32 %v5830_v25, %v5834_v19 }
 0x42c   : > { %7127 = vst [vmem:[#allocation61_spill] sm:$0xff] %v5836_v46  ;;  %v5840_v36 = vpop.f32.mrb[39].mxu0 }
 0x42d   : > { %7128 = vst [vmem:[#allocation62_spill] sm:$0xff] %v5840_v36  ;;  %v5842_v60 = vpop.f32.mrb[24].mxu1  ;;  %2180 = vmax.xlane.f32.xlu0 %v2179_v34  ;;  %v2182_v42 = vmax.f32 %v5836_v46, %v5840_v36 }
 0x42e   : > { %7129 = vst [vmem:[#allocation63_spill] sm:$0xff] %v5842_v60  ;;  %v5846_v22 = vpop.f32.mrb[25].mxu1 }
 0x42f   : > { %7130 = vst [vmem:[#allocation64_spill] sm:$0xff] %v5846_v22  ;;  %v5848_v45 = vpop.f32.mrb[26].mxu1  ;;  %2183 = vmax.xlane.f32.xlu1 %v2182_v42  ;;  %v2149_v21 = vmax.f32 %v5842_v60, %v5846_v22 }
 0x430   : > { %7131 = vst [vmem:[#allocation65_spill] sm:$0xff] %v5848_v45  ;;  %v5852_v41 = vpop.f32.mrb[27].mxu1 }
 0x431   : > { %7132 = vst [vmem:[#allocation66_spill] sm:$0xff] %v5852_v41  ;;  %2150 = vmax.xlane.f32.xlu0 %v2149_v21  ;;  %v5854_v19 = vpop.f32.mrb[40].mxu0  ;;  %v2152_v25 = vmax.f32 %v5848_v45, %v5852_v41 }
 0x432   : > { %7133 = vst [vmem:[#allocation67_spill] sm:$0xff] %v5854_v19  ;;  %v5858_v34 = vpop.f32.mrb[41].mxu0 }
 0x433   : > { %7134 = vst [vmem:[#allocation68_spill] sm:$0xff] %v5858_v34  ;;  %2153 = vmax.xlane.f32.xlu1 %v2152_v25  ;;  %v5860_v36 = vpop.f32.mrb[42].mxu0  ;;  %v2185_v46 = vmax.f32 %v5854_v19, %v5858_v34 }
 0x434   : > { %7135 = vst [vmem:[#allocation69_spill] sm:$0xff] %v5860_v36  ;;  %v5864_v42 = vpop.f32.mrb[43].mxu0 }
 0x435   : > { %7136 = vst [vmem:[#allocation70_spill] sm:$0xff] %v5864_v42  ;;  %v5866_v37 = vpop.f32.mrb[28].mxu1  ;;  %2186 = vmax.xlane.f32.xlu0 %v2185_v46  ;;  %v2188_v21 = vmax.f32 %v5860_v36, %v5864_v42 }
 0x436   : > { %7137 = vst [vmem:[#allocation71_spill] sm:$0xff] %v5866_v37  ;;  %v5870_v22 = vpop.f32.mrb[29].mxu1 }
 0x437   : > { %7138 = vst [vmem:[#allocation72_spill] sm:$0xff] %v5870_v22  ;;  %v5872_v60 = vpop.f32.mrb[30].mxu1  ;;  %2189 = vmax.xlane.f32.xlu1 %v2188_v21  ;;  %v2155_v25 = vmax.f32 %v5866_v37, %v5870_v22 }
 0x438   : > { %7139 = vst [vmem:[#allocation73_spill] sm:$0xff] %v5872_v60  ;;  %v5876_v41 = vpop.f32.mrb[31].mxu1 }
 0x439   : > { %7140 = vst [vmem:[#allocation74_spill] sm:$0xff] %v5876_v41  ;;  %2156 = vmax.xlane.f32.xlu0 %v2155_v25  ;;  %v5878_v34 = vpop.f32.mrb[44].mxu0  ;;  %v2158_v19 = vmax.f32 %v5872_v60, %v5876_v41 }
 0x43a   : > { %7141 = vst [vmem:[#allocation75_spill] sm:$0xff] %v5878_v34  ;;  %v5882_v46 = vpop.f32.mrb[45].mxu0 }
 0x43b   : > { %7142 = vst [vmem:[#allocation76_spill] sm:$0xff] %v5882_v46  ;;  %2159 = vmax.xlane.f32.xlu1 %v2158_v19  ;;  %v5884_v42 = vpop.f32.mrb[46].mxu0  ;;  %v2191_v36 = vmax.f32 %v5878_v34, %v5882_v46 }
 0x43c   : > { %7143 = vst [vmem:[#allocation77_spill] sm:$0xff] %v5884_v42  ;;  %v5888_v21 = vpop.f32.mrb[47].mxu0 }
 0x43d   : > { %7144 = vst [vmem:[#allocation78_spill] sm:$0xff] %v5888_v21  ;;  %v5890_v45 = vpop.f32.mrb[32].mxu1  ;;  %2192 = vmax.xlane.f32.xlu0 %v2191_v36  ;;  %v2194_v25 = vmax.f32 %v5884_v42, %v5888_v21 }
 0x43e   : > { %7145 = vst [vmem:[#allocation79_spill] sm:$0xff] %v5890_v45  ;;  %v5894_v22 = vpop.f32.mrb[33].mxu1 }
 0x43f   : > { %7146 = vst [vmem:[#allocation80_spill] sm:$0xff] %v5894_v22  ;;  %v5896_v37 = vpop.f32.mrb[34].mxu1  ;;  %2195 = vmax.xlane.f32.xlu1 %v2194_v25  ;;  %v2161_v19 = vmax.f32 %v5890_v45, %v5894_v22 }
 0x440   : > { %7147 = vst [vmem:[#allocation81_spill] sm:$0xff] %v5896_v37  ;;  %v5900_v41 = vpop.f32.mrb[35].mxu1 }
 0x441   : > { %7148 = vst [vmem:[#allocation82_spill] sm:$0xff] %v5900_v41  ;;  %2162 = vmax.xlane.f32.xlu0 %v2161_v19  ;;  %v5902_v46 = vpop.f32.mrb[48].mxu0  ;;  %v2164_v34 = vmax.f32 %v5896_v37, %v5900_v41 }
 0x442   : > { %7149 = vst [vmem:[#allocation83_spill] sm:$0xff] %v5902_v46  ;;  %v5906_v36 = vpop.f32.mrb[49].mxu0 }
 0x443   : > { %7150 = vst [vmem:[#allocation84_spill] sm:$0xff] %v5906_v36  ;;  %2165 = vmax.xlane.f32.xlu1 %v2164_v34  ;;  %v5908_v21 = vpop.f32.mrb[50].mxu0  ;;  %v2197_v42 = vmax.f32 %v5902_v46, %v5906_v36 }
 0x444   : > { %7151 = vst [vmem:[#allocation85_spill] sm:$0xff] %v5908_v21  ;;  %v5912_v25 = vpop.f32.mrb[51].mxu0 }
 0x445   : > { %7152 = vst [vmem:[#allocation86_spill] sm:$0xff] %v5912_v25  ;;  %v5914_v60 = vpop.f32.mrb[36].mxu1  ;;  %2198 = vmax.xlane.f32.xlu0 %v2197_v42  ;;  %v2200_v19 = vmax.f32 %v5908_v21, %v5912_v25 }
 0x446   : > { %7153 = vst [vmem:[#allocation87_spill] sm:$0xff] %v5914_v60  ;;  %v5918_v22 = vpop.f32.mrb[37].mxu1 }
 0x447   : > { %7154 = vst [vmem:[#allocation88_spill] sm:$0xff] %v5918_v22  ;;  %v5920_v45 = vpop.f32.mrb[38].mxu1  ;;  %2201 = vmax.xlane.f32.xlu1 %v2200_v19  ;;  %v2215_v34 = vmax.f32 %v5914_v60, %v5918_v22 }
 0x448   : > { %7155 = vst [vmem:[#allocation89_spill] sm:$0xff] %v5920_v45  ;;  %v5924_v41 = vpop.f32.mrb[39].mxu1 }
 0x449   : > { %7156 = vst [vmem:[#allocation90_spill] sm:$0xff] %v5924_v41  ;;  %2216 = vmax.xlane.f32.xlu0 %v2215_v34  ;;  %v5926_v36 = vpop.f32.mrb[52].mxu0  ;;  %v2218_v46 = vmax.f32 %v5920_v45, %v5924_v41 }
 0x44a   : > { %7157 = vst [vmem:[#allocation91_spill] sm:$0xff] %v5926_v36  ;;  %v5930_v42 = vpop.f32.mrb[53].mxu0 }
 0x44b   : > { %7158 = vst [vmem:[#allocation92_spill] sm:$0xff] %v5930_v42  ;;  %2219 = vmax.xlane.f32.xlu1 %v2218_v46  ;;  %v5932_v25 = vpop.f32.mrb[54].mxu0  ;;  %v2203_v21 = vmax.f32 %v5926_v36, %v5930_v42 }
 0x44c   : > { %7159 = vst [vmem:[#allocation93_spill] sm:$0xff] %v5932_v25  ;;  %v5936_v19 = vpop.f32.mrb[55].mxu0 }
 0x44d   : > { %7160 = vst [vmem:[#allocation94_spill] sm:$0xff] %v5936_v19  ;;  %v5938_v37 = vpop.f32.mrb[40].mxu1  ;;  %2204 = vmax.xlane.f32.xlu0 %v2203_v21  ;;  %v2206_v34 = vmax.f32 %v5932_v25, %v5936_v19 }
 0x44e   : > { %7161 = vst [vmem:[#allocation95_spill] sm:$0xff] %v5938_v37  ;;  %v5942_v22 = vpop.f32.mrb[41].mxu1 }
 0x44f   : > { %7162 = vst [vmem:[#allocation96_spill] sm:$0xff] %v5942_v22  ;;  %v5944_v60 = vpop.f32.mrb[42].mxu1  ;;  %2207 = vmax.xlane.f32.xlu1 %v2206_v34  ;;  %v2221_v46 = vmax.f32 %v5938_v37, %v5942_v22 }
 0x450   : > { %7163 = vst [vmem:[#allocation97_spill] sm:$0xff] %v5944_v60  ;;  %v5948_v41 = vpop.f32.mrb[43].mxu1 }
 0x451   : > { %7164 = vst [vmem:[#allocation98_spill] sm:$0xff] %v5948_v41  ;;  %2222 = vmax.xlane.f32.xlu0 %v2221_v46  ;;  %v5950_v42 = vpop.f32.mrb[56].mxu0  ;;  %v2224_v36 = vmax.f32 %v5944_v60, %v5948_v41 }
 0x452   : > { %7165 = vst [vmem:[#allocation99_spill] sm:$0xff] %v5950_v42  ;;  %v5954_v21 = vpop.f32.mrb[57].mxu0 }
 0x453   : > { %7166 = vst [vmem:[#allocation100_spill] sm:$0xff] %v5954_v21  ;;  %2225 = vmax.xlane.f32.xlu1 %v2224_v36  ;;  %v5956_v19 = vpop.f32.mrb[58].mxu0  ;;  %v2209_v25 = vmax.f32 %v5950_v42, %v5954_v21 }
 0x454   : > { %7167 = vst [vmem:[#allocation101_spill] sm:$0xff] %v5956_v19  ;;  %v5960_v34 = vpop.f32.mrb[59].mxu0 }
 0x455   : > { %7168 = vst [vmem:[#allocation102_spill] sm:$0xff] %v5960_v34  ;;  %v5962_v45 = vpop.f32.mrb[44].mxu1  ;;  %2210 = vmax.xlane.f32.xlu0 %v2209_v25  ;;  %v2212_v46 = vmax.f32 %v5956_v19, %v5960_v34 }
 0x456   : > { %7169 = vst [vmem:[#allocation103_spill] sm:$0xff] %v5962_v45  ;;  %v5966_v22 = vpop.f32.mrb[45].mxu1 }
 0x457   : > { %7170 = vst [vmem:[#allocation104_spill] sm:$0xff] %v5966_v22  ;;  %v5968_v37 = vpop.f32.mrb[46].mxu1  ;;  %2213 = vmax.xlane.f32.xlu1 %v2212_v46  ;;  %v2227_v36 = vmax.f32 %v5962_v45, %v5966_v22 }
 0x458   : > { %7171 = vst [vmem:[#allocation105_spill] sm:$0xff] %v5968_v37  ;;  %v5972_v41 = vpop.f32.mrb[47].mxu1 }
 0x459   : > { %7172 = vst [vmem:[#allocation106_spill] sm:$0xff] %v5972_v41  ;;  %2228 = vmax.xlane.f32.xlu0 %v2227_v36  ;;  %v2230_v21 = vmax.f32 %v5968_v37, %v5972_v41 }
 0x45b   : > { %2231 = vmax.xlane.f32.xlu1 %v2230_v21 }
 0x45d   : > { %v5976_v42 = vpop.f32.mrb[48].mxu1 }
 0x45e   : > { %7173 = vst [vmem:[#allocation107_spill] sm:$0xff] %v5976_v42  ;;  %v5978_v25 = vpop.f32.mrb[49].mxu1 }
 0x45f   : > { %7174 = vst [vmem:[#allocation108_spill] sm:$0xff] %v5978_v25  ;;  %v5980_v34 = vpop.f32.mrb[50].mxu1  ;;  %v2233_v19 = vmax.f32 %v5976_v42, %v5978_v25 }
 0x460   : > { %7175 = vst [vmem:[#allocation109_spill] sm:$0xff] %v5980_v34  ;;  %v5984_v46 = vpop.f32.mrb[51].mxu1 }
 0x461   : > { %7176 = vst [vmem:[#allocation110_spill] sm:$0xff] %v5984_v46  ;;  %2234 = vmax.xlane.f32.xlu0 %v2233_v19  ;;  %v2236_v22 = vmax.f32 %v5980_v34, %v5984_v46 }
 0x463   : > { %2237 = vmax.xlane.f32.xlu1 %v2236_v22 }
 0x465   : > { %v5988_v36 = vpop.f32.mrb[52].mxu1 }
 0x466   : > { %7177 = vst [vmem:[#allocation111_spill] sm:$0xff] %v5988_v36  ;;  %v5990_v41 = vpop.f32.mrb[53].mxu1 }
 0x467   : > { %7178 = vst [vmem:[#allocation112_spill] sm:$0xff] %v5990_v41  ;;  %v5992_v21 = vpop.f32.mrb[54].mxu1  ;;  %v2239_v37 = vmax.f32 %v5988_v36, %v5990_v41 }
 0x468   : > { %7179 = vst [vmem:[#allocation113_spill] sm:$0xff] %v5992_v21  ;;  %v5996_v45 = vpop.f32.mrb[55].mxu1 }
 0x469   : > { %7180 = vst [vmem:[#allocation114_spill] sm:$0xff] %v5996_v45  ;;  %2240 = vmax.xlane.f32.xlu0 %v2239_v37  ;;  %v2242_v25 = vmax.f32 %v5992_v21, %v5996_v45 }
 0x46b   : > { %2243 = vmax.xlane.f32.xlu1 %v2242_v25 }
 0x46d   : > { %v6000_v19 = vpop.f32.mrb[56].mxu1 }
 0x46e   : > { %7181 = vst [vmem:[#allocation115_spill] sm:$0xff] %v6000_v19  ;;  %v6002_v46 = vpop.f32.mrb[57].mxu1 }
 0x46f   : > { %7182 = vst [vmem:[#allocation116_spill] sm:$0xff] %v6002_v46  ;;  %v6004_v22 = vpop.f32.mrb[58].mxu1  ;;  %v2245_v34 = vmax.f32 %v6000_v19, %v6002_v46 }
 0x470   : > { %7183 = vst [vmem:[#allocation117_spill] sm:$0xff] %v6004_v22  ;;  %v6008_v42 = vpop.f32.mrb[59].mxu1 }
 0x471   : > { %7184 = vst [vmem:[#allocation118_spill] sm:$0xff] %v6008_v42  ;;  %2246 = vmax.xlane.f32.xlu0 %v2245_v34  ;;  %v2248_v41 = vmax.f32 %v6004_v22, %v6008_v42 }
 0x472   : > { %v2073_v37 = vpop.xlane.xlu0 %2072 }
 0x473   : > { %v2263_v36 = vsub.f32 %v5652_v33, %v2073_v37  ;;  %v2264_v25 = vsub.f32 %v5654_v15, %v2073_v37  ;;  %2249 = vmax.xlane.f32.xlu1 %v2248_v41 }
 0x474   : > { %v2076_v45 = vpop.xlane.xlu1 %2075 }
 0x475   : > { %v2391_v21 = vmul.f32 1.442695, %v2263_v36  ;;  %v2393_v60 = vmul.f32 1.442695, %v2264_v25  ;;  %v2265_v16 = vsub.f32 %v5656_v61, %v2076_v45  ;;  %v2266_v62 = vsub.f32 %v5660_v44, %v2076_v45  ;;  %v6016_v46 = vpop.f32.mrb[60].mxu1 }
 0x476   : > { %v6018_v19 = vpop.f32.mrb[61].mxu1 }
 0x477   : > { %3985 = vpow2.f32 %v2391_v21  ;;  %v2395_v34 = vmul.f32 1.442695, %v2265_v16  ;;  %v2397_v42 = vmul.f32 1.442695, %v2266_v62  ;;  %v6022_v22 = vpop.f32.mrb[62].mxu1 }
 0x478   : > { %3987 = vpow2.f32 %v2393_v60  ;;  %v6024_v15 = vpop.f32.mrb[63].mxu1 }
 0x479   : > { %3989 = vpow2.f32 %v2395_v34 }
 0x47a   : > { %3991 = vpow2.f32 %v2397_v42  ;;  %v2079_v44 = vpop.xlane.xlu0 %2078 }
 0x47b   : > { %v2267_v45 = vsub.f32 %v5664_v54, %v2079_v44  ;;  %v2268_v41 = vsub.f32 %v5666_v50, %v2079_v44 }
 0x47c   : > { %v2082_v16 = vpop.xlane.xlu1 %2081 }
 0x47d   : > { %v2399_v62 = vmul.f32 1.442695, %v2267_v45  ;;  %v2401_v36 = vmul.f32 1.442695, %v2268_v41  ;;  %v2269_v21 = vsub.f32 %v5668_v59, %v2082_v16  ;;  %v2270_v37 = vsub.f32 %v5672_v13, %v2082_v16  ;;  %v6032_v60 = vpop.f32.mrb[64].mxu1 }
 0x47e   : > { %v6034_v25 = vpop.f32.mrb[65].mxu1 }
 0x47f   : > { %3993 = vpow2.f32 %v2399_v62  ;;  %v2403_v34 = vmul.f32 1.442695, %v2269_v21  ;;  %v2405_v61 = vmul.f32 1.442695, %v2270_v37  ;;  %v6038_v54 = vpop.f32.mrb[66].mxu1 }
 0x480   : > { %3995 = vpow2.f32 %v2401_v36  ;;  %v6040_v50 = vpop.f32.mrb[67].mxu1 }
 0x481   : > { %7185 = vst [vmem:[#allocation119_spill] sm:$0xff] %v6040_v50  ;;  %v6042_v44 = vpop.eup %3985  ;;  %3997 = vpow2.f32 %v2403_v34 }
 0x482   : > { %v6046_v13 = vpop.eup %3987  ;;  %3999 = vpow2.f32 %v2405_v61  ;;  %v2085_v45 = vpop.xlane.xlu0 %2084 }
 0x483   : > { %v6048_v41 = vpop.eup %3989  ;;  %v2271_v16 = vsub.f32 %v5676_v56, %v2085_v45  ;;  %v2272_v62 = vsub.f32 %v5678_v14, %v2085_v45  ;;  %v2647_v36 = vadd.f32 %v6046_v13, %v6042_v44 }
 0x484   : > { %v6054_v21 = vpop.eup %3991  ;;  %v2088_v37 = vpop.xlane.xlu1 %2087 }
 0x485   : > { %v2407_v34 = vmul.f32 1.442695, %v2271_v16  ;;  %v2409_v42 = vmul.f32 1.442695, %v2272_v62  ;;  %v2273_v59 = vsub.f32 %v5680_v35, %v2088_v37  ;;  %v2274_v33 = vsub.f32 %v5684_v18, %v2088_v37  ;;  %2648 = vadd.xlane.f32.xlu0 %v2647_v36 }
 0x486   : > { %v2650_v61 = vadd.f32 %v6054_v21, %v6048_v41 }
 0x487   : > { %4001 = vpow2.f32 %v2407_v34  ;;  %v2411_v56 = vmul.f32 1.442695, %v2273_v59  ;;  %v2413_v50 = vmul.f32 1.442695, %v2274_v33 }
 0x488   : > { %4003 = vpow2.f32 %v2409_v42  ;;  %2651 = vadd.xlane.f32.xlu1 %v2650_v61 }
 0x489   : > { %v6060_v14 = vpop.eup %3993  ;;  %4005 = vpow2.f32 %v2411_v56 }
 0x48a   : > { %7186 = vst [vmem:[#allocation120_spill] sm:$0xff] %v6060_v14  ;;  %v6062_v45 = vpop.eup %3995  ;;  %4007 = vpow2.f32 %v2413_v50  ;;  %v2091_v16 = vpop.xlane.xlu0 %2090 }
 0x48b   : > { %7187 = vst [vmem:[#allocation121_spill] sm:$0xff] %v6062_v45  ;;  %v6064_v62 = vpop.eup %3997  ;;  %v2275_v35 = vsub.f32 %v5688_v20, %v2091_v16  ;;  %v2276_v18 = vsub.f32 %v5690_v8, %v2091_v16  ;;  %v2653_v36 = vadd.f32 %v6062_v45, %v6060_v14 }
 0x48c   : > { %7188 = vst [vmem:[#allocation122_spill] sm:$0xff] %v6064_v62  ;;  %v6070_v59 = vpop.eup %3999  ;;  %v2094_v33 = vpop.xlane.xlu1 %2093 }
 0x48d   : > { %v2415_v42 = vmul.f32 1.442695, %v2275_v35  ;;  %v2417_v37 = vmul.f32 1.442695, %v2276_v18  ;;  %v2277_v34 = vsub.f32 %v5692_v24, %v2094_v33  ;;  %v2278_v61 = vsub.f32 %v5696_v26, %v2094_v33  ;;  %2654 = vadd.xlane.f32.xlu0 %v2653_v36 }
 0x48e   : > { %v2656_v50 = vadd.f32 %v6070_v59, %v6064_v62  ;;  %v2115_v56 = vpop.xlane.xlu0 %2114 }
 0x48f   : > { %4009 = vpow2.f32 %v2415_v42  ;;  %v2419_v20 = vmul.f32 1.442695, %v2277_v34  ;;  %v2421_v8 = vmul.f32 1.442695, %v2278_v61  ;;  %v2291_v16 = vsub.f32 %v5698_v30, %v2115_v56 }
 0x490   : > { %4011 = vpow2.f32 %v2417_v37  ;;  %2657 = vadd.xlane.f32.xlu1 %v2656_v50  ;;  %v2118_v14 = vpop.xlane.xlu1 %2117  ;;  %v2292_v24 = vsub.f32 %v5702_v32, %v2115_v56 }
 0x491   : > { %v6077_v45 = vpop.eup %4001  ;;  %4013 = vpow2.f32 %v2419_v20  ;;  %v2293_v26 = vsub.f32 %v5704_v17, %v2118_v14  ;;  %v2447_v42 = vmul.f32 1.442695, %v2291_v16  ;;  %v2294_v17 = vsub.f32 %v5708_v55, %v2118_v14 }
 0x492   : > { %v6080_v35 = vpop.eup %4003  ;;  %4015 = vpow2.f32 %v2421_v8  ;;  %v2097_v18 = vpop.xlane.xlu0 %2096  ;;  %v2449_v34 = vmul.f32 1.442695, %v2292_v24 }
 0x493   : > { %v6083_v36 = vpop.eup %4005  ;;  %v2659_v30 = vadd.f32 %v6080_v35, %v6077_v45  ;;  %v2451_v61 = vmul.f32 1.442695, %v2293_v26  ;;  %4017 = vpow2.f32 %v2447_v42  ;;  %v2279_v20 = vsub.f32 %v5710_v48, %v2097_v18 }
 0x494   : > { %7189 = vst [vmem:[#allocation123_spill] sm:$0xff] %v6083_v36  ;;  %v6085_v33 = vpop.eup %4007  ;;  %v6087_v37 = vpop.xlane.xlu1 %2099  ;;  %4019 = vpow2.f32 %v2449_v34  ;;  %v2280_v55 = vsub.f32 %v5714_v38, %v2097_v18  ;;  %v2453_v42 = vmul.f32 1.442695, %v2294_v17 }
 0x495   : > { %2660 = vadd.xlane.f32.xlu0 %v2659_v30  ;;  %v2662_v32 = vadd.f32 %v6085_v33, %v6083_v36  ;;  %4021 = vpow2.f32 %v2451_v61  ;;  %v2423_v34 = vmul.f32 1.442695, %v2279_v20  ;;  %v2281_v17 = vsub.f32 %v5716_v43, %v6087_v37 }
 0x496   : > { %v2121_v50 = vpop.xlane.xlu0 %2120  ;;  %v2425_v61 = vmul.f32 1.442695, %v2280_v55  ;;  %v2282_v20 = vsub.f32 %v5720_v47, %v6087_v37 }
 0x497   : > { %v2295_v56 = vsub.f32 %v5722_v57, %v2121_v50  ;;  %2663 = vadd.xlane.f32.xlu1 %v2662_v32  ;;  %v2296_v8 = vsub.f32 %v5726_v7, %v2121_v50  ;;  %v2427_v37 = vmul.f32 1.442695, %v2281_v17 }
 0x498   : > { %v2124_v16 = vpop.xlane.xlu1 %2123 }
 0x499   : > { %v6097_v62 = vpop.eup %4009  ;;  %v2455_v24 = vmul.f32 1.442695, %v2295_v56  ;;  %v2297_v26 = vsub.f32 %v5728_v10, %v2124_v16  ;;  %v2298_v30 = vsub.f32 %v5732_v49, %v2124_v16  ;;  %v2457_v57 = vmul.f32 1.442695, %v2296_v8 }
 0x49a   : > { %v6101_v36 = vpop.eup %4011  ;;  %v2103_v14 = vpop.xlane.xlu0 %2102 }
 0x49b   : > { %v6104_v48 = vpop.eup %4013  ;;  %4023 = vpow2.f32 %v2455_v24  ;;  %v2459_v7 = vmul.f32 1.442695, %v2297_v26  ;;  %v2461_v32 = vmul.f32 1.442695, %v2298_v30  ;;  %v2665_v49 = vadd.f32 %v6101_v36, %v6097_v62 }
 0x49c   : > { %v6106_v50 = vpop.eup %4015  ;;  %4025 = vpow2.f32 %v2457_v57  ;;  %v6108_v10 = vpop.xlane.xlu1 %2105  ;;  %v2283_v24 = vsub.f32 %v5734_v9, %v2103_v14  ;;  %v2284_v43 = vsub.f32 %v5738_v11, %v2103_v14 }
 0x49d   : > { %4027 = vpow2.f32 %v2459_v7  ;;  %2666 = vadd.xlane.f32.xlu0 %v2665_v49  ;;  %v2668_v38 = vadd.f32 %v6106_v50, %v6104_v48  ;;  %v6123_v57 = vpop.eup %4017 }
 0x49e   : > { %4029 = vpow2.f32 %v2461_v32  ;;  %v2127_v18 = vpop.xlane.xlu0 %2126  ;;  %7190 = vst [vmem:[#allocation124_spill] sm:$0xff] %v6123_v57  ;;  %v6128_v47 = vpop.eup %4019  ;;  %v2429_v32 = vmul.f32 1.442695, %v2282_v20  ;;  %v2433_v14 = vmul.f32 1.442695, %v2284_v43 }
 0x49f   : > { %4031 = vpow2.f32 %v2453_v42  ;;  %v2299_v56 = vsub.f32 %v5746_v4, %v2127_v18  ;;  %2669 = vadd.xlane.f32.xlu1 %v2668_v38  ;;  %v2300_v8 = vsub.f32 %v5750_v63, %v2127_v18  ;;  %7191 = vst [vmem:[#allocation125_spill] sm:$0xff] %v6128_v47  ;;  %v6130_v9 = vpop.eup %4021  ;;  %v2285_v38 = vsub.f32 %v5740_v39, %v6108_v10 }
 0x4a0   : > { %4033 = vpow2.f32 %v2423_v34  ;;  %v2130_v16 = vpop.xlane.xlu1 %2129  ;;  %7192 = vst [vmem:[#allocation126_spill] sm:$0xff] %v6130_v9  ;;  %v2431_v34 = vmul.f32 1.442695, %v2283_v24 }
 0x4a1   : > { %v2463_v26 = vmul.f32 1.442695, %v2299_v56  ;;  %v2301_v30 = vsub.f32 %v5752_v53, %v2130_v16  ;;  %v2302_v55 = vsub.f32 %v5756_v2, %v2130_v16  ;;  %4035 = vpow2.f32 %v2425_v61 }
 0x4a2   : > { %v2465_v4 = vmul.f32 1.442695, %v2300_v8  ;;  %v6126_v42 = vpop.xlane.xlu0 %2108  ;;  %v2286_v56 = vsub.f32 %v5744_v58, %v6108_v10  ;;  %v2435_v43 = vmul.f32 1.442695, %v2285_v38 }
 0x4a3   : > { %4037 = vpow2.f32 %v2463_v26  ;;  %v2467_v63 = vmul.f32 1.442695, %v2301_v30  ;;  %v2469_v7 = vmul.f32 1.442695, %v2302_v55  ;;  %v2287_v58 = vsub.f32 %v5758_v5, %v6126_v42 }
 0x4a4   : > { %4039 = vpow2.f32 %v2465_v4  ;;  %v6132_v53 = vpop.xlane.xlu1 %2111  ;;  %v2288_v38 = vsub.f32 %v5762_v6, %v6126_v42 }
 0x4a5   : > { %v6134_v2 = vpop.eup %4023  ;;  %4041 = vpow2.f32 %v2467_v63  ;;  %v2290_v6 = vsub.f32 %v5768_v23, %v6132_v53 }
 0x4a6   : > { %v6136_v11 = vpop.eup %4025  ;;  %4043 = vpow2.f32 %v2469_v7  ;;  %v2133_v49 = vpop.xlane.xlu0 %2132  ;;  %v2441_v23 = vmul.f32 1.442695, %v2288_v38 }
 0x4a7   : > { %v6138_v61 = vpop.eup %4027  ;;  %4045 = vpow2.f32 %v2427_v37  ;;  %v2303_v18 = vsub.f32 %v5770_v27, %v2133_v49  ;;  %v2304_v20 = vsub.f32 %v5774_v29, %v2133_v49  ;;  %v2695_v16 = vadd.f32 %v6136_v11, %v6134_v2 }
 0x4a8   : > { %v6143_v17 = vpop.eup %4029  ;;  %4047 = vpow2.f32 %v2429_v32  ;;  %v2136_v8 = vpop.xlane.xlu1 %2135  ;;  %v2439_v32 = vmul.f32 1.442695, %v2287_v58 }
 0x4a9   : > { %v6150_v24 = vpop.eup %4031  ;;  %4049 = vpow2.f32 %v2431_v34  ;;  %v2471_v26 = vmul.f32 1.442695, %v2303_v18  ;;  %v2305_v39 = vsub.f32 %v5776_v0, %v2136_v8  ;;  %v2306_v27 = vsub.f32 %v5780_v31, %v2136_v8  ;;  %2696 = vadd.xlane.f32.xlu0 %v2695_v16 }
 0x4aa   : > { %7193 = vst [vmem:[#allocation127_spill] sm:$0xff] %v6150_v24  ;;  %v6154_v30 = vpop.eup %4033  ;;  %4051 = vpow2.f32 %v2433_v14  ;;  %v2473_v10 = vmul.f32 1.442695, %v2304_v20  ;;  %v2698_v29 = vadd.f32 %v6143_v17, %v6138_v61  ;;  %v6160_v55 = vpop.xlane.xlu0 %2168  ;;  %v2437_v31 = vmul.f32 1.442695, %v2286_v56 }
 0x4ab   : > { %7194 = vst [vmem:[#allocation128_spill] sm:$0xff] %v6154_v30  ;;  %4053 = vpow2.f32 %v2471_v26  ;;  %v2475_v4 = vmul.f32 1.442695, %v2305_v39  ;;  %v2477_v37 = vmul.f32 1.442695, %v2306_v27  ;;  %v6162_v0 = vpop.eup %4035  ;;  %v7196_v34 = vmax.f32 %v6016_v46, %v6018_v19 }
 0x4ac   : > { %7195 = vst [vmem:[#allocation129_spill] sm:$0xff] %v6162_v0  ;;  %4055 = vpow2.f32 %v2473_v10  ;;  %2699 = vadd.xlane.f32.xlu1 %v2698_v29  ;;  %v6164_v63 = vpop.xlane.xlu1 %2171  ;;  %v2289_v20 = vsub.f32 %v5764_v40, %v6132_v53  ;;  %v7198_v8 = vmax.f32 %v6022_v22, %v6024_v15 }
 0x4ad   : > { %v6166_v7 = vpop.eup %4037  ;;  %4057 = vpow2.f32 %v2475_v4  ;;  %2252 = vmax.xlane.f32.xlu0 %v7196_v34  ;;  %v2445_v34 = vmul.f32 1.442695, %v2290_v6  ;;  %v7208_v6 = vld [vmem:[#allocation49_spill] sm:$0xff] }
 0x4ae   : > { %v6168_v5 = vpop.eup %4039  ;;  %4059 = vpow2.f32 %v2477_v37  ;;  %v2139_v14 = vpop.xlane.xlu0 %2138  ;;  %v2443_v37 = vmul.f32 1.442695, %v2289_v20 }
 0x4af   : > { %v6173_v49 = vpop.eup %4041  ;;  %4061 = vpow2.f32 %v2435_v43  ;;  %v2307_v18 = vsub.f32 %v5794_v12, %v2139_v14  ;;  %v2308_v16 = vsub.f32 %v5798_v51, %v2139_v14  ;;  %v2701_v39 = vadd.f32 %v6168_v5, %v6166_v7 }
 0x4b0   : > { %7197 = vst [vmem:[#allocation130_spill] sm:$0xff] %v6173_v49  ;;  %v6178_v56 = vpop.eup %4043  ;;  %4063 = vpow2.f32 %v2437_v31  ;;  %2255 = vmax.xlane.f32.xlu1 %v7198_v8  ;;  %v2142_v26 = vpop.xlane.xlu1 %2141  ;;  %v2327_v51 = vsub.f32 %v5782_v52, %v6160_v55  ;;  %v2671_v52 = vadd.f32 %v6162_v0, %v6154_v30  ;;  %v7230_v30 = vld [vmem:[#allocation66_spill] sm:$0xff] }
 0x4b1   : > { %v6188_v27 = vpop.eup %4045  ;;  %v2479_v12 = vmul.f32 1.442695, %v2307_v18  ;;  %v2309_v42 = vsub.f32 %v5800_v28, %v2142_v26  ;;  %v2310_v40 = vsub.f32 %v5804_v3, %v2142_v26  ;;  %4065 = vpow2.f32 %v2439_v32  ;;  %2702 = vadd.xlane.f32.xlu0 %v2701_v39  ;;  %v7206_v26 = vld [vmem:[#allocation55_spill] sm:$0xff] }
 0x4b2   : > { %7199 = vst [vmem:[#allocation131_spill] sm:$0xff] %v6188_v27  ;;  %v6194_v58 = vpop.eup %4047  ;;  %v2481_v10 = vmul.f32 1.442695, %v2308_v16  ;;  %v2704_v29 = vadd.f32 %v6178_v56, %v6173_v49  ;;  %v6200_v43 = vpop.xlane.xlu0 %2174  ;;  %v2519_v38 = vmul.f32 1.442695, %v2327_v51  ;;  %v2328_v16 = vsub.f32 %v5786_v1, %v6160_v55  ;;  %v7211_v1 = vld [vmem:[#allocation57_spill] sm:$0xff] }
 0x4b3   : > { %7200 = vst [vmem:[#allocation132_spill] sm:$0xff] %v6194_v58  ;;  %v6202_v4 = vpop.eup %4049  ;;  %4067 = vpow2.f32 %v2479_v12  ;;  %v2483_v28 = vmul.f32 1.442695, %v2309_v42  ;;  %v2485_v53 = vmul.f32 1.442695, %v2310_v40  ;;  %v2674_v18 = vadd.f32 %v6194_v58, %v6188_v27  ;;  %v7209_v40 = vld [vmem:[#allocation56_spill] sm:$0xff] }
 0x4b4   : > { %7201 = vst [vmem:[#allocation133_spill] sm:$0xff] %v6202_v4  ;;  %v6204_v3 = vpop.eup %4051  ;;  %4069 = vpow2.f32 %v2481_v10  ;;  %2705 = vadd.xlane.f32.xlu1 %v2704_v29  ;;  %v6206_v31 = vpop.xlane.xlu1 %2177  ;;  %v2329_v42 = vsub.f32 %v7208_v6, %v6164_v63 }
 0x4b5   : > { %7202 = vst [vmem:[#allocation134_spill] sm:$0xff] %v6204_v3  ;;  %v6210_v32 = vpop.eup %4053  ;;  %4071 = vpow2.f32 %v2483_v28  ;;  %2672 = vadd.xlane.f32.xlu0 %v2671_v52 }
 0x4b6   : > { %7203 = vst [vmem:[#allocation135_spill] sm:$0xff] %v6210_v32  ;;  %v6212_v14 = vpop.eup %4055  ;;  %4073 = vpow2.f32 %v2485_v53  ;;  %v2145_v20 = vpop.xlane.xlu0 %2144  ;;  %v7212_v53 = vld [vmem:[#allocation58_spill] sm:$0xff] }
 0x4b7   : > { %7204 = vst [vmem:[#allocation136_spill] sm:$0xff] %v6212_v14  ;;  %v6216_v8 = vpop.eup %4057  ;;  %4075 = vpow2.f32 %v2441_v23  ;;  %v2311_v39 = vsub.f32 %v7206_v26, %v2145_v20  ;;  %v2312_v51 = vsub.f32 %v7209_v40, %v2145_v20  ;;  %v2707_v29 = vadd.f32 %v6212_v14, %v6210_v32 }
 0x4b8   : > { %7205 = vst [vmem:[#allocation137_spill] sm:$0xff] %v6216_v8  ;;  %v6221_v12 = vpop.eup %4059  ;;  %4077 = vpow2.f32 %v2443_v37  ;;  %2675 = vadd.xlane.f32.xlu1 %v2674_v18  ;;  %v2148_v10 = vpop.xlane.xlu1 %2147  ;;  %v7214_v37 = vld [vmem:[#allocation50_spill] sm:$0xff]  ;;  %v2521_v32 = vmul.f32 1.442695, %v2328_v16  ;;  %v7218_v16 = vmax.f32 %v6032_v60, %v6034_v25 }
 0x4b9   : > { %7207 = vst [vmem:[#allocation55_spill] sm:$0xff] %v6221_v12  ;;  %v6228_v28 = vpop.eup %4061  ;;  %4079 = vpow2.f32 %v2445_v34  ;;  %v2487_v23 = vmul.f32 1.442695, %v2311_v39  ;;  %v2313_v55 = vsub.f32 %v7211_v1, %v2148_v10  ;;  %v2314_v52 = vsub.f32 %v7212_v53, %v2148_v10  ;;  %2708 = vadd.xlane.f32.xlu0 %v2707_v29 }
 0x4ba   : > { %7210 = vst [vmem:[#allocation49_spill] sm:$0xff] %v6228_v28  ;;  %v6232_v26 = vpop.eup %4063  ;;  %4081 = vpow2.f32 %v2519_v38  ;;  %v2330_v18 = vsub.f32 %v7214_v37, %v6164_v63  ;;  %v2489_v6 = vmul.f32 1.442695, %v2312_v51  ;;  %v2710_v20 = vadd.f32 %v6221_v12, %v6216_v8  ;;  %v6238_v40 = vpop.xlane.xlu0 %2180 }
 0x4bb   : > { %7213 = vst [vmem:[#allocation56_spill] sm:$0xff] %v6232_v26  ;;  %4083 = vpow2.f32 %v2487_v23  ;;  %v2491_v34 = vmul.f32 1.442695, %v2313_v55  ;;  %v2493_v39 = vmul.f32 1.442695, %v2314_v52  ;;  %v6240_v1 = vpop.eup %4065  ;;  %v7221_v52 = vld [vmem:[#allocation63_spill] sm:$0xff] }
 0x4bc   : > { %7215 = vst [vmem:[#allocation57_spill] sm:$0xff] %v6240_v1  ;;  %v2523_v10 = vmul.f32 1.442695, %v2329_v42  ;;  %4085 = vpow2.f32 %v2489_v6  ;;  %2711 = vadd.xlane.f32.xlu1 %v2710_v20  ;;  %v6242_v38 = vpop.xlane.xlu1 %2183  ;;  %v2525_v51 = vmul.f32 1.442695, %v2330_v18  ;;  %v7220_v42 = vld [vmem:[#allocation51_spill] sm:$0xff] }
 0x4bd   : > { %v6244_v53 = vpop.eup %4067  ;;  %4087 = vpow2.f32 %v2491_v34  ;;  %2258 = vmax.xlane.f32.xlu0 %v7218_v16  ;;  %v2331_v55 = vsub.f32 %v7220_v42, %v6200_v43  ;;  %v7223_v20 = vld [vmem:[#allocation52_spill] sm:$0xff]  ;;  %v7224_v34 = vld [vmem:[#allocation119_spill] sm:$0xff]  ;;  %v7228_v42 = vld [vmem:[#allocation53_spill] sm:$0xff] }
 0x4be   : > { %7216 = vst [vmem:[#allocation58_spill] sm:$0xff] %v6244_v53  ;;  %v6246_v63 = vpop.eup %4069  ;;  %4089 = vpow2.f32 %v2493_v39  ;;  %v2151_v29 = vpop.xlane.xlu0 %2150  ;;  %v2332_v18 = vsub.f32 %v7223_v20, %v6200_v43  ;;  %v7225_v39 = vmax.f32 %v6038_v54, %v7224_v34  ;;  %v7226_v16 = vld [vmem:[#allocation64_spill] sm:$0xff] }
 0x4bf   : > { %7217 = vst [vmem:[#allocation50_spill] sm:$0xff] %v6246_v63  ;;  %v6251_v23 = vpop.eup %4071  ;;  %4091 = vpow2.f32 %v2521_v32  ;;  %v2315_v37 = vsub.f32 %v7221_v52, %v2151_v29  ;;  %v2316_v8 = vsub.f32 %v7226_v16, %v2151_v29  ;;  %v2713_v32 = vadd.f32 %v6246_v63, %v6244_v53 }
 0x4c0   : > { %7219 = vst [vmem:[#allocation138_spill] sm:$0xff] %v6251_v23  ;;  %v6256_v6 = vpop.eup %4073  ;;  %4093 = vpow2.f32 %v2523_v10  ;;  %2261 = vmax.xlane.f32.xlu1 %v7225_v39  ;;  %v2154_v12 = vpop.xlane.xlu1 %2153  ;;  %v2333_v52 = vsub.f32 %v7228_v42, %v6206_v31  ;;  %v7229_v10 = vld [vmem:[#allocation65_spill] sm:$0xff]  ;;  %v7232_v39 = vld [vmem:[#allocation54_spill] sm:$0xff] }
 0x4c1   : > { %7222 = vst [vmem:[#allocation51_spill] sm:$0xff] %v6256_v6  ;;  %v6266_v14 = vpop.eup %4075  ;;  %v2495_v27 = vmul.f32 1.442695, %v2315_v37  ;;  %v2317_v58 = vsub.f32 %v7229_v10, %v2154_v12  ;;  %v2318_v43 = vsub.f32 %v7230_v30, %v2154_v12  ;;  %4095 = vpow2.f32 %v2525_v51  ;;  %2714 = vadd.xlane.f32.xlu0 %v2713_v32 }
 0x4c2   : > { %7227 = vst [vmem:[#allocation63_spill] sm:$0xff] %v6266_v14  ;;  %v6272_v20 = vpop.eup %4077  ;;  %v2334_v29 = vsub.f32 %v7232_v39, %v6206_v31  ;;  %v2497_v16 = vmul.f32 1.442695, %v2316_v8  ;;  %v2716_v53 = vadd.f32 %v6256_v6, %v6251_v23  ;;  %v6278_v63 = vpop.xlane.xlu0 %2186  ;;  %v2527_v37 = vmul.f32 1.442695, %v2331_v55 }
 0x4c3   : > { %7231 = vst [vmem:[#allocation52_spill] sm:$0xff] %v6272_v20  ;;  %v6280_v0 = vpop.eup %4079  ;;  %4097 = vpow2.f32 %v2495_v27  ;;  %v2499_v42 = vmul.f32 1.442695, %v2317_v58  ;;  %v2501_v10 = vmul.f32 1.442695, %v2318_v43  ;;  %v2677_v31 = vadd.f32 %v6204_v3, %v6202_v4 }
 0x4c4   : > { %7233 = vst [vmem:[#allocation119_spill] sm:$0xff] %v6280_v0  ;;  %v6282_v30 = vpop.eup %4081  ;;  %v2529_v12 = vmul.f32 1.442695, %v2332_v18  ;;  %4099 = vpow2.f32 %v2497_v16  ;;  %2717 = vadd.xlane.f32.xlu1 %v2716_v53  ;;  %v6284_v51 = vpop.xlane.xlu1 %2189  ;;  %v2531_v32 = vmul.f32 1.442695, %v2333_v52  ;;  %v2680_v27 = vadd.f32 %v6232_v26, %v6228_v28  ;;  %v7237_v53 = vld [vmem:[#allocation59_spill] sm:$0xff] }
 0x4c5   : > { %7234 = vst [vmem:[#allocation64_spill] sm:$0xff] %v6282_v30  ;;  %v6288_v8 = vpop.eup %4083  ;;  %4101 = vpow2.f32 %v2499_v42  ;;  %v2533_v55 = vmul.f32 1.442695, %v2334_v29  ;;  %2678 = vadd.xlane.f32.xlu0 %v2677_v31  ;;  %v2335_v43 = vsub.f32 %v7237_v53, %v6238_v40  ;;  %v7238_v16 = vld [vmem:[#allocation71_spill] sm:$0xff]  ;;  %v7240_v52 = vld [vmem:[#allocation60_spill] sm:$0xff]  ;;  %v7243_v53 = vld [vmem:[#allocation73_spill] sm:$0xff] }
 0x4c6   : > { %7235 = vst [vmem:[#allocation53_spill] sm:$0xff] %v6288_v8  ;;  %v6290_v39 = vpop.eup %4085  ;;  %4103 = vpow2.f32 %v2501_v10  ;;  %v2157_v58 = vpop.xlane.xlu0 %2156  ;;  %v2336_v29 = vsub.f32 %v7240_v52, %v6238_v40  ;;  %v7241_v42 = vld [vmem:[#allocation72_spill] sm:$0xff]  ;;  %v7246_v40 = vld [vmem:[#allocation61_spill] sm:$0xff] }
 0x4c7   : > { %v6294_v18 = vpop.eup %4087  ;;  %4105 = vpow2.f32 %v2527_v37  ;;  %v2319_v4 = vsub.f32 %v7238_v16, %v2157_v58  ;;  %v2320_v10 = vsub.f32 %v7241_v42, %v2157_v58  ;;  %v2719_v28 = vadd.f32 %v6290_v39, %v6288_v8  ;;  %v7244_v16 = vld [vmem:[#allocation74_spill] sm:$0xff] }
 0x4c8   : > { %7236 = vst [vmem:[#allocation65_spill] sm:$0xff] %v6294_v18  ;;  %v6299_v3 = vpop.eup %4089  ;;  %4107 = vpow2.f32 %v2529_v12  ;;  %2681 = vadd.xlane.f32.xlu1 %v2680_v27  ;;  %v2160_v31 = vpop.xlane.xlu1 %2159  ;;  %v2337_v12 = vsub.f32 %v7246_v40, %v6242_v38  ;;  %v2535_v42 = vmul.f32 1.442695, %v2335_v43 }
 0x4c9   : > { %7239 = vst [vmem:[#allocation66_spill] sm:$0xff] %v6299_v3  ;;  %v6306_v26 = vpop.eup %4091  ;;  %4109 = vpow2.f32 %v2531_v32  ;;  %v2503_v37 = vmul.f32 1.442695, %v2319_v4  ;;  %v2321_v23 = vsub.f32 %v7243_v53, %v2160_v31  ;;  %v2322_v6 = vsub.f32 %v7244_v16, %v2160_v31  ;;  %2720 = vadd.xlane.f32.xlu0 %v2719_v28 }
 0x4ca   : > { %7242 = vst [vmem:[#allocation54_spill] sm:$0xff] %v6306_v26  ;;  %v6310_v49 = vpop.eup %4093  ;;  %4111 = vpow2.f32 %v2533_v55  ;;  %v2505_v27 = vmul.f32 1.442695, %v2320_v10  ;;  %v2722_v58 = vadd.f32 %v6299_v3, %v6294_v18  ;;  %v6316_v52 = vpop.xlane.xlu0 %2192  ;;  %v2537_v31 = vmul.f32 1.442695, %v2336_v29  ;;  %v7251_v29 = vld [vmem:[#allocation62_spill] sm:$0xff] }
 0x4cb   : > { %7245 = vst [vmem:[#allocation59_spill] sm:$0xff] %v6310_v49  ;;  %4113 = vpow2.f32 %v2503_v37  ;;  %v2507_v4 = vmul.f32 1.442695, %v2321_v23  ;;  %v2509_v32 = vmul.f32 1.442695, %v2322_v6  ;;  %v6318_v53 = vpop.eup %4095  ;;  %v2683_v10 = vadd.f32 %v6266_v14, %v6240_v1  ;;  %v7259_v18 = vld [vmem:[#allocation82_spill] sm:$0xff] }
 0x4cc   : > { %7247 = vst [vmem:[#allocation71_spill] sm:$0xff] %v6318_v53  ;;  %4115 = vpow2.f32 %v2505_v27  ;;  %2723 = vadd.xlane.f32.xlu1 %v2722_v58  ;;  %v6320_v55 = vpop.xlane.xlu1 %2195  ;;  %v2539_v40 = vmul.f32 1.442695, %v2337_v12  ;;  %v2686_v23 = vadd.f32 %v6280_v0, %v6272_v20  ;;  %v2338_v37 = vsub.f32 %v7251_v29, %v6242_v38  ;;  %v7252_v27 = vld [vmem:[#allocation79_spill] sm:$0xff] }
 0x4cd   : > { %v6324_v28 = vpop.eup %4097  ;;  %4117 = vpow2.f32 %v2507_v4  ;;  %2684 = vadd.xlane.f32.xlu0 %v2683_v10  ;;  %v7254_v4 = vld [vmem:[#allocation67_spill] sm:$0xff] }
 0x4ce   : > { %7248 = vst [vmem:[#allocation60_spill] sm:$0xff] %v6324_v28  ;;  %v6326_v16 = vpop.eup %4099  ;;  %4119 = vpow2.f32 %v2509_v32  ;;  %v2163_v6 = vpop.xlane.xlu0 %2162  ;;  %v2339_v12 = vsub.f32 %v7254_v4, %v6278_v63  ;;  %v7255_v32 = vld [vmem:[#allocation80_spill] sm:$0xff] }
 0x4cf   : > { %7249 = vst [vmem:[#allocation72_spill] sm:$0xff] %v6326_v16  ;;  %v6330_v43 = vpop.eup %4101  ;;  %4121 = vpow2.f32 %v2535_v42  ;;  %v2323_v58 = vsub.f32 %v7252_v27, %v2163_v6  ;;  %v2324_v10 = vsub.f32 %v7255_v32, %v2163_v6  ;;  %v2725_v20 = vadd.f32 %v6326_v16, %v6324_v28  ;;  %v7257_v42 = vld [vmem:[#allocation68_spill] sm:$0xff]  ;;  %v7258_v27 = vld [vmem:[#allocation81_spill] sm:$0xff] }
 0x4d0   : > { %7250 = vst [vmem:[#allocation73_spill] sm:$0xff] %v6330_v43  ;;  %v6335_v1 = vpop.eup %4103  ;;  %4123 = vpow2.f32 %v2537_v31  ;;  %2687 = vadd.xlane.f32.xlu1 %v2686_v23  ;;  %v2166_v14 = vpop.xlane.xlu1 %2165  ;;  %v2340_v38 = vsub.f32 %v7257_v42, %v6278_v63  ;;  %v7261_v23 = vld [vmem:[#allocation69_spill] sm:$0xff]  ;;  %v2541_v63 = vmul.f32 1.442695, %v2338_v37 }
 0x4d1   : > { %7253 = vst [vmem:[#allocation74_spill] sm:$0xff] %v6335_v1  ;;  %v6342_v0 = vpop.eup %4105  ;;  %v2511_v29 = vmul.f32 1.442695, %v2323_v58  ;;  %v2325_v8 = vsub.f32 %v7258_v27, %v2166_v14  ;;  %v2326_v31 = vsub.f32 %v7259_v18, %v2166_v14  ;;  %4125 = vpow2.f32 %v2539_v40  ;;  %2726 = vadd.xlane.f32.xlu0 %v2725_v20 }
 0x4d2   : > { %7256 = vst [vmem:[#allocation61_spill] sm:$0xff] %v6342_v0  ;;  %v6348_v3 = vpop.eup %4107  ;;  %v2341_v6 = vsub.f32 %v7261_v23, %v6284_v51  ;;  %v2513_v4 = vmul.f32 1.442695, %v2324_v10  ;;  %v2728_v32 = vadd.f32 %v6335_v1, %v6330_v43  ;;  %v6354_v28 = vpop.xlane.xlu0 %2198  ;;  %v2543_v18 = vmul.f32 1.442695, %v2339_v12 }
 0x4d3   : > { %7260 = vst [vmem:[#allocation62_spill] sm:$0xff] %v6348_v3  ;;  %v6356_v16 = vpop.eup %4109  ;;  %4127 = vpow2.f32 %v2511_v29  ;;  %v2515_v58 = vmul.f32 1.442695, %v2325_v8  ;;  %v2517_v42 = vmul.f32 1.442695, %v2326_v31  ;;  %v2689_v20 = vadd.f32 %v6128_v47, %v6123_v57  ;;  %v7267_v31 = vld [vmem:[#allocation70_spill] sm:$0xff] }
 0x4d4   : > { %7262 = vst [vmem:[#allocation79_spill] sm:$0xff] %v6356_v16  ;;  %v6358_v14 = vpop.eup %4111  ;;  %4129 = vpow2.f32 %v2513_v4  ;;  %2729 = vadd.xlane.f32.xlu1 %v2728_v32  ;;  %v6360_v40 = vpop.xlane.xlu1 %2201  ;;  %v2545_v27 = vmul.f32 1.442695, %v2340_v38  ;;  %v2547_v37 = vmul.f32 1.442695, %v2341_v6  ;;  %v2692_v8 = vadd.f32 %v6150_v24, %v6130_v9  ;;  %v7268_v32 = vld [vmem:[#allocation87_spill] sm:$0xff] }
 0x4d5   : > { %7263 = vst [vmem:[#allocation67_spill] sm:$0xff] %v6358_v14  ;;  %v6364_v10 = vpop.eup %4113  ;;  %4131 = vpow2.f32 %v2515_v58  ;;  %2690 = vadd.xlane.f32.xlu0 %v2689_v20  ;;  %v2342_v4 = vsub.f32 %v7267_v31, %v6284_v51  ;;  %v7270_v38 = vld [vmem:[#allocation75_spill] sm:$0xff]  ;;  %v7271_v58 = vld [vmem:[#allocation88_spill] sm:$0xff]  ;;  %v7273_v51 = vld [vmem:[#allocation89_spill] sm:$0xff] }
 0x4d6   : > { %7264 = vst [vmem:[#allocation80_spill] sm:$0xff] %v6364_v10  ;;  %v6366_v23 = vpop.eup %4115  ;;  %4133 = vpow2.f32 %v2517_v42  ;;  %v2217_v12 = vpop.xlane.xlu0 %2216  ;;  %v2343_v6 = vsub.f32 %v7270_v38, %v6316_v52 }
 0x4d7   : > { %7265 = vst [vmem:[#allocation68_spill] sm:$0xff] %v6366_v23  ;;  %v6370_v29 = vpop.eup %4117  ;;  %4135 = vpow2.f32 %v2541_v63  ;;  %v2359_v57 = vsub.f32 %v7268_v32, %v2217_v12  ;;  %v2360_v42 = vsub.f32 %v7271_v58, %v2217_v12  ;;  %v2731_v9 = vadd.f32 %v6366_v23, %v6364_v10  ;;  %v7274_v32 = vld [vmem:[#allocation90_spill] sm:$0xff] }
 0x4d8   : > { %7266 = vst [vmem:[#allocation81_spill] sm:$0xff] %v6370_v29  ;;  %v6375_v47 = vpop.eup %4119  ;;  %4137 = vpow2.f32 %v2543_v18  ;;  %2693 = vadd.xlane.f32.xlu1 %v2692_v8  ;;  %v2220_v20 = vpop.xlane.xlu1 %2219  ;;  %v7276_v18 = vld [vmem:[#allocation76_spill] sm:$0xff]  ;;  %v2549_v10 = vmul.f32 1.442695, %v2342_v4 }
 0x4d9   : > { %7269 = vst [vmem:[#allocation82_spill] sm:$0xff] %v6375_v47  ;;  %v6382_v24 = vpop.eup %4121  ;;  %4139 = vpow2.f32 %v2545_v27  ;;  %v2583_v63 = vmul.f32 1.442695, %v2359_v57  ;;  %v2361_v31 = vsub.f32 %v7273_v51, %v2220_v20  ;;  %v2362_v43 = vsub.f32 %v7274_v32, %v2220_v20  ;;  %2732 = vadd.xlane.f32.xlu0 %v2731_v9 }
 0x4da   : > { %7272 = vst [vmem:[#allocation69_spill] sm:$0xff] %v6382_v24  ;;  %v6386_v1 = vpop.eup %4123  ;;  %4141 = vpow2.f32 %v2547_v37  ;;  %v2344_v8 = vsub.f32 %v7276_v18, %v6316_v52  ;;  %v2585_v38 = vmul.f32 1.442695, %v2360_v42  ;;  %v2734_v12 = vadd.f32 %v6375_v47, %v6370_v29  ;;  %v6392_v58 = vpop.xlane.xlu0 %2204  ;;  %v7281_v18 = vld [vmem:[#allocation95_spill] sm:$0xff]  ;;  %v7288_v47 = vld [vmem:[#allocation98_spill] sm:$0xff] }
 0x4db   : > { %7275 = vst [vmem:[#allocation70_spill] sm:$0xff] %v6386_v1  ;;  %4143 = vpow2.f32 %v2583_v63  ;;  %v2587_v57 = vmul.f32 1.442695, %v2361_v31  ;;  %v2589_v27 = vmul.f32 1.442695, %v2362_v43  ;;  %v6394_v51 = vpop.eup %4125  ;;  %v2743_v52 = vadd.f32 %v6306_v26, %v6282_v30  ;;  %v7280_v63 = vld [vmem:[#allocation77_spill] sm:$0xff] }
 0x4dc   : > { %7277 = vst [vmem:[#allocation87_spill] sm:$0xff] %v6394_v51  ;;  %v2551_v20 = vmul.f32 1.442695, %v2343_v6  ;;  %4145 = vpow2.f32 %v2585_v38  ;;  %2735 = vadd.xlane.f32.xlu1 %v2734_v12  ;;  %v6396_v37 = vpop.xlane.xlu1 %2207  ;;  %v2553_v32 = vmul.f32 1.442695, %v2344_v8  ;;  %v2746_v43 = vadd.f32 %v6318_v53, %v6310_v49 }
 0x4dd   : > { %v6400_v9 = vpop.eup %4127  ;;  %4147 = vpow2.f32 %v2587_v57  ;;  %2744 = vadd.xlane.f32.xlu0 %v2743_v52  ;;  %v2345_v31 = vsub.f32 %v7280_v63, %v6320_v55  ;;  %v7283_v57 = vld [vmem:[#allocation78_spill] sm:$0xff] }
 0x4de   : > { %7278 = vst [vmem:[#allocation75_spill] sm:$0xff] %v6400_v9  ;;  %v6402_v42 = vpop.eup %4129  ;;  %4149 = vpow2.f32 %v2589_v27  ;;  %v2223_v4 = vpop.xlane.xlu0 %2222  ;;  %v2346_v8 = vsub.f32 %v7283_v57, %v6320_v55  ;;  %v7284_v27 = vld [vmem:[#allocation96_spill] sm:$0xff] }
 0x4df   : > { %v6406_v6 = vpop.eup %4131  ;;  %4151 = vpow2.f32 %v2549_v10  ;;  %v2363_v38 = vsub.f32 %v7281_v18, %v2223_v4  ;;  %v2364_v52 = vsub.f32 %v7284_v27, %v2223_v4  ;;  %v2737_v49 = vadd.f32 %v6402_v42, %v6400_v9  ;;  %v7286_v10 = vld [vmem:[#allocation83_spill] sm:$0xff]  ;;  %v7287_v18 = vld [vmem:[#allocation97_spill] sm:$0xff]  ;;  %v7290_v55 = vld [vmem:[#allocation84_spill] sm:$0xff] }
 0x4e0   : > { %7279 = vst [vmem:[#allocation88_spill] sm:$0xff] %v6406_v6  ;;  %v6411_v12 = vpop.eup %4133  ;;  %4153 = vpow2.f32 %v2551_v20  ;;  %2747 = vadd.xlane.f32.xlu1 %v2746_v43  ;;  %v2226_v30 = vpop.xlane.xlu1 %2225  ;;  %v2347_v63 = vsub.f32 %v7286_v10, %v6354_v28  ;;  %v2348_v43 = vsub.f32 %v7290_v55, %v6354_v28 }
 0x4e1   : > { %7282 = vst [vmem:[#allocation89_spill] sm:$0xff] %v6411_v12  ;;  %v6418_v53 = vpop.eup %4135  ;;  %v2591_v26 = vmul.f32 1.442695, %v2363_v38  ;;  %v2365_v29 = vsub.f32 %v7287_v18, %v2226_v30  ;;  %v2366_v20 = vsub.f32 %v7288_v47, %v2226_v30  ;;  %4155 = vpow2.f32 %v2553_v32  ;;  %2738 = vadd.xlane.f32.xlu0 %v2737_v49 }
 0x4e2   : > { %7285 = vst [vmem:[#allocation90_spill] sm:$0xff] %v6418_v53  ;;  %v6424_v23 = vpop.eup %4137  ;;  %v2593_v4 = vmul.f32 1.442695, %v2364_v52  ;;  %v2740_v57 = vadd.f32 %v6411_v12, %v6406_v6  ;;  %v6430_v27 = vpop.xlane.xlu0 %2210  ;;  %v2555_v38 = vmul.f32 1.442695, %v2345_v31  ;;  %v2749_v49 = vadd.f32 %v6348_v3, %v6342_v0  ;;  %v7297_v0 = vld [vmem:[#allocation104_spill] sm:$0xff] }
 0x4e3   : > { %7289 = vst [vmem:[#allocation76_spill] sm:$0xff] %v6424_v23  ;;  %v6432_v9 = vpop.eup %4139  ;;  %4157 = vpow2.f32 %v2591_v26  ;;  %v2595_v10 = vmul.f32 1.442695, %v2365_v29  ;;  %v2597_v18 = vmul.f32 1.442695, %v2366_v20  ;;  %v2752_v26 = vadd.f32 %v6358_v14, %v6356_v16  ;;  %v7295_v20 = vld [vmem:[#allocation103_spill] sm:$0xff] }
 0x4e4   : > { %7291 = vst [vmem:[#allocation77_spill] sm:$0xff] %v6432_v9  ;;  %v6434_v47 = vpop.eup %4141  ;;  %v2557_v30 = vmul.f32 1.442695, %v2346_v8  ;;  %4159 = vpow2.f32 %v2593_v4  ;;  %2741 = vadd.xlane.f32.xlu1 %v2740_v57  ;;  %v6436_v32 = vpop.xlane.xlu1 %2213  ;;  %v2559_v52 = vmul.f32 1.442695, %v2347_v63  ;;  %v7296_v63 = vld [vmem:[#allocation85_spill] sm:$0xff] }
 0x4e5   : > { %7292 = vst [vmem:[#allocation95_spill] sm:$0xff] %v6434_v47  ;;  %v6440_v28 = vpop.eup %4143  ;;  %4161 = vpow2.f32 %v2595_v10  ;;  %v2561_v31 = vmul.f32 1.442695, %v2348_v43  ;;  %2750 = vadd.xlane.f32.xlu0 %v2749_v49  ;;  %v2349_v10 = vsub.f32 %v7296_v63, %v6360_v40 }
 0x4e6   : > { %7293 = vst [vmem:[#allocation78_spill] sm:$0xff] %v6440_v28  ;;  %v6442_v55 = vpop.eup %4145  ;;  %4163 = vpow2.f32 %v2597_v18  ;;  %v2229_v29 = vpop.xlane.xlu0 %2228 }
 0x4e7   : > { %v6446_v8 = vpop.eup %4147  ;;  %4165 = vpow2.f32 %v2555_v38  ;;  %v2367_v4 = vsub.f32 %v7295_v20, %v2229_v29  ;;  %v2368_v43 = vsub.f32 %v7297_v0, %v2229_v29  ;;  %v2791_v49 = vadd.f32 %v6442_v55, %v6440_v28  ;;  %v7299_v38 = vld [vmem:[#allocation105_spill] sm:$0xff]  ;;  %v7300_v20 = vld [vmem:[#allocation106_spill] sm:$0xff] }
 0x4e8   : > { %7294 = vst [vmem:[#allocation96_spill] sm:$0xff] %v6446_v8  ;;  %v6449_v57 = vpop.eup %4149  ;;  %4167 = vpow2.f32 %v2557_v30  ;;  %2753 = vadd.xlane.f32.xlu1 %v2752_v26  ;;  %v2232_v18 = vpop.xlane.xlu1 %2231  ;;  %v7302_v30 = vld [vmem:[#allocation86_spill] sm:$0xff] }
 0x4e9   : > { %v6456_v16 = vpop.eup %4151  ;;  %4169 = vpow2.f32 %v2559_v52  ;;  %v2599_v14 = vmul.f32 1.442695, %v2367_v4  ;;  %v2369_v3 = vsub.f32 %v7299_v38, %v2232_v18  ;;  %v2370_v6 = vsub.f32 %v7300_v20, %v2232_v18  ;;  %2792 = vadd.xlane.f32.xlu0 %v2791_v49  ;;  %v7307_v38 = vld [vmem:[#allocation107_spill] sm:$0xff] }
 0x4ea   : > { %7298 = vst [vmem:[#allocation83_spill] sm:$0xff] %v6456_v16  ;;  %v6460_v12 = vpop.eup %4153  ;;  %4171 = vpow2.f32 %v2561_v31  ;;  %v2350_v26 = vsub.f32 %v7302_v30, %v6360_v40  ;;  %v2601_v63 = vmul.f32 1.442695, %v2368_v43  ;;  %v2794_v0 = vadd.f32 %v6449_v57, %v6446_v8  ;;  %v7308_v30 = vld [vmem:[#allocation108_spill] sm:$0xff] }
 0x4eb   : > { %7301 = vst [vmem:[#allocation97_spill] sm:$0xff] %v6460_v12  ;;  %4173 = vpow2.f32 %v2599_v14  ;;  %v2603_v29 = vmul.f32 1.442695, %v2369_v3  ;;  %v2605_v28 = vmul.f32 1.442695, %v2370_v6  ;;  %v6466_v52 = vpop.eup %4155  ;;  %v2755_v18 = vadd.f32 %v6386_v1, %v6382_v24 }
 0x4ec   : > { %7303 = vst [vmem:[#allocation98_spill] sm:$0xff] %v6466_v52  ;;  %v2563_v4 = vmul.f32 1.442695, %v2349_v10  ;;  %4175 = vpow2.f32 %v2601_v63  ;;  %2795 = vadd.xlane.f32.xlu1 %v2794_v0  ;;  %v2565_v43 = vmul.f32 1.442695, %v2350_v26  ;;  %v2758_v3 = vadd.f32 %v6418_v53, %v6394_v51  ;;  %v7306_v10 = vld [vmem:[#allocation91_spill] sm:$0xff] }
 0x4ed   : > { %v6470_v31 = vpop.eup %4157  ;;  %4177 = vpow2.f32 %v2603_v29  ;;  %2756 = vadd.xlane.f32.xlu0 %v2755_v18  ;;  %v2351_v49 = vsub.f32 %v7306_v10, %v6392_v58  ;;  %v7311_v10 = vld [vmem:[#allocation109_spill] sm:$0xff] }
 0x4ee   : > { %7304 = vst [vmem:[#allocation84_spill] sm:$0xff] %v6470_v31  ;;  %v6472_v40 = vpop.eup %4159  ;;  %4179 = vpow2.f32 %v2605_v28  ;;  %v2235_v14 = vpop.xlane.xlu0 %2234  ;;  %v7309_v28 = vld [vmem:[#allocation92_spill] sm:$0xff] }
 0x4ef   : > { %v6476_v6 = vpop.eup %4161  ;;  %v2371_v20 = vsub.f32 %v7307_v38, %v2235_v14  ;;  %v2372_v63 = vsub.f32 %v7308_v30, %v2235_v14  ;;  %v2797_v0 = vadd.f32 %v6472_v40, %v6470_v31  ;;  %4181 = vpow2.f32 %v2563_v4  ;;  %v7312_v38 = vld [vmem:[#allocation110_spill] sm:$0xff]  ;;  %v7314_v30 = vld [vmem:[#allocation93_spill] sm:$0xff] }
 0x4f0   : > { %7305 = vst [vmem:[#allocation103_spill] sm:$0xff] %v6476_v6  ;;  %v6484_v29 = vpop.eup %4163  ;;  %v2352_v26 = vsub.f32 %v7309_v28, %v6392_v58  ;;  %2759 = vadd.xlane.f32.xlu1 %v2758_v3  ;;  %v2238_v18 = vpop.xlane.xlu1 %2237  ;;  %4183 = vpow2.f32 %v2565_v43  ;;  %v2353_v31 = vsub.f32 %v7314_v30, %v6396_v37  ;;  %v2567_v3 = vmul.f32 1.442695, %v2351_v49 }
 0x4f1   : > { %v6488_v51 = vpop.eup %4165  ;;  %v2607_v24 = vmul.f32 1.442695, %v2371_v20  ;;  %v2609_v53 = vmul.f32 1.442695, %v2372_v63  ;;  %v2373_v1 = vsub.f32 %v7311_v10, %v2238_v18  ;;  %v2374_v8 = vsub.f32 %v7312_v38, %v2238_v18  ;;  %2798 = vadd.xlane.f32.xlu0 %v2797_v0 }
 0x4f2   : > { %7310 = vst [vmem:[#allocation85_spill] sm:$0xff] %v6488_v51  ;;  %v6492_v14 = vpop.eup %4167  ;;  %v2800_v58 = vadd.f32 %v6484_v29, %v6476_v6  ;;  %v2569_v10 = vmul.f32 1.442695, %v2352_v26  ;;  %v2761_v43 = vadd.f32 %v6432_v9, %v6424_v23  ;;  %v2571_v38 = vmul.f32 1.442695, %v2353_v31  ;;  %v7317_v26 = vld [vmem:[#allocation112_spill] sm:$0xff] }
 0x4f3   : > { %7313 = vst [vmem:[#allocation104_spill] sm:$0xff] %v6492_v14  ;;  %v6498_v4 = vpop.eup %4169  ;;  %4185 = vpow2.f32 %v2607_v24  ;;  %v2611_v20 = vmul.f32 1.442695, %v2373_v1  ;;  %v2613_v63 = vmul.f32 1.442695, %v2374_v8  ;;  %v2764_v24 = vadd.f32 %v6456_v16, %v6434_v47  ;;  %v7318_v31 = vld [vmem:[#allocation94_spill] sm:$0xff] }
 0x4f4   : > { %v6500_v28 = vpop.eup %4171  ;;  %4187 = vpow2.f32 %v2609_v53  ;;  %2801 = vadd.xlane.f32.xlu1 %v2800_v58  ;;  %v7316_v53 = vld [vmem:[#allocation111_spill] sm:$0xff]  ;;  %v7319_v16 = vld [vmem:[#allocation113_spill] sm:$0xff] }
 0x4f5   : > { %v6504_v18 = vpop.eup %4173  ;;  %4189 = vpow2.f32 %v2611_v20  ;;  %2762 = vadd.xlane.f32.xlu0 %v2761_v43 }
 0x4f6   : > { %7315 = vst [vmem:[#allocation105_spill] sm:$0xff] %v6504_v18  ;;  %v6506_v0 = vpop.eup %4175  ;;  %4191 = vpow2.f32 %v2613_v63  ;;  %v2241_v1 = vpop.xlane.xlu0 %2240  ;;  %v2354_v63 = vsub.f32 %v7318_v31, %v6396_v37 }
 0x4f7   : > { %v6510_v8 = vpop.eup %4177  ;;  %4193 = vpow2.f32 %v2567_v3  ;;  %v2375_v49 = vsub.f32 %v7316_v53, %v2241_v1  ;;  %v2376_v30 = vsub.f32 %v7317_v26, %v2241_v1  ;;  %v2803_v58 = vadd.f32 %v6506_v0, %v6504_v18  ;;  %v7320_v3 = vld [vmem:[#allocation114_spill] sm:$0xff]  ;;  %v7321_v1 = vld [vmem:[#allocation99_spill] sm:$0xff] }
 0x4f8   : > { %v6516_v20 = vpop.eup %4179  ;;  %4195 = vpow2.f32 %v2569_v10  ;;  %2765 = vadd.xlane.f32.xlu1 %v2764_v24  ;;  %v2244_v43 = vpop.xlane.xlu1 %2243  ;;  %v2355_v26 = vsub.f32 %v7321_v1, %v6430_v27 }
 0x4f9   : > { %v2615_v47 = vmul.f32 1.442695, %v2375_v49  ;;  %v2617_v23 = vmul.f32 1.442695, %v2376_v30  ;;  %v2377_v9 = vsub.f32 %v7319_v16, %v2244_v43  ;;  %v2378_v6 = vsub.f32 %v7320_v3, %v2244_v43  ;;  %v6522_v53 = vpop.eup %4181  ;;  %2804 = vadd.xlane.f32.xlu0 %v2803_v58  ;;  %v7325_v3 = vld [vmem:[#allocation115_spill] sm:$0xff] }
 0x4fa   : > { %4197 = vpow2.f32 %v2571_v38  ;;  %v2806_v10 = vadd.f32 %v6516_v20, %v6510_v8  ;;  %v6528_v31 = vpop.eup %4183  ;;  %v2573_v49 = vmul.f32 1.442695, %v2354_v63  ;;  %v2767_v16 = vadd.f32 %v6466_v52, %v6460_v12  ;;  %v3096_v38 = vld [vmem:[#allocation4 + $0x8] sm:$0xff] }
 0x4fb   : > { %4199 = vpow2.f32 %v2615_v47  ;;  %v2619_v37 = vmul.f32 1.442695, %v2377_v9  ;;  %v2621_v24 = vmul.f32 1.442695, %v2378_v6  ;;  %v2575_v58 = vmul.f32 1.442695, %v2355_v26  ;;  %3143 = vmatprep.mubr.bf16.mxu0 %v3096_v38 }
 0x4fc   : > { %4201 = vpow2.f32 %v2617_v23  ;;  %2807 = vadd.xlane.f32.xlu1 %v2806_v10  ;;  %v2770_v9 = vadd.f32 %v6492_v14, %v6488_v51  ;;  %v7324_v23 = vld [vmem:[#allocation100_spill] sm:$0xff]  ;;  %v7328_v38 = vld [vmem:[#allocation102_spill] sm:$0xff] }
 0x4fd   : > { %v6532_v30 = vpop.eup %4185  ;;  %4203 = vpow2.f32 %v2619_v37  ;;  %2768 = vadd.xlane.f32.xlu0 %v2767_v16  ;;  %v2356_v63 = vsub.f32 %v7324_v23, %v6430_v27  ;;  %v7326_v10 = vld [vmem:[#allocation116_spill] sm:$0xff]  ;;  %v2358_v51 = vsub.f32 %v7328_v38, %v6436_v32 }
 0x4fe   : > { %7322 = vst [vmem:[#allocation106_spill] sm:$0xff] %v6532_v30  ;;  %v6534_v43 = vpop.eup %4187  ;;  %4205 = vpow2.f32 %v2621_v24  ;;  %v2247_v47 = vpop.xlane.xlu0 %2246  ;;  %v7327_v24 = vld [vmem:[#allocation101_spill] sm:$0xff] }
 0x4ff   : > { %7323 = vst [vmem:[#allocation86_spill] sm:$0xff] %v6534_v43  ;;  %v6538_v6 = vpop.eup %4189  ;;  %v2379_v1 = vsub.f32 %v7325_v3, %v2247_v47  ;;  %v2380_v37 = vsub.f32 %v7326_v10, %v2247_v47  ;;  %v2809_v12 = vadd.f32 %v6534_v43, %v6532_v30  ;;  %4207 = vpow2.f32 %v2573_v49  ;;  %v7330_v3 = vld [vmem:[#allocation117_spill] sm:$0xff]  ;;  %v7331_v10 = vld [vmem:[#allocation118_spill] sm:$0xff] }
 0x500   : > { %v6546_v26 = vpop.eup %4191  ;;  %v2357_v16 = vsub.f32 %v7327_v24, %v6436_v32  ;;  %2771 = vadd.xlane.f32.xlu1 %v2770_v9  ;;  %v2250_v14 = vpop.xlane.xlu1 %2249  ;;  %4209 = vpow2.f32 %v2575_v58  ;;  %v2577_v24 = vmul.f32 1.442695, %v2356_v63  ;;  %v2776_v58 = vadd.f32 %v6528_v31, %v6522_v53 }
 0x501   : > { %v6552_v52 = vpop.eup %4193  ;;  %v2623_v27 = vmul.f32 1.442695, %v2379_v1  ;;  %v2625_v23 = vmul.f32 1.442695, %v2380_v37  ;;  %v2381_v47 = vsub.f32 %v7330_v3, %v2250_v14  ;;  %v2382_v18 = vsub.f32 %v7331_v10, %v2250_v14  ;;  %2810 = vadd.xlane.f32.xlu0 %v2809_v12 }
 0x502   : > { %7329 = vst [vmem:[#allocation91_spill] sm:$0xff] %v6552_v52  ;;  %v6556_v30 = vpop.eup %4195  ;;  %v2812_v49 = vadd.f32 %v6546_v26, %v6538_v6  ;;  %v2579_v43 = vmul.f32 1.442695, %v2357_v16  ;;  %v2773_v1 = vadd.f32 %v6500_v28, %v6498_v4  ;;  %v2581_v37 = vmul.f32 1.442695, %v2358_v51 }
 0x503   : > { %4211 = vpow2.f32 %v2623_v27  ;;  %v2627_v32 = vmul.f32 1.442695, %v2381_v47  ;;  %v2629_v9 = vmul.f32 1.442695, %v2382_v18  ;;  %v3100_v27 = vld [vmem:[#allocation4 + $0x28] sm:$0xff]  ;;  %v2779_v47 = vadd.f32 %v6556_v30, %v6552_v52  ;;  %v7343_v52 = vld [vmem:[#allocation122_spill] sm:$0xff] }
 0x504   : > { %v6560_v38 = vpop.eup %4197  ;;  %4213 = vpow2.f32 %v2625_v23  ;;  %2813 = vadd.xlane.f32.xlu1 %v2812_v49  ;;  %3192 = vmatprep.mubr.bf16.mxu1 %v3100_v27 }
 0x505   : > { %7332 = vst [vmem:[#allocation107_spill] sm:$0xff] %v6560_v38  ;;  %v6564_v14 = vpop.eup %4199  ;;  %4215 = vpow2.f32 %v2627_v32  ;;  %2774 = vadd.xlane.f32.xlu0 %v2773_v1 }
 0x506   : > { %v6566_v12 = vpop.eup %4201  ;;  %4217 = vpow2.f32 %v2629_v9 }
 0x507   : > { %v6570_v18 = vpop.eup %4203  ;;  %4219 = vpow2.f32 %v2577_v24  ;;  %v2815_v63 = vadd.f32 %v6566_v12, %v6564_v14 }
 0x508   : > { %v6574_v16 = vpop.eup %4205  ;;  %4221 = vpow2.f32 %v2579_v43  ;;  %2777 = vadd.xlane.f32.xlu1 %v2776_v58 }
 0x509   : > { %4223 = vpow2.f32 %v2581_v37  ;;  %v2818_v51 = vadd.f32 %v6574_v16, %v6570_v18  ;;  %v6578_v23 = vpop.eup %4207  ;;  %2816 = vadd.xlane.f32.xlu0 %v2815_v63 }
 0x50a   : > { %v6580_v3 = vpop.eup %4209  ;;  %v2782_v43 = vadd.f32 %v6578_v23, %v6560_v38  ;;  %v7342_v38 = vld [vmem:[#allocation120_spill] sm:$0xff] }
 0x50b   : > { %7333 = vst [vmem:[#allocation108_spill] sm:$0xff] %v6580_v3 }
 0x50c   : > { %2819 = vadd.xlane.f32.xlu1 %v2818_v51 }
 0x50d   : > { %v6584_v10 = vpop.eup %4211  ;;  %2780 = vadd.xlane.f32.xlu0 %v2779_v47 }
 0x50e   : > { %7334 = vst [vmem:[#allocation92_spill] sm:$0xff] %v6584_v10  ;;  %v6586_v49 = vpop.eup %4213 }
 0x50f   : > { %7335 = vst [vmem:[#allocation109_spill] sm:$0xff] %v6586_v49  ;;  %v6590_v24 = vpop.eup %4215  ;;  %v2821_v32 = vadd.f32 %v6586_v49, %v6584_v10 }
 0x510   : > { %7336 = vst [vmem:[#allocation110_spill] sm:$0xff] %v6590_v24  ;;  %v6594_v9 = vpop.eup %4217  ;;  %2783 = vadd.xlane.f32.xlu1 %v2782_v43 }
 0x511   : > { %7337 = vst [vmem:[#allocation93_spill] sm:$0xff] %v6594_v9  ;;  %v6596_v1 = vpop.eup %4219  ;;  %v2824_v37 = vadd.f32 %v6594_v9, %v6590_v24  ;;  %2822 = vadd.xlane.f32.xlu0 %v2821_v32 }
 0x512   : > { %7338 = vst [vmem:[#allocation111_spill] sm:$0xff] %v6596_v1  ;;  %v6600_v58 = vpop.eup %4221  ;;  %v2649_v63 = vpop.xlane.xlu0 %2648  ;;  %v2785_v51 = vadd.f32 %v6596_v1, %v6580_v3 }
 0x513   : > { %7339 = vst [vmem:[#allocation112_spill] sm:$0xff] %v6600_v58  ;;  %v6602_v27 = vpop.eup %4223  ;;  %4225 = vrcp.f32 %v2649_v63 }
 0x514   : > { %7340 = vst [vmem:[#allocation94_spill] sm:$0xff] %v6602_v27  ;;  %2825 = vadd.xlane.f32.xlu1 %v2824_v37  ;;  %v2788_v43 = vadd.f32 %v6602_v27, %v6600_v58 }
 0x515   : > { %v2652_v47 = vpop.xlane.xlu1 %2651  ;;  %2786 = vadd.xlane.f32.xlu0 %v2785_v51 }
 0x516   : > { %4227 = vrcp.f32 %v2652_v47 }
 0x518   : > { %2789 = vadd.xlane.f32.xlu1 %v2788_v43 }
 0x51a   : > { %v2655_v10 = vpop.xlane.xlu0 %2654 }
 0x51b   : > { %4229 = vrcp.f32 %v2655_v10 }
 0x51d   : > { %v2658_v24 = vpop.xlane.xlu1 %2657  ;;  %v4226_v9 = vpop.eup %4225 }
 0x51e   : > { %4231 = vrcp.f32 %v2658_v24  ;;  %v2904_v49 = vmul.f32 %v4226_v9, %v6046_v13  ;;  %v2903_v63 = vmul.f32 %v4226_v9, %v6042_v44  ;;  %v7341_v24 = vld [vmem:[#allocation121_spill] sm:$0xff] }
 0x520   : > { %v4228_v32 = vpop.eup %4227 }
 0x521   : > { %v2906_v37 = vmul.f32 %v4228_v32, %v6054_v21  ;;  %v2905_v3 = vmul.f32 %v4228_v32, %v6048_v41 }
 0x522   : > { %v2661_v47 = vpop.xlane.xlu0 %2660 }
 0x523   : > { %v3032_v51 = vpack.c.bf16 %v2906_v37, %v2904_v49  ;;  %v3031_v1 = vpack.c.bf16 %v2905_v3, %v2903_v63  ;;  %4233 = vrcp.f32 %v2661_v47  ;;  %v7344_v63 = vld [vmem:[#allocation123_spill] sm:$0xff] }
 0x524   : > { %v2664_v58 = vpop.xlane.xlu1 %2663 }
 0x525   : > { %3111 = vmatprep.subr.bf16.mxu0 %v3032_v51  ;;  %v4230_v43 = vpop.eup %4229  ;;  %4235 = vrcp.f32 %v2664_v58 }
 0x526   : > { %3112 = vmatpush1.bf16.xpose.msra.mxu0 %v3031_v1  ;;  %v2908_v27 = vmul.f32 %v4230_v43, %v7341_v24  ;;  %v2907_v21 = vmul.f32 %v4230_v43, %v7342_v38 }
 0x528   : > { %v4232_v10 = vpop.eup %4231 }
 0x529   : > { %v2910_v13 = vmul.f32 %v4232_v10, %v6070_v59  ;;  %v2909_v44 = vmul.f32 %v4232_v10, %v7343_v52 }
 0x52a   : > { %v2667_v9 = vpop.xlane.xlu0 %2666 }
 0x52b   : > { %v3034_v41 = vpack.c.bf16 %v2910_v13, %v2908_v27  ;;  %v3033_v32 = vpack.c.bf16 %v2909_v44, %v2907_v21  ;;  %4237 = vrcp.f32 %v2667_v9 }
 0x52c   : > { %v2670_v3 = vpop.xlane.xlu1 %2669 }
 0x52d   : > { %3113 = vmatprep.subr.bf16.mxu0 %v3034_v41  ;;  %v4234_v49 = vpop.eup %4233  ;;  %4239 = vrcp.f32 %v2670_v3 }
 0x52e   : > { %3114 = vmatpush1.bf16.xpose.msra.mxu0 %v3033_v32  ;;  %v2912_v1 = vmul.f32 %v4234_v49, %v6080_v35  ;;  %v2911_v59 = vmul.f32 %v4234_v49, %v6077_v45 }
 0x52f   : > { %v4236_v58 = vpop.eup %4235 }
 0x530   : > { %v2914_v37 = vmul.f32 %v4236_v58, %v6085_v33  ;;  %v2913_v38 = vmul.f32 %v4236_v58, %v7344_v63 }
 0x532   : > { %v3036_v47 = vpack.c.bf16 %v2914_v37, %v2912_v1  ;;  %v3035_v52 = vpack.c.bf16 %v2913_v38, %v2911_v59 }
 0x534   : > { %3115 = vmatprep.subr.bf16.mxu0 %v3036_v47 }
 0x535   : > { %v4238_v27 = vpop.eup %4237 }
 0x536   : > { %3116 = vmatpush1.bf16.xpose.msra.mxu0 %v3035_v52  ;;  %v2697_v51 = vpop.xlane.xlu0 %2696  ;;  %v2916_v24 = vmul.f32 %v4238_v27, %v6101_v36  ;;  %v2915_v35 = vmul.f32 %v4238_v27, %v6097_v62 }
 0x537   : > { %v4240_v43 = vpop.eup %4239  ;;  %4241 = vrcp.f32 %v2697_v51 }
 0x538   : > { %v2918_v13 = vmul.f32 %v4240_v43, %v6106_v50  ;;  %v2917_v33 = vmul.f32 %v4240_v43, %v6104_v48 }
 0x539   : > { %v2700_v10 = vpop.xlane.xlu1 %2699 }
 0x53a   : > { %4243 = vrcp.f32 %v2700_v10  ;;  %v2253_v45 = vpop.xlane.xlu0 %2252  ;;  %v3038_v21 = vpack.c.bf16 %v2918_v13, %v2916_v24  ;;  %v3037_v44 = vpack.c.bf16 %v2917_v33, %v2915_v35 }
 0x53b   : > { %v2383_v9 = vsub.f32 %v6016_v46, %v2253_v45  ;;  %v2384_v41 = vsub.f32 %v6018_v19, %v2253_v45 }
 0x53c   : > { %3117 = vmatprep.subr.bf16.mxu0 %v3038_v21 }
 0x53d   : > { %v2256_v32 = vpop.xlane.xlu1 %2255  ;;  %v2631_v3 = vmul.f32 1.442695, %v2383_v9  ;;  %v2633_v49 = vmul.f32 1.442695, %v2384_v41 }
 0x53e   : > { %v2385_v36 = vsub.f32 %v6022_v22, %v2256_v32  ;;  %v2386_v50 = vsub.f32 %v6024_v15, %v2256_v32  ;;  %3118 = vmatpush1.bf16.xpose.msra.mxu0 %v3037_v44  ;;  %v2703_v62 = vpop.xlane.xlu0 %2702 }
 0x53f   : > { %4245 = vpow2.f32 %v2631_v3 }
 0x540   : > { %v2635_v48 = vmul.f32 1.442695, %v2385_v36  ;;  %v2637_v58 = vmul.f32 1.442695, %v2386_v50  ;;  %4247 = vpow2.f32 %v2633_v49 }
 0x541   : > { %v2706_v1 = vpop.xlane.xlu1 %2705  ;;  %v4242_v37 = vpop.eup %4241 }
 0x542   : > { %4249 = vpow2.f32 %v2635_v48  ;;  %v2673_v46 = vpop.xlane.xlu0 %2672  ;;  %v2936_v59 = vmul.f32 %v4242_v37, %v6136_v11  ;;  %v2935_v15 = vmul.f32 %v4242_v37, %v6134_v2 }
 0x543   : > { %4251 = vpow2.f32 %v2637_v58 }
 0x544   : > { %v4244_v19 = vpop.eup %4243  ;;  %4253 = vrcp.f32 %v2703_v62 }
 0x545   : > { %4255 = vrcp.f32 %v2706_v1  ;;  %v2676_v63 = vpop.xlane.xlu1 %2675  ;;  %v2938_v22 = vmul.f32 %v4244_v19, %v6143_v17  ;;  %v2937_v38 = vmul.f32 %v4244_v19, %v6138_v61  ;;  %v7346_v1 = vld [vmem:[#allocation129_spill] sm:$0xff] }
 0x546   : > { %4257 = vrcp.f32 %v2673_v46  ;;  %v2709_v47 = vpop.xlane.xlu0 %2708  ;;  %v7347_v46 = vld [vmem:[#allocation128_spill] sm:$0xff] }
 0x547   : > { %4259 = vrcp.f32 %v2676_v63  ;;  %v3048_v52 = vpack.c.bf16 %v2938_v22, %v2936_v59  ;;  %v3047_v27 = vpack.c.bf16 %v2937_v38, %v2935_v15  ;;  %v7349_v22 = vld [vmem:[#allocation131_spill] sm:$0xff] }
 0x548   : > { %4261 = vrcp.f32 %v2709_v47 }
 0x549   : > { %v2712_v51 = vpop.xlane.xlu1 %2711  ;;  %3160 = vmatprep.subr.bf16.mxu1 %v3048_v52  ;;  %v6632_v43 = vpop.eup %4245 }
 0x54a   : > { %4263 = vrcp.f32 %v2712_v51  ;;  %3161 = vmatpush1.bf16.xpose.msra.mxu1 %v3047_v27  ;;  %v6634_v11 = vpop.eup %4247  ;;  %v2259_v10 = vpop.xlane.xlu0 %2258 }
 0x54b   : > { %v2387_v2 = vsub.f32 %v6032_v60, %v2259_v10  ;;  %v2388_v61 = vsub.f32 %v6034_v25, %v2259_v10  ;;  %v2827_v24 = vadd.f32 %v6634_v11, %v6632_v43  ;;  %v7350_v10 = vld [vmem:[#allocation136_spill] sm:$0xff] }
 0x54c   : > { %v6636_v17 = vpop.eup %4249 }
 0x54d   : > { %v6642_v13 = vpop.eup %4251  ;;  %v2262_v35 = vpop.xlane.xlu1 %2261  ;;  %v2639_v45 = vmul.f32 1.442695, %v2387_v2  ;;  %v2641_v21 = vmul.f32 1.442695, %v2388_v61  ;;  %2828 = vadd.xlane.f32.xlu0 %v2827_v24  ;;  %v7351_v61 = vld [vmem:[#allocation55_spill] sm:$0xff] }
 0x54e   : > { %v4254_v33 = vpop.eup %4253  ;;  %v2389_v44 = vsub.f32 %v6038_v54, %v2262_v35  ;;  %v2390_v9 = vsub.f32 %v7224_v34, %v2262_v35  ;;  %v2830_v60 = vadd.f32 %v6642_v13, %v6636_v17  ;;  %v2715_v32 = vpop.xlane.xlu0 %2714  ;;  %v7345_v34 = vld [vmem:[#allocation130_spill] sm:$0xff]  ;;  %v7352_v35 = vld [vmem:[#allocation137_spill] sm:$0xff] }
 0x54f   : > { %v4256_v41 = vpop.eup %4255  ;;  %v2940_v25 = vmul.f32 %v4254_v33, %v6168_v5  ;;  %v2939_v3 = vmul.f32 %v4254_v33, %v6166_v7  ;;  %4265 = vpow2.f32 %v2639_v45  ;;  %v7348_v7 = vld [vmem:[#allocation132_spill] sm:$0xff] }
 0x550   : > { %v4258_v49 = vpop.eup %4257  ;;  %v2643_v36 = vmul.f32 1.442695, %v2389_v44  ;;  %v2645_v50 = vmul.f32 1.442695, %v2390_v9  ;;  %v2942_v62 = vmul.f32 %v4256_v41, %v6178_v56  ;;  %4267 = vpow2.f32 %v2641_v21  ;;  %2831 = vadd.xlane.f32.xlu1 %v2830_v60  ;;  %v7353_v44 = vld [vmem:[#allocation135_spill] sm:$0xff] }
 0x551   : > { %v4260_v48 = vpop.eup %4259  ;;  %v2718_v54 = vpop.xlane.xlu1 %2717  ;;  %v2941_v58 = vmul.f32 %v4256_v41, %v7345_v34  ;;  %v2920_v37 = vmul.f32 %v4258_v49, %v7346_v1  ;;  %v2919_v19 = vmul.f32 %v4258_v49, %v7347_v46  ;;  %v7354_v1 = vld [vmem:[#allocation50_spill] sm:$0xff] }
 0x552   : > { %v4262_v59 = vpop.eup %4261  ;;  %4269 = vpow2.f32 %v2643_v36  ;;  %v3050_v5 = vpack.c.bf16 %v2942_v62, %v2940_v25  ;;  %v2922_v63 = vmul.f32 %v4260_v48, %v7348_v7  ;;  %v2921_v15 = vmul.f32 %v4260_v48, %v7349_v22  ;;  %v2679_v56 = vpop.xlane.xlu0 %2678 }
 0x553   : > { %4271 = vpow2.f32 %v2645_v50  ;;  %v3049_v38 = vpack.c.bf16 %v2941_v58, %v2939_v3  ;;  %v2944_v2 = vmul.f32 %v4262_v59, %v7350_v10  ;;  %v2943_v9 = vmul.f32 %v4262_v59, %v7353_v44  ;;  %v7359_v10 = vld [vmem:[#allocation56_spill] sm:$0xff] }
 0x554   : > { %v4264_v47 = vpop.eup %4263  ;;  %4273 = vrcp.f32 %v2715_v32  ;;  %3162 = vmatprep.subr.bf16.mxu1 %v3050_v5  ;;  %v3040_v52 = vpack.c.bf16 %v2922_v63, %v2920_v37  ;;  %v3039_v27 = vpack.c.bf16 %v2921_v15, %v2919_v19  ;;  %v7355_v19 = vld [vmem:[#allocation51_spill] sm:$0xff]  ;;  %v7356_v5 = vld [vmem:[#allocation58_spill] sm:$0xff] }
 0x555   : > { %4275 = vrcp.f32 %v2718_v54  ;;  %3163 = vmatpush1.bf16.xpose.msra.mxu1 %v3049_v38  ;;  %v2682_v51 = vpop.xlane.xlu1 %2681  ;;  %v2946_v24 = vmul.f32 %v4264_v47, %v7351_v61  ;;  %v2945_v33 = vmul.f32 %v4264_v47, %v7352_v35  ;;  %v7357_v63 = vld [vmem:[#allocation138_spill] sm:$0xff] }
 0x556   : > { %4277 = vrcp.f32 %v2679_v56  ;;  %3119 = vmatprep.subr.bf16.mxu0 %v3040_v52  ;;  %v2721_v45 = vpop.xlane.xlu0 %2720  ;;  %v7358_v56 = vld [vmem:[#allocation134_spill] sm:$0xff] }
 0x557   : > { %4279 = vrcp.f32 %v2682_v51  ;;  %3120 = vmatpush1.bf16.xpose.msra.mxu0 %v3039_v27  ;;  %v3052_v21 = vpack.c.bf16 %v2946_v24, %v2944_v2  ;;  %v3051_v60 = vpack.c.bf16 %v2945_v33, %v2943_v9  ;;  %v7360_v24 = vld [vmem:[#allocation133_spill] sm:$0xff] }
 0x558   : > { %4281 = vrcp.f32 %v2721_v45  ;;  %v7361_v33 = vld [vmem:[#allocation49_spill] sm:$0xff] }
 0x559   : > { %v2724_v41 = vpop.xlane.xlu1 %2723  ;;  %3164 = vmatprep.subr.bf16.mxu1 %v3052_v21  ;;  %v6660_v32 = vpop.eup %4265 }
 0x55a   : > { %4283 = vrcp.f32 %v2724_v41  ;;  %v6662_v25 = vpop.eup %4267  ;;  %v2685_v3 = vpop.xlane.xlu0 %2684 }
 0x55b   : > { %4285 = vrcp.f32 %v2685_v3  ;;  %v2833_v36 = vadd.f32 %v6662_v25, %v6660_v32  ;;  %v7362_v3 = vld [vmem:[#allocation66_spill] sm:$0xff] }
 0x55c   : > { %v6664_v49 = vpop.eup %4269 }
 0x55d   : > { %v6668_v50 = vpop.eup %4271  ;;  %3165 = vmatpush1.bf16.xpose.msra.mxu1 %v3051_v60  ;;  %v2688_v62 = vpop.xlane.xlu1 %2687  ;;  %2834 = vadd.xlane.f32.xlu0 %v2833_v36 }
 0x55e   : > { %v4274_v48 = vpop.eup %4273  ;;  %4287 = vrcp.f32 %v2688_v62  ;;  %v2836_v54 = vadd.f32 %v6668_v50, %v6664_v49  ;;  %v2727_v58 = vpop.xlane.xlu0 %2726  ;;  %v7363_v62 = vld [vmem:[#allocation65_spill] sm:$0xff] }
 0x55f   : > { %v4276_v34 = vpop.eup %4275  ;;  %v2948_v37 = vmul.f32 %v4274_v48, %v7354_v1  ;;  %4289 = vrcp.f32 %v2727_v58  ;;  %v2947_v7 = vmul.f32 %v4274_v48, %v7356_v5  ;;  %v7365_v5 = vld [vmem:[#allocation63_spill] sm:$0xff] }
 0x560   : > { %v4278_v46 = vpop.eup %4277  ;;  %2837 = vadd.xlane.f32.xlu1 %v2836_v54  ;;  %v2950_v59 = vmul.f32 %v4276_v34, %v7355_v19  ;;  %v2949_v22 = vmul.f32 %v4276_v34, %v7357_v63  ;;  %v7364_v34 = vld [vmem:[#allocation53_spill] sm:$0xff] }
 0x561   : > { %v4280_v15 = vpop.eup %4279  ;;  %v2730_v38 = vpop.xlane.xlu1 %2729  ;;  %v2924_v47 = vmul.f32 %v4278_v46, %v7358_v56  ;;  %v2923_v35 = vmul.f32 %v4278_v46, %v7360_v24 }
 0x562   : > { %v4282_v52 = vpop.eup %4281  ;;  %4291 = vrcp.f32 %v2730_v38  ;;  %v3054_v27 = vpack.c.bf16 %v2950_v59, %v2948_v37  ;;  %v3053_v51 = vpack.c.bf16 %v2949_v22, %v2947_v7  ;;  %v2926_v2 = vmul.f32 %v4280_v15, %v7359_v10  ;;  %v2691_v61 = vpop.xlane.xlu0 %2690  ;;  %v7367_v22 = vld [vmem:[#allocation57_spill] sm:$0xff]  ;;  %v7368_v38 = vld [vmem:[#allocation52_spill] sm:$0xff] }
 0x563   : > { %v2925_v45 = vmul.f32 %v4280_v15, %v7361_v33  ;;  %4293 = vrcp.f32 %v2691_v61  ;;  %v2952_v60 = vmul.f32 %v4282_v52, %v6290_v39  ;;  %v2951_v58 = vmul.f32 %v4282_v52, %v7364_v34  ;;  %v7366_v39 = vld [vmem:[#allocation119_spill] sm:$0xff]  ;;  %v7369_v61 = vld [vmem:[#allocation72_spill] sm:$0xff] }
 0x564   : > { %v4284_v21 = vpop.eup %4283  ;;  %3166 = vmatprep.subr.bf16.mxu1 %v3054_v27  ;;  %v3042_v44 = vpack.c.bf16 %v2926_v2, %v2924_v47 }
 0x565   : > { %3167 = vmatpush1.bf16.xpose.msra.mxu1 %v3053_v51  ;;  %v2694_v9 = vpop.xlane.xlu1 %2693  ;;  %v3041_v41 = vpack.c.bf16 %v2925_v45, %v2923_v35  ;;  %v2954_v36 = vmul.f32 %v4284_v21, %v7362_v3  ;;  %v2953_v48 = vmul.f32 %v4284_v21, %v7363_v62  ;;  %v4286_v54 = vpop.eup %4285  ;;  %v7370_v35 = vld [vmem:[#allocation74_spill] sm:$0xff]  ;;  %v7371_v45 = vld [vmem:[#allocation73_spill] sm:$0xff] }
 0x566   : > { %4295 = vrcp.f32 %v2694_v9  ;;  %3121 = vmatprep.subr.bf16.mxu0 %v3042_v44  ;;  %v2733_v1 = vpop.xlane.xlu0 %2732  ;;  %v2928_v7 = vmul.f32 %v4286_v54, %v7365_v5  ;;  %v2927_v15 = vmul.f32 %v4286_v54, %v7367_v22  ;;  %v7372_v9 = vld [vmem:[#allocation60_spill] sm:$0xff]  ;;  %v7373_v54 = vld [vmem:[#allocation125_spill] sm:$0xff] }
 0x567   : > { %3122 = vmatpush1.bf16.xpose.msra.mxu0 %v3041_v41  ;;  %v3056_v37 = vpack.c.bf16 %v2954_v36, %v2952_v60  ;;  %4297 = vrcp.f32 %v2733_v1  ;;  %v3055_v19 = vpack.c.bf16 %v2953_v48, %v2951_v58  ;;  %v7374_v58 = vld [vmem:[#allocation127_spill] sm:$0xff] }
 0x568   : > { %v4288_v46 = vpop.eup %4287 }
 0x569   : > { %v2736_v59 = vpop.xlane.xlu1 %2735  ;;  %3168 = vmatprep.subr.bf16.mxu1 %v3056_v37  ;;  %v2930_v63 = vmul.f32 %v4288_v46, %v7366_v39  ;;  %v2929_v56 = vmul.f32 %v4288_v46, %v7368_v38  ;;  %v4290_v47 = vpop.eup %4289  ;;  %v7375_v37 = vld [vmem:[#allocation124_spill] sm:$0xff] }
 0x56a   : > { %4299 = vrcp.f32 %v2736_v59  ;;  %v2745_v27 = vpop.xlane.xlu0 %2744  ;;  %v2956_v24 = vmul.f32 %v4290_v47, %v7369_v61  ;;  %v2955_v41 = vmul.f32 %v4290_v47, %v7372_v9  ;;  %v7377_v38 = vld [vmem:[#allocation68_spill] sm:$0xff]  ;;  %v7378_v47 = vld [vmem:[#allocation82_spill] sm:$0xff] }
 0x56b   : > { %v3044_v52 = vpack.c.bf16 %v2930_v63, %v2928_v7  ;;  %v3043_v51 = vpack.c.bf16 %v2929_v56, %v2927_v15  ;;  %4301 = vrcp.f32 %v2745_v27 }
 0x56c   : > { %v4292_v10 = vpop.eup %4291 }
 0x56d   : > { %3169 = vmatpush1.bf16.xpose.msra.mxu1 %v3055_v19  ;;  %v2748_v2 = vpop.xlane.xlu1 %2747  ;;  %3123 = vmatprep.subr.bf16.mxu0 %v3044_v52  ;;  %v2958_v33 = vmul.f32 %v4292_v10, %v7370_v35  ;;  %v2957_v21 = vmul.f32 %v4292_v10, %v7371_v45  ;;  %v4294_v44 = vpop.eup %4293  ;;  %v7376_v19 = vld [vmem:[#allocation126_spill] sm:$0xff]  ;;  %v7379_v52 = vld [vmem:[#allocation81_spill] sm:$0xff] }
 0x56e   : > { %4303 = vrcp.f32 %v2748_v2  ;;  %v2739_v60 = vpop.xlane.xlu0 %2738  ;;  %v2932_v34 = vmul.f32 %v4294_v44, %v7373_v54  ;;  %v2931_v46 = vmul.f32 %v4294_v44, %v7375_v37  ;;  %v7380_v2 = vld [vmem:[#allocation80_spill] sm:$0xff]  ;;  %v7381_v44 = vld [vmem:[#allocation54_spill] sm:$0xff] }
 0x56f   : > { %3124 = vmatpush1.bf16.xpose.msra.mxu0 %v3043_v51  ;;  %v3058_v3 = vpack.c.bf16 %v2958_v33, %v2956_v24  ;;  %4305 = vrcp.f32 %v2739_v60  ;;  %v3057_v62 = vpack.c.bf16 %v2957_v21, %v2955_v41  ;;  %v7382_v41 = vld [vmem:[#allocation71_spill] sm:$0xff] }
 0x570   : > { %v4296_v36 = vpop.eup %4295 }
 0x571   : > { %v2742_v48 = vpop.xlane.xlu1 %2741  ;;  %3170 = vmatprep.subr.bf16.mxu1 %v3058_v3  ;;  %v2934_v1 = vmul.f32 %v4296_v36, %v7374_v58  ;;  %v2933_v59 = vmul.f32 %v4296_v36, %v7376_v19  ;;  %v4298_v5 = vpop.eup %4297  ;;  %v7383_v3 = vld [vmem:[#allocation64_spill] sm:$0xff] }
 0x572   : > { %4307 = vrcp.f32 %v2742_v48  ;;  %v2751_v7 = vpop.xlane.xlu0 %2750  ;;  %v2960_v56 = vmul.f32 %v4298_v5, %v7377_v38  ;;  %v2959_v61 = vmul.f32 %v4298_v5, %v7380_v2  ;;  %v7385_v5 = vld [vmem:[#allocation89_spill] sm:$0xff]  ;;  %v7387_v38 = vld [vmem:[#allocation75_spill] sm:$0xff] }
 0x573   : > { %v3046_v39 = vpack.c.bf16 %v2934_v1, %v2932_v34  ;;  %v3045_v63 = vpack.c.bf16 %v2933_v59, %v2931_v46  ;;  %4309 = vrcp.f32 %v2751_v7  ;;  %v3095_v1 = vld [vmem:[#allocation4] sm:$0xff] }
 0x574   : > { %v4300_v22 = vpop.eup %4299 }
 0x575   : > { %3171 = vmatpush1.bf16.xpose.msra.mxu1 %v3057_v62  ;;  %v2754_v15 = vpop.xlane.xlu1 %2753  ;;  %3125 = vmatprep.subr.bf16.mxu0 %v3046_v39  ;;  %v2962_v27 = vmul.f32 %v4300_v22, %v7378_v47  ;;  %v2961_v51 = vmul.f32 %v4300_v22, %v7379_v52  ;;  %v4302_v10 = vpop.eup %4301  ;;  %v7384_v62 = vld [vmem:[#allocation59_spill] sm:$0xff]  ;;  %v7386_v39 = vld [vmem:[#allocation88_spill] sm:$0xff]  ;;  %v3098_v22 = vld [vmem:[#allocation4 + $0x18] sm:$0xff] }
 0x576   : > { %4311 = vrcp.f32 %v2754_v15  ;;  %v2793_v24 = vpop.xlane.xlu0 %2792  ;;  %v2968_v9 = vmul.f32 %v4302_v10, %v7381_v44  ;;  %v2967_v36 = vmul.f32 %v4302_v10, %v7383_v3  ;;  %v3097_v3 = vld [vmem:[#allocation4 + $0x10] sm:$0xff] }
 0x577   : > { %3126 = vmatpush1.bf16.xpose.msra.mxu0 %v3045_v63  ;;  %v3060_v35 = vpack.c.bf16 %v2962_v27, %v2960_v56  ;;  %4313 = vrcp.f32 %v2793_v24  ;;  %v3059_v45 = vpack.c.bf16 %v2961_v51, %v2959_v61  ;;  %v7389_v61 = vld [vmem:[#allocation67_spill] sm:$0xff] }
 0x578   : > { %v4304_v33 = vpop.eup %4303 }
 0x579   : > { %v2796_v21 = vpop.xlane.xlu1 %2795  ;;  %3172 = vmatprep.subr.bf16.mxu1 %v3060_v35  ;;  %v2970_v60 = vmul.f32 %v4304_v33, %v7382_v41  ;;  %v2969_v48 = vmul.f32 %v4304_v33, %v7384_v62  ;;  %v4306_v54 = vpop.eup %4305  ;;  %v7390_v35 = vld [vmem:[#allocation61_spill] sm:$0xff] }
 0x57a   : > { %4315 = vrcp.f32 %v2796_v21  ;;  %v2757_v34 = vpop.xlane.xlu0 %2756  ;;  %v2964_v59 = vmul.f32 %v4306_v54, %v6402_v42  ;;  %v2963_v56 = vmul.f32 %v4306_v54, %v7387_v38  ;;  %v7388_v42 = vld [vmem:[#allocation62_spill] sm:$0xff] }
 0x57b   : > { %v3064_v58 = vpack.c.bf16 %v2970_v60, %v2968_v9  ;;  %v3063_v37 = vpack.c.bf16 %v2969_v48, %v2967_v36  ;;  %4317 = vrcp.f32 %v2757_v34  ;;  %v7392_v34 = vld [vmem:[#allocation96_spill] sm:$0xff] }
 0x57c   : > { %v4308_v46 = vpop.eup %4307 }
 0x57d   : > { %3173 = vmatpush1.bf16.xpose.msra.mxu1 %v3059_v45  ;;  %v2760_v19 = vpop.xlane.xlu1 %2759  ;;  %3209 = vmatprep.subr.bf16.mxu0 %v3064_v58  ;;  %v2966_v7 = vmul.f32 %v4308_v46, %v7385_v5  ;;  %v2965_v63 = vmul.f32 %v4308_v46, %v7386_v39  ;;  %v4310_v15 = vpop.eup %4309  ;;  %v7391_v45 = vld [vmem:[#allocation79_spill] sm:$0xff]  ;;  %v7393_v46 = vld [vmem:[#allocation78_spill] sm:$0xff] }
 0x57e   : > { %4319 = vrcp.f32 %v2760_v19  ;;  %3144 = vmatmul.mubr.bf16.vlgmr.msra.gmra.mrb[60].mxu0 %v3095_v1  ;;  %v2799_v47 = vpop.xlane.xlu0 %2798  ;;  %v2972_v2 = vmul.f32 %v4310_v15, %v7388_v42  ;;  %v2971_v33 = vmul.f32 %v4310_v15, %v7390_v35  ;;  %v3104_v1 = vld [vmem:[#allocation4 + $0x48] sm:$0xff]  ;;  %v7395_v15 = vld [vmem:[#allocation90_spill] sm:$0xff] }
 0x57f   : > { %3210 = vmatpush1.bf16.xpose.msra.mxu0 %v3063_v37  ;;  %v3062_v27 = vpack.c.bf16 %v2966_v7, %v2964_v59  ;;  %4321 = vrcp.f32 %v2799_v47  ;;  %v3061_v51 = vpack.c.bf16 %v2965_v63, %v2963_v56  ;;  %3151 = vmatprep.mubr.bf16.mxu0 %v3098_v22  ;;  %v7394_v22 = vld [vmem:[#allocation70_spill] sm:$0xff]  ;;  %v7396_v56 = vld [vmem:[#allocation69_spill] sm:$0xff] }
 0x580   : > { %v4312_v52 = vpop.eup %4311 }
 0x581   : > { %v2802_v10 = vpop.xlane.xlu1 %2801  ;;  %3174 = vmatprep.subr.bf16.mxu1 %v3062_v27  ;;  %v2974_v24 = vmul.f32 %v4312_v52, %v7389_v61  ;;  %v2973_v21 = vmul.f32 %v4312_v52, %v7391_v45  ;;  %v4314_v44 = vpop.eup %4313  ;;  %v7397_v27 = vld [vmem:[#allocation87_spill] sm:$0xff]  ;;  %v3102_v61 = vld [vmem:[#allocation4 + $0x38] sm:$0xff] }
 0x582   : > { %4323 = vrcp.f32 %v2802_v10  ;;  %v2763_v9 = vpop.xlane.xlu0 %2762  ;;  %v3000_v48 = vmul.f32 %v4314_v44, %v6442_v55  ;;  %v2999_v19 = vmul.f32 %v4314_v44, %v7393_v46  ;;  %v3099_v55 = vld [vmem:[#allocation4 + $0x20] sm:$0xff] }
 0x583   : > { %v3066_v41 = vpack.c.bf16 %v2974_v24, %v2972_v2  ;;  %v3065_v60 = vpack.c.bf16 %v2973_v21, %v2971_v33  ;;  %4325 = vrcp.f32 %v2763_v9  ;;  %v7398_v21 = vld [vmem:[#allocation103_spill] sm:$0xff] }
 0x584   : > { %v4316_v36 = vpop.eup %4315  ;;  %v7403_v46 = vld [vmem:[#allocation95_spill] sm:$0xff] }
 0x585   : > { %3175 = vmatpush1.bf16.xpose.msra.mxu1 %v3061_v51  ;;  %v2766_v62 = vpop.xlane.xlu1 %2765  ;;  %3211 = vmatprep.subr.bf16.mxu0 %v3066_v41  ;;  %v3002_v54 = vmul.f32 %v4316_v36, %v6449_v57  ;;  %v3001_v58 = vmul.f32 %v4316_v36, %v7392_v34  ;;  %v4318_v37 = vpop.eup %4317  ;;  %v7399_v41 = vld [vmem:[#allocation84_spill] sm:$0xff]  ;;  %v7400_v34 = vld [vmem:[#allocation77_spill] sm:$0xff] }
 0x586   : > { %4327 = vrcp.f32 %v2766_v62  ;;  %3152 = vmatmul.mubr.bf16.gmra.mrb[64].mxu0 %v3097_v3  ;;  %v2805_v59 = vpop.xlane.xlu0 %2804  ;;  %v2976_v57 = vmul.f32 %v4318_v37, %v7394_v22  ;;  %v2975_v47 = vmul.f32 %v4318_v37, %v7396_v56 }
 0x587   : > { %3212 = vmatpush1.bf16.xpose.msra.mxu0 %v3065_v60  ;;  %v3080_v5 = vpack.c.bf16 %v3002_v54, %v3000_v48  ;;  %4329 = vrcp.f32 %v2805_v59  ;;  %v3079_v39 = vpack.c.bf16 %v3001_v58, %v2999_v19  ;;  %3241 = vmatprep.mubr.bf16.mxu0 %v3104_v1  ;;  %v3101_v59 = vld [vmem:[#allocation4 + $0x30] sm:$0xff] }
 0x588   : > { %v4320_v7 = vpop.eup %4319 }
 0x589   : > { %v2808_v63 = vpop.xlane.xlu1 %2807  ;;  %3258 = vmatprep.subr.bf16.mxu1 %v3080_v5  ;;  %v2978_v38 = vmul.f32 %v4320_v7, %v7395_v15  ;;  %v2977_v52 = vmul.f32 %v4320_v7, %v7397_v27  ;;  %v4322_v51 = vpop.eup %4321  ;;  %v7404_v27 = vld [vmem:[#allocation105_spill] sm:$0xff] }
 0x58a   : > { %4331 = vrcp.f32 %v2808_v63  ;;  %v2769_v10 = vpop.xlane.xlu0 %2768  ;;  %v3004_v33 = vmul.f32 %v4322_v51, %v6472_v40  ;;  %v3003_v60 = vmul.f32 %v4322_v51, %v7399_v41  ;;  %v7401_v40 = vld [vmem:[#allocation83_spill] sm:$0xff] }
 0x58b   : > { %v3068_v42 = vpack.c.bf16 %v2978_v38, %v2976_v57  ;;  %v3067_v2 = vpack.c.bf16 %v2977_v52, %v2975_v47  ;;  %4333 = vrcp.f32 %v2769_v10 }
 0x58c   : > { %v4324_v24 = vpop.eup %4323  ;;  %3193 = vmatmul.mubr.bf16.vlgmr.msra.gmra.mrb[68].mxu1 %v3099_v55  ;;  %v3108_v55 = vld [vmem:[#allocation4 + $0x68] sm:$0xff] }
 0x58d   : > { %3259 = vmatpush1.bf16.xpose.msra.mxu1 %v3079_v39  ;;  %v2772_v35 = vpop.xlane.xlu1 %2771  ;;  %3213 = vmatprep.subr.bf16.mxu0 %v3068_v42  ;;  %v3006_v45 = vmul.f32 %v4324_v24, %v6484_v29  ;;  %v3005_v44 = vmul.f32 %v4324_v24, %v7398_v21  ;;  %v4326_v9 = vpop.eup %4325  ;;  %v7402_v29 = vld [vmem:[#allocation76_spill] sm:$0xff]  ;;  %v7405_v24 = vld [vmem:[#allocation98_spill] sm:$0xff] }
 0x58e   : > { %4335 = vrcp.f32 %v2772_v35  ;;  %3200 = vmatprep.mubr.bf16.mxu1 %v3102_v61  ;;  %v2811_v3 = vpop.xlane.xlu0 %2810  ;;  %v2980_v58 = vmul.f32 %v4326_v9, %v7400_v34  ;;  %v2979_v37 = vmul.f32 %v4326_v9, %v7402_v29 }
 0x58f   : > { %3214 = vmatpush1.bf16.xpose.msra.mxu0 %v3067_v2  ;;  %v3082_v36 = vpack.c.bf16 %v3006_v45, %v3004_v33  ;;  %4337 = vrcp.f32 %v2811_v3  ;;  %v3081_v48 = vpack.c.bf16 %v3005_v44, %v3003_v60 }
 0x590   : > { %v4328_v62 = vpop.eup %4327 }
 0x591   : > { %v2814_v54 = vpop.xlane.xlu1 %2813  ;;  %3260 = vmatprep.subr.bf16.mxu1 %v3082_v36  ;;  %v2982_v1 = vmul.f32 %v4328_v62, %v7401_v40  ;;  %v2981_v19 = vmul.f32 %v4328_v62, %v7403_v46  ;;  %v4330_v5 = vpop.eup %4329  ;;  %v7409_v62 = vld [vmem:[#allocation86_spill] sm:$0xff] }
 0x592   : > { %4339 = vrcp.f32 %v2814_v54  ;;  %v2775_v7 = vpop.xlane.xlu0 %2774  ;;  %v3008_v15 = vmul.f32 %v4330_v5, %v6506_v0  ;;  %v3007_v52 = vmul.f32 %v4330_v5, %v7404_v27  ;;  %v7406_v0 = vld [vmem:[#allocation104_spill] sm:$0xff]  ;;  %v7410_v40 = vld [vmem:[#allocation106_spill] sm:$0xff] }
 0x593   : > { %v3070_v39 = vpack.c.bf16 %v2982_v1, %v2980_v58  ;;  %v3069_v63 = vpack.c.bf16 %v2981_v19, %v2979_v37  ;;  %4341 = vrcp.f32 %v2775_v7 }
 0x594   : > { %v4332_v22 = vpop.eup %4331  ;;  %3201 = vmatmul.mubr.bf16.gmra.mrb[72].mxu1 %v3101_v59 }
 0x595   : > { %3261 = vmatpush1.bf16.xpose.msra.mxu1 %v3081_v48  ;;  %v2778_v57 = vpop.xlane.xlu1 %2777  ;;  %3215 = vmatprep.subr.bf16.mxu0 %v3070_v39  ;;  %v3010_v38 = vmul.f32 %v4332_v22, %v6516_v20  ;;  %v3009_v56 = vmul.f32 %v4332_v22, %v6510_v8  ;;  %v4334_v47 = vpop.eup %4333  ;;  %v7407_v20 = vld [vmem:[#allocation97_spill] sm:$0xff] }
 0x596   : > { %4343 = vrcp.f32 %v2778_v57  ;;  %3290 = vmatprep.mubr.bf16.mxu1 %v3108_v55  ;;  %v2817_v51 = vpop.xlane.xlu0 %2816  ;;  %v2984_v35 = vmul.f32 %v4334_v47, %v7405_v24  ;;  %v2983_v45 = vmul.f32 %v4334_v47, %v7407_v20  ;;  %v7408_v8 = vld [vmem:[#allocation85_spill] sm:$0xff]  ;;  %v7415_v20 = vld [vmem:[#allocation110_spill] sm:$0xff] }
 0x597   : > { %3216 = vmatpush1.bf16.xpose.msra.mxu0 %v3069_v63  ;;  %v3084_v10 = vpack.c.bf16 %v3010_v38, %v3008_v15  ;;  %4345 = vrcp.f32 %v2817_v51  ;;  %v3083_v2 = vpack.c.bf16 %v3009_v56, %v3007_v52 }
 0x598   : > { %v4336_v42 = vpop.eup %4335 }
 0x599   : > { %v2820_v61 = vpop.xlane.xlu1 %2819  ;;  %3262 = vmatprep.subr.bf16.mxu1 %v3084_v10  ;;  %v2986_v33 = vmul.f32 %v4336_v42, %v7406_v0  ;;  %v2985_v21 = vmul.f32 %v4336_v42, %v7408_v8  ;;  %v4338_v44 = vpop.eup %4337  ;;  %v7411_v10 = vld [vmem:[#allocation91_spill] sm:$0xff]  ;;  %v7414_v0 = vld [vmem:[#allocation93_spill] sm:$0xff] }
 0x59a   : > { %4347 = vrcp.f32 %v2820_v61  ;;  %v2781_v9 = vpop.xlane.xlu0 %2780  ;;  %v3012_v48 = vmul.f32 %v4338_v44, %v7409_v62  ;;  %v3011_v1 = vmul.f32 %v4338_v44, %v7410_v40  ;;  %v7419_v62 = vld [vmem:[#allocation108_spill] sm:$0xff] }
 0x59b   : > { %v3072_v41 = vpack.c.bf16 %v2986_v33, %v2984_v35  ;;  %v3071_v60 = vpack.c.bf16 %v2985_v21, %v2983_v45  ;;  %4349 = vrcp.f32 %v2781_v9 }
 0x59c   : > { %v4340_v3 = vpop.eup %4339 }
 0x59d   : > { %3263 = vmatpush1.bf16.xpose.msra.mxu1 %v3083_v2  ;;  %v2784_v36 = vpop.xlane.xlu1 %2783  ;;  %3217 = vmatprep.subr.bf16.mxu0 %v3072_v41  ;;  %v3014_v54 = vmul.f32 %v4340_v3, %v6546_v26  ;;  %v3013_v34 = vmul.f32 %v4340_v3, %v6538_v6  ;;  %v4342_v58 = vpop.eup %4341  ;;  %v7417_v41 = vld [vmem:[#allocation111_spill] sm:$0xff]  ;;  %v7418_v3 = vld [vmem:[#allocation94_spill] sm:$0xff] }
 0x59e   : > { %4351 = vrcp.f32 %v2784_v36  ;;  %v2823_v29 = vpop.xlane.xlu0 %2822  ;;  %v2988_v5 = vmul.f32 %v4342_v58, %v6500_v28  ;;  %v2987_v26 = vmul.f32 %v4342_v58, %v6498_v4 }
 0x59f   : > { %3218 = vmatpush1.bf16.xpose.msra.mxu0 %v3071_v60  ;;  %v3086_v37 = vpack.c.bf16 %v3014_v54, %v3012_v48  ;;  %4353 = vrcp.f32 %v2823_v29  ;;  %v3085_v19 = vpack.c.bf16 %v3013_v34, %v3011_v1  ;;  %v7420_v54 = vld [vmem:[#allocation112_spill] sm:$0xff]  ;;  %v3103_v1 = vld [vmem:[#allocation4 + $0x40] sm:$0xff]  ;;  %v3106_v29 = vld [vmem:[#allocation4 + $0x58] sm:$0xff] }
 0x5a0   : > { %v4344_v46 = vpop.eup %4343 }
 0x5a1   : > { %v2826_v59 = vpop.xlane.xlu1 %2825  ;;  %3264 = vmatprep.subr.bf16.mxu1 %v3086_v37  ;;  %v2990_v7 = vmul.f32 %v4344_v46, %v6528_v31  ;;  %v2989_v6 = vmul.f32 %v4344_v46, %v6522_v53  ;;  %v4346_v39 = vpop.eup %4345  ;;  %v3105_v37 = vld [vmem:[#allocation4 + $0x50] sm:$0xff] }
 0x5a2   : > { %4355 = vrcp.f32 %v2826_v59  ;;  %v2787_v63 = vpop.xlane.xlu0 %2786  ;;  %v3016_v38 = vmul.f32 %v4346_v39, %v6566_v12  ;;  %v3015_v4 = vmul.f32 %v4346_v39, %v6564_v14  ;;  %v7412_v12 = vld [vmem:[#allocation107_spill] sm:$0xff]  ;;  %v7413_v14 = vld [vmem:[#allocation109_spill] sm:$0xff] }
 0x5a3   : > { %v3074_v55 = vpack.c.bf16 %v2990_v7, %v2988_v5  ;;  %v3073_v22 = vpack.c.bf16 %v2989_v6, %v2987_v26  ;;  %4357 = vrcp.f32 %v2787_v63 }
 0x5a4   : > { %v4348_v57 = vpop.eup %4347 }
 0x5a5   : > { %3265 = vmatpush1.bf16.xpose.msra.mxu1 %v3085_v19  ;;  %v2790_v15 = vpop.xlane.xlu1 %2789  ;;  %3219 = vmatprep.subr.bf16.mxu0 %v3074_v55  ;;  %v3018_v28 = vmul.f32 %v4348_v57, %v6574_v16  ;;  %v3017_v31 = vmul.f32 %v4348_v57, %v6570_v18  ;;  %v4350_v56 = vpop.eup %4349 }
 0x5a6   : > { %4359 = vrcp.f32 %v2790_v15  ;;  %v2992_v52 = vmul.f32 %v4350_v56, %v6556_v30  ;;  %v2991_v42 = vmul.f32 %v4350_v56, %v7411_v10  ;;  %v7416_v30 = vld [vmem:[#allocation92_spill] sm:$0xff]  ;;  %v3107_v56 = vld [vmem:[#allocation4 + $0x60] sm:$0xff] }
 0x5a7   : > { %3220 = vmatpush1.bf16.xpose.msra.mxu0 %v3073_v22  ;;  %v3088_v53 = vpack.c.bf16 %v3018_v28, %v3016_v38  ;;  %v3087_v27 = vpack.c.bf16 %v3017_v31, %v3015_v4  ;;  %v3110_v4 = vld [vmem:[#allocation4 + $0x78] sm:$0xff] }
 0x5a8   : > { %v4352_v47 = vpop.eup %4351 }
 0x5a9   : > { %3266 = vmatprep.subr.bf16.mxu1 %v3088_v53  ;;  %v2994_v51 = vmul.f32 %v4352_v47, %v6578_v23  ;;  %v2993_v2 = vmul.f32 %v4352_v47, %v7412_v12  ;;  %v4354_v16 = vpop.eup %4353  ;;  %v3109_v53 = vld [vmem:[#allocation4 + $0x70] sm:$0xff] }
 0x5aa   : > { %v3020_v35 = vmul.f32 %v4354_v16, %v7413_v14  ;;  %v3019_v21 = vmul.f32 %v4354_v16, %v7416_v30  ;;  %v3321_v30 = vld [vmem:[#allocation11 + $0x10] sm:$0xff] }
 0x5ab   : > { %v3076_v61 = vpack.c.bf16 %v2994_v51, %v2992_v52  ;;  %v3075_v18 = vpack.c.bf16 %v2993_v2, %v2991_v42 }
 0x5ac   : > { %v4356_v24 = vpop.eup %4355 }
 0x5ad   : > { %3267 = vmatpush1.bf16.xpose.msra.mxu1 %v3087_v27  ;;  %3221 = vmatprep.subr.bf16.mxu0 %v3076_v61  ;;  %v3022_v33 = vmul.f32 %v4356_v24, %v7414_v0  ;;  %v3021_v45 = vmul.f32 %v4356_v24, %v7415_v20  ;;  %v4358_v8 = vpop.eup %4357  ;;  %v3983_v24 = vld [vmem:[#allocation10] sm:$0xff]  }
 0x5ae   : > { %v2996_v60 = vmul.f32 %v4358_v8, %v7417_v41  ;;  %v2995_v48 = vmul.f32 %v4358_v8, %v7419_v62  ;;  %v3319_v8 = vld [vmem:[#allocation11] sm:$0xff] }
 0x5af   : > { %3222 = vmatpush1.bf16.xpose.msra.mxu0 %v3075_v18  ;;  %v3090_v23 = vpack.c.bf16 %v3022_v33, %v3020_v35  ;;  %v3089_v9 = vpack.c.bf16 %v3021_v45, %v3019_v21  ;;  %v3320_v33 = vld [vmem:[#allocation11 + $0x8] sm:$0xff]  ;;  %3325 = vperm.xlu0 %3981, %v3319_v8   ;;  %v3322_v21 = vld [vmem:[#allocation11 + $0x18] sm:$0xff] }
 0x5b0   : > { %v4360_v44 = vpop.eup %4359  ;;  %3330 = vperm.xlu1 %3982, %v3320_v33  }
 0x5b1   : > { %3268 = vmatprep.subr.bf16.mxu1 %v3090_v23  ;;  %v2998_v36 = vmul.f32 %v4360_v44, %v7418_v3  ;;  %v2997_v34 = vmul.f32 %v4360_v44, %v7420_v54 }
 0x5b3   : > { %v3078_v58 = vpack.c.bf16 %v2998_v36, %v2996_v60  ;;  %v3077_v40 = vpack.c.bf16 %v2997_v34, %v2995_v48 }
 0x5b4   : > { %3335 = vperm.xlu1 %3982, %v3321_v30  }
 0x5b5   : > { %3269 = vmatpush1.bf16.xpose.msra.mxu1 %v3089_v9  ;;  %3223 = vmatprep.subr.bf16.mxu0 %v3078_v58 }
 0x5b7   : > { %3224 = vmatpush1.bf16.xpose.msra.mxu0 %v3077_v40 }
 0x5b8   : > { %3340 = vperm.xlu1 %3982, %v3322_v21  }
 0x5be   : > { %3242 = vmatmul.mubr.bf16.vlgmr.msra.gmra.mrb[68].mxu0 %v3103_v1 }
 0x5bf   : > { %3249 = vmatprep.mubr.bf16.mxu0 %v3106_v29 }
 0x5c6   : > { %3250 = vmatmul.mubr.bf16.gmra.mrb[72].mxu0 %v3105_v37 }
 0x5c7   : > { %3673 = vmatprep.mubr.bf16.mxu0 %v3983_v24 }
 0x5da   : > { %v2829_v46 = vpop.xlane.xlu0 %2828 }
 0x5db   : > { %4361 = vrcp.f32 %v2829_v46 }
 0x5dd   : > { %v2832_v19 = vpop.xlane.xlu1 %2831 }
 0x5de   : > { %4363 = vrcp.f32 %v2832_v19 }
 0x5e5   : > { %v4362_v59 = vpop.eup %4361 }
 0x5e6   : > { %v3024_v7 = vmul.f32 %v4362_v59, %v6634_v11  ;;  %v3023_v6 = vmul.f32 %v4362_v59, %v6632_v43 }
 0x5e8   : > { %v4364_v5 = vpop.eup %4363 }
 0x5e9   : > { %v3026_v26 = vmul.f32 %v4364_v5, %v6642_v13  ;;  %v3025_v39 = vmul.f32 %v4364_v5, %v6636_v17 }
 0x5ea   : > { %v2835_v63 = vpop.xlane.xlu0 %2834 }
 0x5eb   : > { %4365 = vrcp.f32 %v2835_v63  ;;  %v3092_v55 = vpack.c.bf16 %v3026_v26, %v3024_v7  ;;  %v3091_v22 = vpack.c.bf16 %v3025_v39, %v3023_v6  ;;  %v3984_v7 = vld [vmem:[#allocation10 + $0x8] sm:$0xff]  }
 0x5ed   : > { %v2838_v57 = vpop.xlane.xlu1 %2837  ;;  %3270 = vmatprep.subr.bf16.mxu1 %v3092_v55 }
 0x5ee   : > { %4367 = vrcp.f32 %v2838_v57  ;;  %3271 = vmatpush1.bf16.xpose.msra.mxu1 %v3091_v22 }
 0x5f5   : > { %v4366_v15 = vpop.eup %4365 }
 0x5f6   : > { %v3028_v28 = vmul.f32 %v4366_v15, %v6662_v25  ;;  %v3027_v13 = vmul.f32 %v4366_v15, %v6660_v32 }
 0x5f8   : > { %v4368_v38 = vpop.eup %4367 }
 0x5f9   : > { %v3030_v11 = vmul.f32 %v4368_v38, %v6668_v50  ;;  %v3029_v43 = vmul.f32 %v4368_v38, %v6664_v49 }
 0x5fb   : > { %v3094_v31 = vpack.c.bf16 %v3030_v11, %v3028_v28  ;;  %v3093_v17 = vpack.c.bf16 %v3029_v43, %v3027_v13 }
 0x5fd   : > { %3272 = vmatprep.subr.bf16.mxu1 %v3094_v31 }
 0x5fe   : > { %3273 = vmatpush1.bf16.xpose.msra.mxu1 %v3093_v17 }
 0x605   : > { %3291 = vmatmul.mubr.bf16.vlgmr.msra.gmra.mrb[76].mxu1 %v3107_v56 }
 0x606   : > { %3298 = vmatprep.mubr.bf16.mxu1 %v3110_v4 }
 0x60d   : > { %3299 = vmatmul.mubr.bf16.gmra.mrb[80].mxu1 %v3109_v53 }
 0x62e   : > { %v3326_v39 = vpop.permute.xlu0 %3325 }
 0x62f   : > { %v3331_v26 = vpop.permute.xlu1 %3330 }
 0x633   : > { %v3336_v6 = vpop.permute.xlu1 %3335 }
 0x637   : > { %v3341_v57 = vpop.permute.xlu1 %3340 }
 0x651   : > { %v3145_v47 = vpop.f32.mrb[60].mxu0 }
 0x652   : > { %v3147_v27 = vpop.f32.mrb[61].mxu0 }
 0x653   : > { %v3148_v52 = vpop.f32.mrb[62].mxu0 }
 0x654   : > { %v3307_v25 = vpack.c.bf16 %v3148_v52, %v3145_v47  ;;  %v3150_v51 = vpop.f32.mrb[63].mxu0 }
 0x656   : > { %3657 = vmatprep.subr.bf16.mxu0 %v3307_v25 }
 0x657   : > { %3658 = vmatpush3.bf16.msra.mxu0 %v3307_v25 }
 0x659   : > { %v3153_v32 = vpop.f32.mrb[64].mxu0 }
 0x65a   : > { %v3155_v50 = vpop.f32.mrb[65].mxu0 }
 0x65b   : > { %v3156_v49 = vpop.f32.mrb[66].mxu0 }
 0x65c   : > { %v3308_v10 = vpack.c.bf16 %v3156_v49, %v3153_v32  ;;  %v3158_v42 = vpop.f32.mrb[67].mxu0 }
 0x65e   : > { %3659 = vmatprep.subr.bf16.mxu0 %v3308_v10 }
 0x65f   : > { %v3194_v12 = vpop.f32.mrb[68].mxu1  ;;  %3660 = vmatpush3.bf16.msra.mxu0 %v3308_v10 }
 0x660   : > { %v3196_v2 = vpop.f32.mrb[69].mxu1 }
 0x661   : > { %v3197_v16 = vpop.f32.mrb[70].mxu1 }
 0x662   : > { %v3309_v61 = vpack.c.bf16 %v3197_v16, %v3194_v12  ;;  %v3199_v18 = vpop.f32.mrb[71].mxu1 }
 0x664   : > { %3661 = vmatprep.subr.bf16.mxu0 %v3309_v61 }
 0x665   : > { %3662 = vmatpush3.bf16.msra.mxu0 %v3309_v61 }
 0x667   : > { %v3202_v14 = vpop.f32.mrb[72].mxu1 }
 0x668   : > { %v3204_v35 = vpop.f32.mrb[73].mxu1 }
 0x669   : > { %v3205_v0 = vpop.f32.mrb[74].mxu1 }
 0x66a   : > { %v3310_v20 = vpack.c.bf16 %v3205_v0, %v3202_v14  ;;  %v3207_v45 = vpop.f32.mrb[75].mxu1 }
 0x66c   : > { %3663 = vmatprep.subr.bf16.mxu0 %v3310_v20 }
 0x66d   : > { %3664 = vmatpush3.bf16.msra.mxu0 %v3310_v20 }
 0x691   : > { %v3243_v23 = vpop.f32.mrb[68].mxu0 }
 0x692   : > { %v3245_v44 = vpop.f32.mrb[69].mxu0 }
 0x693   : > { %v3246_v9 = vpop.f32.mrb[70].mxu0 }
 0x694   : > { %v3311_v41 = vpack.c.bf16 %v3246_v9, %v3243_v23  ;;  %v3248_v60 = vpop.f32.mrb[71].mxu0 }
 0x696   : > { %3665 = vmatprep.subr.bf16.mxu0 %v3311_v41 }
 0x697   : > { %3666 = vmatpush3.bf16.msra.mxu0 %v3311_v41 }
 0x699   : > { %v3251_v3 = vpop.f32.mrb[72].mxu0 }
 0x69a   : > { %v3253_v36 = vpop.f32.mrb[73].mxu0 }
 0x69b   : > { %v3254_v62 = vpop.f32.mrb[74].mxu0 }
 0x69c   : > { %v3312_v48 = vpack.c.bf16 %v3254_v62, %v3251_v3  ;;  %v3256_v54 = vpop.f32.mrb[75].mxu0 }
 0x69e   : > { %3667 = vmatprep.subr.bf16.mxu0 %v3312_v48 }
 0x69f   : > { %3668 = vmatpush3.bf16.msra.mxu0 %v3312_v48 }
 0x6d8   : > { %v3292_v34 = vpop.f32.mrb[76].mxu1 }
 0x6d9   : > { %v3294_v58 = vpop.f32.mrb[77].mxu1 }
 0x6da   : > { %v3295_v40 = vpop.f32.mrb[78].mxu1 }
 0x6db   : > { %v3313_v1 = vpack.c.bf16 %v3295_v40, %v3292_v34  ;;  %v3297_v29 = vpop.f32.mrb[79].mxu1 }
 0x6dd   : > { %3669 = vmatprep.subr.bf16.mxu0 %v3313_v1 }
 0x6de   : > { %3670 = vmatpush3.bf16.msra.mxu0 %v3313_v1 }
 0x6e0   : > { %v3300_v37 = vpop.f32.mrb[80].mxu1 }
 0x6e1   : > { %v3302_v46 = vpop.f32.mrb[81].mxu1 }
 0x6e2   : > { %v3303_v19 = vpop.f32.mrb[82].mxu1 }
 0x6e3   : > { %v3314_v59 = vpack.c.bf16 %v3303_v19, %v3300_v37  ;;  %v3305_v5 = vpop.f32.mrb[83].mxu1 }
 0x6e5   : > { %3671 = vmatprep.subr.bf16.mxu0 %v3314_v59 }
 0x6e6   : > { %3672 = vmatpush3.bf16.msra.mxu0 %v3314_v59 }
 0x6e9   : > { %3674 = vmatmul.mubr.bf16.vlgmr.msra.gmra.mrb[76].mxu0 %v3984_v7 }
 0x7bc   : > { %v3675_v63 = vpop.f32.mrb[76].mxu0 }
 0x7bd   : > { %v3398_v55 = vadd.f32 %v3675_v63, %v3336_v6  ;;  %v3389_v22 = vpop.f32.mrb[77].mxu0 }
 0x7be   : > { %v3390_v15 = vadd.f32 %v3389_v22, %v3326_v39  ;;  %v3676_v38 = vpop.f32.mrb[78].mxu0 }
 0x7bf   : > { %3406 = vst [vmem:[%s4917_s26 + $0x10] sm:$0xff] %v3398_v55  ;;  %v3401_v28 = vadd.f32 %v3676_v38, %v3341_v57  ;;  %v3392_v11 = vpop.f32.mrb[79].mxu0 }
 0x7c0   : > { %3404 = vst [vmem:[%s4917_s26] sm:$0xff] %v3390_v15  ;;  %v3393_v13 = vadd.f32 %v3392_v11, %v3331_v26 }
 0x7c1   : > { %3407 = vst [vmem:[%s4917_s26 + $0x18] sm:$0xff] %v3401_v28 }
 0x7c2   : > { %3405 = vst [vmem:[%s4917_s26 + $0x8] sm:$0xff] %v3393_v13 }
 0x7c3   : > { %4496 = shalt.err (!%p4493_p4)
}
 0x7c4   : > { %s4497_s2 = scalar_lea.hbm %s6777_s11, 512  ;;  %s4501_s5 = scalar_lea.hbm %s7423_s14, 2048 }
 0x7c5   : > { %p4498_p7 = scmp.ne.s32.totalorder %s6777_s11, %s4497_s2  ;;  %p4502_p1 = scmp.lt.u32.totalorder %s6777_s11, %s7423_s14 }
 0x7c6   : > { %p4503_p11 = scmp.lt.u32.totalorder %s4501_s5, %s4497_s2  ;;  %p4505_p2 = scmp.lt.u32.totalorder %s4497_s2, %s6777_s11 }
 0x7c7   : > { %p4499_p3 = pnand %p4498_p7, %p7424_p9 }
 0x7c8   : > { %p4504_p10 = por %p4503_p11, %p4502_p1 }
 0x7c9   : > { %p4500_p0 = pneg %p4499_p3 }
 0x7ca   : > { %p4506_p5 = por %p4505_p2, %p4504_p10 }
 0x7cc   : > { %p4507_p13 = pnand %p4506_p5, %p4500_p0 }
 0x7ce   : > { %4510 = shalt.err (!%p4507_p13)
}
 0x7cf   : > { %s4628_s8 = smov 128   ;;  %s4629_s21 = smov 256  }
 0x7d0   : > { %s4630_s27 = smov 8  }
 0x7d1   : > { %3699 = dma.vmem_to_hbm [thread:$0]  (%p7424_p9), %s6771_s18, 512, %s6777_s11, %s6784_s13, %s4628_s8, %s4629_s21, %s4630_s27  }
 0x7d2 PF: > { %s7425_s7 = sld [smem:[#allocation18_spill]]  ;;  %s7426_s28 = sld [smem:[#allocation21_spill]] }
 0x7d3   : > { %p3726_p6 = scmp.ge.s32.totalorder %s4613_s25, 2 }
 0x7d8   : > { %s3438_s30 = sand.u32 1, %s7425_s7   ;;  %p7427_p8 = scmp.ne.s32.totalorder %s7426_s28, 0 }
 0x7d9   : > { %s3439_s22 = scalar_lea.sflag [#allocation7], %s3438_s30 }
 0x7da   : > { %p3716_p12 = pnand %p3726_p6, %p7427_p8 }
 0x7dc   : > { %4568 = dma.done.wait (!%p3716_p12), %s3439_s22, 512  }
 0x7dd   : > { %4570 = vsyncadd (!%p3716_p12), %s3439_s22, 4294966784  ;;  %s22_s25 = sadd.s32 1, %s4613_s25   ;;  %s7428_s1 = smov %s7444_s15 }
 0x7de   : > { %p19_p4 = scmp.ge.s32.totalorder %s22_s25, 6   ;;  %s7429_s15 = smov %s4577_s16 }
 0x7df   : > { %s7430_s16 = smov %s4581_s17  ;;  %s7431_s17 = smov %s4854_s12 }
 0x7e0   : > { %s7432_s18 = smov %s4589_s19  ;;  %s7433_s19 = smov %s4593_s20 }
 0x7e1   : > { %s7434_s20 = smov %s4849_s29  ;;  %s7435_s21 = smov %s4605_s23 }
 0x7e2   : > { %s7436_s22 = smov %s4609_s24  ;;  %s7437_s23 = smov %s7440_s4 }
 0x7e3   : > { %s7438_s24 = smov %s7428_s1  ;;  %21 = sbr.rel (!%p19_p4) target bundleno = 15 (0xf), region = 98 }
 0x7ea   :  { %3444 = vsyncpa [#allocation6], 1 }
 0x7eb   :  { %3446 = vsyncpa [#allocation6 + $0x1], 1 }
 0x7ec   :  { %3447 = vsyncpa [#allocation9], 1 }
 0x7ed   :  { %3448 = vsyncpa [#allocation12], 1 }
 0x7ee   :  { %3449 = vsyncpa [#allocation7], 1 }
 0x7ef   :  { %3451 = vsyncpa [#allocation7 + $0x1], 1 }

</bundles_post_ra>
